<compile_context>
chip_gen: v5e
topology: v5e:2x2
jax: 0.10.0
libtpu: 0.0.40
codegen_flags: <defaults>
</compile_context>

<pallas_src>
import numpy as np
import jax
import jax.numpy as jnp
from jax.experimental import pallas as pl
from jax.experimental.pallas import tpu as pltpu

NUM_JOINTS = 16
NUM_BONES = 15
PSI_DIM = NUM_BONES * NUM_BONES           # 225
PSI_PAD = 256                             # 225 zero-padded to a lane multiple
KCS_CHANNEL = 256
CHANNEL_MID = 100
MID_PAD = 128                             # 100 zero-padded to a lane multiple
OUT_PAD = 128                             # lane-dense output slab; scores in lanes 0..4
LEAKY_SLOPE = 0.01                        # torch.nn.LeakyReLU default

# bone b connects parent _BONE_PARENTS[b] -> child (b + 1)
_BONE_PARENTS = [0, 1, 2, 0, 4, 5, 0, 7, 8, 8, 10, 11, 8, 13, 14]

_MASK_IDX = {
    "lh": [7, 9, 10, 11],
    "rh": [7, 12, 13, 14],
    "ll": [0, 1, 2, 3, 6],
    "rl": [0, 3, 4, 5, 6],
    "hb": [0, 3, 6, 7, 8, 9, 12],
}
# output column order must match torch.cat([k_lh, k_rh, k_ll, k_rl, k_hb], dim=1)
_PATH_ORDER = ("lh", "rh", "ll", "rl", "hb")
NUM_PATHS = len(_PATH_ORDER)
H1_ALL = NUM_PATHS * KCS_CHANNEL          # 1280 (fused layer-1 output width)
H4_ALL = NUM_PATHS * MID_PAD              # 640  (stacked head input width)


def _bone_matrix():
    # C: (15, 16) ; bv = C @ joints  (bv[b] = joint[child_b] - joint[parent_b])
    C = np.zeros((NUM_BONES, NUM_JOINTS), np.float32)
    for b, p in enumerate(_BONE_PARENTS):
        C[b, p] = -1.0
        C[b, b + 1] = 1.0
    return C


def _pose_from_bone_matrix():
    # A: (16, 15) ; pose = A @ bones (root at origin, cumulative bone path). Note C @ A = I.
    A = np.zeros((NUM_JOINTS, NUM_BONES), np.float32)
    for j in range(1, NUM_JOINTS):
        A[j] = A[_BONE_PARENTS[j - 1]]
        A[j, j - 1] = 1.0
    return A


def _outer_masks():
    # Masking the bone Gram Psi with bone-mask m is a diagonal 0/1 scaling of the 225
    # flattened features: psi_masked[15*i+j] = m[i]*m[j]*psi_full[...], so
    # psi_masked @ W1 == psi_full @ (row-masked W1) exactly.  Precompute m_i*m_j.
    m = np.zeros((NUM_PATHS, NUM_BONES), np.float32)
    for p, name in enumerate(_PATH_ORDER):
        m[p, _MASK_IDX[name]] = 1.0
    return (m[:, :, None] * m[:, None, :]).reshape(NUM_PATHS, PSI_DIM)   # (5, 225)


C_MAT = jnp.asarray(_bone_matrix())
A_MAT = jnp.asarray(_pose_from_bone_matrix())
OUTER_MASKS = jnp.asarray(_outer_masks())


def _round_up(n, m):
    return ((n + m - 1) // m) * m


# ----------------------------- Pallas kernel -------------------------------

def _leaky(x):
    return jnp.where(x > 0, x, LEAKY_SLOPE * x)


def kcs_paths_kernel(psi_ref, w1_ref, b1_ref, w2_ref, b2_ref, w3_ref, b3_ref,
                     w4_ref, b4_ref, w5_ref, b5_ref, out_ref):
    # psi_ref: (TB, 256) bf16      shared un-masked gram (bone masks folded into w1)
    # w1: (256, 1280) bf16         five row-masked + padded W1 blocks concat on the out dim
    # b1: (1, 1280) f32
    # w2, w3: (5, 256, 256) bf16 ; b2, b3: (5, 256) f32
    # w4: (5, 256, 128) bf16 ; b4: (5, 128) f32 (lanes 100..127 zero)
    # w5: (640, 128) bf16          block p (rows 128p..128p+127) non-zero only in column p
    # b5: (1, 128) f32             path biases in lanes 0..4
    # out_ref: (TB, 128) f32       lanes 0..4 hold [lh, rh, ll, rl, hb]
    x = psi_ref[...]                                                      # (TB, 256) bf16

    # Layer 1, fused across all 5 paths: one weight-stationary MXU pass.
    h1_all = _leaky(jnp.dot(x, w1_ref[...], preferred_element_type=jnp.float32)
                    + b1_ref[...])                                        # (TB, 1280) f32

    h4_parts = []
    for p in range(NUM_PATHS):                            # static unroll over the 5 paths
        h1 = h1_all[:, p * KCS_CHANNEL:(p + 1) * KCS_CHANNEL]   # lane-aligned static slice
        h2 = _leaky(jnp.dot(h1.astype(jnp.bfloat16), w2_ref[p],
                            preferred_element_type=jnp.float32)
                    + b2_ref[pl.ds(p, 1), :])                             # (TB, 256)
        # residual, NO activation before or after the add (matches the torch KCSpath)
        h3 = (jnp.dot(h2.astype(jnp.bfloat16), w3_ref[p],
                      preferred_element_type=jnp.float32)
              + b3_ref[pl.ds(p, 1), :]) + h1                              # (TB, 256)
        h4 = _leaky(jnp.dot(h3.astype(jnp.bfloat16), w4_ref[p],
                            preferred_element_type=jnp.float32)
                    + b4_ref[pl.ds(p, 1), :])                             # (TB, 128)
        h4_parts.append(h4.astype(jnp.bfloat16))

    # Single stacked final head: (TB, 640) @ (640, 128); block p lands in output lane p.
    h4_all = jnp.concatenate(h4_parts, axis=1)                            # (TB, 640) bf16
    out_ref[...] = (jnp.dot(h4_all, w5_ref[...], preferred_element_type=jnp.float32)
                    + b5_ref[...])                                        # lane-dense store


def _choose_batch_tiling(b, tb_max=512, min_steps=2):
    # Balanced batch tiles: grid = cdiv(B, tb_max), tb = round_up(cdiv(B, grid), 8)
    # (caps padding at <8 rows/step), and >=2 steps whenever B > 8 so the "parallel"
    # batch axis can be sharded across v7x's two TensorCores.
    b = max(int(b), 1)
    steps = pl.cdiv(b, tb_max)
    if b > 8:
        steps = max(steps, min_steps)
    tb = _round_up(pl.cdiv(b, steps), 8)
    return tb, steps


def run_kcs_paths(psi, kparams, *, tb_max=512):
    # psi: (B, 256) bf16 ; kparams: 11 stacked kernel-ready parameter arrays.
    b = psi.shape[0]
    tb, steps = _choose_batch_tiling(b, tb_max=tb_max)
    bp = tb * steps
    psi_p = jnp.pad(psi, ((0, bp - b), (0, 0)))                    # stays bf16

    param_specs = [pl.BlockSpec(p.shape, lambda i, nd=p.ndim: (0,) * nd)   # VMEM-resident
                   for p in kparams]
    out = pl.pallas_call(
        kcs_paths_kernel,
        out_shape=jax.ShapeDtypeStruct((bp, OUT_PAD), jnp.float32),
        grid=(steps,),
        in_specs=[pl.BlockSpec((tb, PSI_PAD), lambda i: (i, 0))] + param_specs,
        out_specs=pl.BlockSpec((tb, OUT_PAD), lambda i: (i, 0)),
        compiler_params=pltpu.CompilerParams(
            dimension_semantics=("parallel",),            # shards batch across v7x's 2 TCs
            vmem_limit_bytes=32 * 1024 * 1024),
    )(psi_p, *kparams)
    return out[:b, :NUM_PATHS]                            # (B, 5)


# ------------------------------ JAX glue ------------------------------------

def _canonicalize(inputs_3d):
    # torch's .squeeze(), but never drop the batch axis (handles B == 1 safely).
    axes = tuple(i for i in range(1, inputs_3d.ndim) if inputs_3d.shape[i] == 1)
    x = jnp.squeeze(inputs_3d, axis=axes) if axes else inputs_3d
    assert x.ndim == 3 and x.shape[-2:] == (NUM_JOINTS, 3), x.shape
    return x                                              # (B, 16, 3)


def _preprocess(inputs_3d):
    # Collapsed preprocessing: root-centering does not change bone differences, and the
    # bones of get_pose3dbyBoneVec(get_bone_unit_vecbypose3d(x)) equal the unit bones
    # exactly (C @ A == identity), so Psi is just the Gram of the unit bones of x.
    x = _canonicalize(inputs_3d)
    bv = jnp.einsum('bj,njc->nbc', C_MAT, x)               # (B, 15, 3)
    n = jnp.linalg.norm(bv, axis=-1, keepdims=True)
    bvu = bv / jnp.where(n > 0, n, 1.0)                    # guard zero-length bones
    psi = jnp.einsum('nbc,ndc->nbd', bvu, bvu).reshape(x.shape[0], PSI_DIM)
    psi = jnp.pad(psi, ((0, 0), (0, PSI_PAD - PSI_DIM)))   # (B, 256)
    return psi.astype(jnp.bfloat16)                        # bf16 input -> half the psi DMA


@jax.jit
def forward(inputs_3d, kernel_params):
    return run_kcs_paths(_preprocess(inputs_3d), kernel_params)


# ------------------------------ parameters ----------------------------------

def init_raw_params(key):
    """Stacked-over-paths float32 params in (in, out) layout, PyTorch-Linear-like init."""
    shapes = [
        (PSI_DIM, KCS_CHANNEL), (KCS_CHANNEL,),
        (KCS_CHANNEL, KCS_CHANNEL), (KCS_CHANNEL,),
        (KCS_CHANNEL, KCS_CHANNEL), (KCS_CHANNEL,),
        (KCS_CHANNEL, CHANNEL_MID), (CHANNEL_MID,),
        (CHANNEL_MID, 1), (1,),
    ]
    fan_ins = [PSI_DIM, PSI_DIM, KCS_CHANNEL, KCS_CHANNEL, KCS_CHANNEL, KCS_CHANNEL,
               KCS_CHANNEL, KCS_CHANNEL, CHANNEL_MID, CHANNEL_MID]
    keys = jax.random.split(key, NUM_PATHS * len(shapes))
    params, ki = [], 0
    for si, shp in enumerate(shapes):
        bound = 1.0 / np.sqrt(fan_ins[si])
        stack = jnp.stack([jax.random.uniform(keys[ki + p], shp, jnp.float32, -bound, bound)
                           for p in range(NUM_PATHS)], axis=0)
        ki += NUM_PATHS
        params.append(stack)
    return tuple(params)


def prepare_kernel_params(raw):
    """Fold masks into W1, fuse layer-1 and the final heads across paths, pad, cast bf16."""
    w1, b1, w2, b2, w3, b3, w4, b4, w5, b5 = raw
    # --- fused layer 1: row-masked + input-padded W1 blocks concat along the output dim
    w1m = w1 * OUTER_MASKS[:, :, None]                                    # (5, 225, 256)
    w1m = jnp.pad(w1m, ((0, 0), (0, PSI_PAD - PSI_DIM), (0, 0)))          # (5, 256, 256)
    w1_all = jnp.transpose(w1m, (1, 0, 2)).reshape(PSI_PAD, H1_ALL)       # (256, 1280)
    b1_all = b1.reshape(1, H1_ALL)                                        # (1, 1280)
    # --- layer 4 padded to 128 lanes
    w4p = jnp.pad(w4, ((0, 0), (0, 0), (0, MID_PAD - CHANNEL_MID)))       # (5, 256, 128)
    b4p = jnp.pad(b4, ((0, 0), (0, MID_PAD - CHANNEL_MID)))               # (5, 128)
    # --- five 100->1 heads stacked into one (640, 128) matrix; block p hits output lane p
    w5p = jnp.pad(w5, ((0, 0), (0, MID_PAD - CHANNEL_MID), (0, 0)))[..., 0]   # (5, 128)
    lane_onehot = jnp.eye(NUM_PATHS, OUT_PAD, dtype=jnp.float32)              # (5, 128)
    w5_all = (w5p[:, :, None] * lane_onehot[:, None, :]).reshape(H4_ALL, OUT_PAD)
    b5_row = jnp.zeros((1, OUT_PAD), jnp.float32).at[0, :NUM_PATHS].set(b5[:, 0])
    bf = lambda a: a.astype(jnp.bfloat16)
    return (bf(w1_all), b1_all, bf(w2), b2, bf(w3), b3, bf(w4p), b4p, bf(w5_all), b5_row)


# --------------------------- pure-JAX reference ------------------------------

def reference_forward(inputs_3d, raw):
    """Float32 re-implementation of the PyTorch forward (full pose-reconstruction path)."""
    w1, b1, w2, b2, w3, b3, w4, b4, w5, b5 = raw
    x = _canonicalize(inputs_3d)
    x = x - x[:, :1, :]
    bv = jnp.einsum('bj,njc->nbc', C_MAT, x)
    n = jnp.linalg.norm(bv, axis=-1, keepdims=True)
    bv_unit = bv / jnp.where(n > 0, n, 1.0)
    pose = jnp.einsum('jb,nbc->njc', A_MAT, bv_unit)       # get_pose3dbyBoneVec
    bvp = jnp.einsum('bj,njc->nbc', C_MAT, pose)           # bones of reconstructed pose

    def leaky(v):
        return jnp.where(v > 0, v, LEAKY_SLOPE * v)

    cols = []
    for p, name in enumerate(_PATH_ORDER):
        m = np.zeros((NUM_BONES,), np.float32)
        m[_MASK_IDX[name]] = 1.0
        bvm = bvp * jnp.asarray(m)[None, :, None]
        psi = jnp.einsum('nbc,ndc->nbd', bvm, bvm).reshape(x.shape[0], PSI_DIM)
        h1 = leaky(psi @ w1[p] + b1[p])
        h2 = leaky(h1 @ w2[p] + b2[p])
        h3 = h2 @ w3[p] + b3[p] + h1            # residual, no activation (matches torch)
        h4 = leaky(h3 @ w4[p] + b4[p])
        cols.append(h4 @ w5[p] + b5[p])
    return jnp.concatenate(cols, axis=1)        # (B, 5)


if __name__ == "__main__":
    key = jax.random.PRNGKey(0)
    k_in, k_par, k_in2 = jax.random.split(key, 3)

    raw = init_raw_params(k_par)
    kparams = prepare_kernel_params(raw)

    # small batch (single grid step, padded to 8 rows inside)
    B = 6
    inputs_3d = jax.random.normal(k_in, (B, 1, NUM_JOINTS, 3), jnp.float32)
    out = jax.block_until_ready(forward(inputs_3d, kparams))
    assert out.shape == (B, NUM_PATHS) and out.dtype == jnp.float32
    assert bool(jnp.all(jnp.isfinite(out)))
    ref = reference_forward(inputs_3d, raw)
    # bf16 weights + bf16 activations + bf16 psi on the MXU -> loose f32 tolerance
    tol = 3e-2 * (1.0 + float(jnp.max(jnp.abs(ref))))
    assert float(jnp.max(jnp.abs(out - ref))) < tol

    # slightly larger batch: exercises the 2-step grid (v7x 2-TC path) + tile padding
    B2 = 22
    inputs_3d2 = jax.random.normal(k_in2, (B2, 1, NUM_JOINTS, 3), jnp.float32)
    out2 = jax.block_until_ready(forward(inputs_3d2, kparams))
    ref2 = reference_forward(inputs_3d2, raw)
    assert out2.shape == (B2, NUM_PATHS)
    tol2 = 3e-2 * (1.0 + float(jnp.max(jnp.abs(ref2))))
    assert float(jnp.max(jnp.abs(out2 - ref2))) < tol2

    print("KERNEL_OK")
</pallas_src>

<mosaic_0001>
module attributes {stable_mosaic.version = 11 : i64} {
  func.func @kcs_paths_kernel(%arg0: i32, %arg1: memref<8x256xbf16, #tpu.memory_space<vmem>>, %arg2: memref<256x1280xbf16, #tpu.memory_space<vmem>>, %arg3: memref<1x1280xf32, #tpu.memory_space<vmem>>, %arg4: memref<5x256x256xbf16, #tpu.memory_space<vmem>>, %arg5: memref<5x256xf32, #tpu.memory_space<vmem>>, %arg6: memref<5x256x256xbf16, #tpu.memory_space<vmem>>, %arg7: memref<5x256xf32, #tpu.memory_space<vmem>>, %arg8: memref<5x256x128xbf16, #tpu.memory_space<vmem>>, %arg9: memref<5x128xf32, #tpu.memory_space<vmem>>, %arg10: memref<640x128xbf16, #tpu.memory_space<vmem>>, %arg11: memref<1x128xf32, #tpu.memory_space<vmem>>, %arg12: memref<8x128xf32, #tpu.memory_space<vmem>>) attributes {dimension_semantics = [#tpu.dimension_semantics<parallel>], iteration_bounds = array<i64: 1>, scalar_prefetch = 0 : i64, scratch_operands = 0 : i64, tpu.core_type = #tpu.core_type<tc>, window_params = [{transform_indices = @transform_0, window_bounds = array<i64: 8, 256>}, {pipeline_mode = #tpu.pipeline_mode<synchronous>, transform_indices = @transform_1, window_bounds = array<i64: 256, 1280>}, {pipeline_mode = #tpu.pipeline_mode<synchronous>, transform_indices = @transform_2, window_bounds = array<i64: 1, 1280>}, {pipeline_mode = #tpu.pipeline_mode<synchronous>, transform_indices = @transform_3, window_bounds = array<i64: 5, 256, 256>}, {pipeline_mode = #tpu.pipeline_mode<synchronous>, transform_indices = @transform_4, window_bounds = array<i64: 5, 256>}, {pipeline_mode = #tpu.pipeline_mode<synchronous>, transform_indices = @transform_5, window_bounds = array<i64: 5, 256, 256>}, {pipeline_mode = #tpu.pipeline_mode<synchronous>, transform_indices = @transform_6, window_bounds = array<i64: 5, 256>}, {pipeline_mode = #tpu.pipeline_mode<synchronous>, transform_indices = @transform_7, window_bounds = array<i64: 5, 256, 128>}, {pipeline_mode = #tpu.pipeline_mode<synchronous>, transform_indices = @transform_8, window_bounds = array<i64: 5, 128>}, {pipeline_mode = #tpu.pipeline_mode<synchronous>, transform_indices = @transform_9, window_bounds = array<i64: 640, 128>}, {pipeline_mode = #tpu.pipeline_mode<synchronous>, transform_indices = @transform_10, window_bounds = array<i64: 1, 128>}, {transform_indices = @transform_11, window_bounds = array<i64: 8, 128>}]} {
    %c0 = arith.constant 0 : index
    %c0_0 = arith.constant 0 : index
    %0 = vector.load %arg1[%c0, %c0_0] : memref<8x256xbf16, #tpu.memory_space<vmem>>, vector<8x256xbf16>
    %c0_1 = arith.constant 0 : index
    %c0_2 = arith.constant 0 : index
    %1 = vector.load %arg2[%c0_1, %c0_2] : memref<256x1280xbf16, #tpu.memory_space<vmem>>, vector<256x1280xbf16>
    %cst = arith.constant dense<0.000000e+00> : vector<8x1280xf32>
    %2 = tpu.matmul %0, %1, %cst {dimension_numbers = #tpu.dot_dimension_numbers<[1], [0], [0], [1], [0, 0, 1, 1], [], []>} : vector<8x256xbf16>, vector<256x1280xbf16>, vector<8x1280xf32> -> vector<8x1280xf32>
    %c0_3 = arith.constant 0 : index
    %c0_4 = arith.constant 0 : index
    %3 = vector.load %arg3[%c0_3, %c0_4] : memref<1x1280xf32, #tpu.memory_space<vmem>>, vector<1x1280xf32>
    %4 = vector.broadcast %3 : vector<1x1280xf32> to vector<8x1280xf32>
    %5 = arith.addf %2, %4 : vector<8x1280xf32>
    %cst_5 = arith.constant 0.000000e+00 : f32
    %6 = vector.broadcast %cst_5 : f32 to vector<8x1280xf32>
    %7 = arith.cmpf ogt, %5, %6 : vector<8x1280xf32>
    %cst_6 = arith.constant 0.00999999977 : f32
    %8 = vector.broadcast %cst_6 : f32 to vector<8x1280xf32>
    %9 = arith.mulf %8, %5 : vector<8x1280xf32>
    %10 = arith.select %7, %5, %9 : vector<8x1280xi1>, vector<8x1280xf32>
    %11 = vector.extract_strided_slice %10 {offsets = [0, 0], sizes = [8, 256], strides = [1, 1]} : vector<8x1280xf32> to vector<8x256xf32>
    %12 = arith.truncf %11 : vector<8x256xf32> to vector<8x256xbf16>
    %c0_7 = arith.constant 0 : index
    %c0_8 = arith.constant 0 : index
    %c0_9 = arith.constant 0 : index
    %13 = vector.load %arg4[%c0_7, %c0_8, %c0_9] : memref<5x256x256xbf16, #tpu.memory_space<vmem>>, vector<1x256x256xbf16>
    %14 = vector.shape_cast %13 : vector<1x256x256xbf16> to vector<256x256xbf16>
    %cst_10 = arith.constant dense<0.000000e+00> : vector<8x256xf32>
    %15 = tpu.matmul %12, %14, %cst_10 {dimension_numbers = #tpu.dot_dimension_numbers<[1], [0], [0], [1], [0, 0, 1, 1], [], []>} : vector<8x256xbf16>, vector<256x256xbf16>, vector<8x256xf32> -> vector<8x256xf32>
    %c0_11 = arith.constant 0 : index
    %c0_12 = arith.constant 0 : index
    %16 = vector.load %arg5[%c0_11, %c0_12] : memref<5x256xf32, #tpu.memory_space<vmem>>, vector<1x256xf32>
    %17 = vector.broadcast %16 : vector<1x256xf32> to vector<8x256xf32>
    %18 = arith.addf %15, %17 : vector<8x256xf32>
    %cst_13 = arith.constant 0.000000e+00 : f32
    %19 = vector.broadcast %cst_13 : f32 to vector<8x256xf32>
    %20 = arith.cmpf ogt, %18, %19 : vector<8x256xf32>
    %cst_14 = arith.constant 0.00999999977 : f32
    %21 = vector.broadcast %cst_14 : f32 to vector<8x256xf32>
    %22 = arith.mulf %21, %18 : vector<8x256xf32>
    %23 = arith.select %20, %18, %22 : vector<8x256xi1>, vector<8x256xf32>
    %24 = arith.truncf %23 : vector<8x256xf32> to vector<8x256xbf16>
    %c0_15 = arith.constant 0 : index
    %c0_16 = arith.constant 0 : index
    %c0_17 = arith.constant 0 : index
    %25 = vector.load %arg6[%c0_15, %c0_16, %c0_17] : memref<5x256x256xbf16, #tpu.memory_space<vmem>>, vector<1x256x256xbf16>
    %26 = vector.shape_cast %25 : vector<1x256x256xbf16> to vector<256x256xbf16>
    %cst_18 = arith.constant dense<0.000000e+00> : vector<8x256xf32>
    %27 = tpu.matmul %24, %26, %cst_18 {dimension_numbers = #tpu.dot_dimension_numbers<[1], [0], [0], [1], [0, 0, 1, 1], [], []>} : vector<8x256xbf16>, vector<256x256xbf16>, vector<8x256xf32> -> vector<8x256xf32>
    %c0_19 = arith.constant 0 : index
    %c0_20 = arith.constant 0 : index
    %28 = vector.load %arg7[%c0_19, %c0_20] : memref<5x256xf32, #tpu.memory_space<vmem>>, vector<1x256xf32>
    %29 = vector.broadcast %28 : vector<1x256xf32> to vector<8x256xf32>
    %30 = arith.addf %27, %29 : vector<8x256xf32>
    %31 = arith.addf %30, %11 : vector<8x256xf32>
    %32 = arith.truncf %31 : vector<8x256xf32> to vector<8x256xbf16>
    %c0_21 = arith.constant 0 : index
    %c0_22 = arith.constant 0 : index
    %c0_23 = arith.constant 0 : index
    %33 = vector.load %arg8[%c0_21, %c0_22, %c0_23] : memref<5x256x128xbf16, #tpu.memory_space<vmem>>, vector<1x256x128xbf16>
    %34 = vector.shape_cast %33 : vector<1x256x128xbf16> to vector<256x128xbf16>
    %cst_24 = arith.constant dense<0.000000e+00> : vector<8x128xf32>
    %35 = tpu.matmul %32, %34, %cst_24 {dimension_numbers = #tpu.dot_dimension_numbers<[1], [0], [0], [1], [0, 0, 1, 1], [], []>} : vector<8x256xbf16>, vector<256x128xbf16>, vector<8x128xf32> -> vector<8x128xf32>
    %c0_25 = arith.constant 0 : index
    %c0_26 = arith.constant 0 : index
    %36 = vector.load %arg9[%c0_25, %c0_26] : memref<5x128xf32, #tpu.memory_space<vmem>>, vector<1x128xf32>
    %37 = vector.broadcast %36 : vector<1x128xf32> to vector<8x128xf32>
    %38 = arith.addf %35, %37 : vector<8x128xf32>
    %cst_27 = arith.constant 0.000000e+00 : f32
    %39 = vector.broadcast %cst_27 : f32 to vector<8x128xf32>
    %40 = arith.cmpf ogt, %38, %39 : vector<8x128xf32>
    %cst_28 = arith.constant 0.00999999977 : f32
    %41 = vector.broadcast %cst_28 : f32 to vector<8x128xf32>
    %42 = arith.mulf %41, %38 : vector<8x128xf32>
    %43 = arith.select %40, %38, %42 : vector<8x128xi1>, vector<8x128xf32>
    %44 = arith.truncf %43 : vector<8x128xf32> to vector<8x128xbf16>
    %45 = vector.extract_strided_slice %10 {offsets = [0, 256], sizes = [8, 256], strides = [1, 1]} : vector<8x1280xf32> to vector<8x256xf32>
    %46 = arith.truncf %45 : vector<8x256xf32> to vector<8x256xbf16>
    %c1 = arith.constant 1 : index
    %c0_29 = arith.constant 0 : index
    %c0_30 = arith.constant 0 : index
    %47 = vector.load %arg4[%c1, %c0_29, %c0_30] : memref<5x256x256xbf16, #tpu.memory_space<vmem>>, vector<1x256x256xbf16>
    %48 = vector.shape_cast %47 : vector<1x256x256xbf16> to vector<256x256xbf16>
    %cst_31 = arith.constant dense<0.000000e+00> : vector<8x256xf32>
    %49 = tpu.matmul %46, %48, %cst_31 {dimension_numbers = #tpu.dot_dimension_numbers<[1], [0], [0], [1], [0, 0, 1, 1], [], []>} : vector<8x256xbf16>, vector<256x256xbf16>, vector<8x256xf32> -> vector<8x256xf32>
    %c1_32 = arith.constant 1 : index
    %c0_33 = arith.constant 0 : index
    %50 = vector.load %arg5[%c1_32, %c0_33] : memref<5x256xf32, #tpu.memory_space<vmem>>, vector<1x256xf32>
    %51 = vector.broadcast %50 : vector<1x256xf32> to vector<8x256xf32>
    %52 = arith.addf %49, %51 : vector<8x256xf32>
    %cst_34 = arith.constant 0.000000e+00 : f32
    %53 = vector.broadcast %cst_34 : f32 to vector<8x256xf32>
    %54 = arith.cmpf ogt, %52, %53 : vector<8x256xf32>
    %cst_35 = arith.constant 0.00999999977 : f32
    %55 = vector.broadcast %cst_35 : f32 to vector<8x256xf32>
    %56 = arith.mulf %55, %52 : vector<8x256xf32>
    %57 = arith.select %54, %52, %56 : vector<8x256xi1>, vector<8x256xf32>
    %58 = arith.truncf %57 : vector<8x256xf32> to vector<8x256xbf16>
    %c1_36 = arith.constant 1 : index
    %c0_37 = arith.constant 0 : index
    %c0_38 = arith.constant 0 : index
    %59 = vector.load %arg6[%c1_36, %c0_37, %c0_38] : memref<5x256x256xbf16, #tpu.memory_space<vmem>>, vector<1x256x256xbf16>
    %60 = vector.shape_cast %59 : vector<1x256x256xbf16> to vector<256x256xbf16>
    %cst_39 = arith.constant dense<0.000000e+00> : vector<8x256xf32>
    %61 = tpu.matmul %58, %60, %cst_39 {dimension_numbers = #tpu.dot_dimension_numbers<[1], [0], [0], [1], [0, 0, 1, 1], [], []>} : vector<8x256xbf16>, vector<256x256xbf16>, vector<8x256xf32> -> vector<8x256xf32>
    %c1_40 = arith.constant 1 : index
    %c0_41 = arith.constant 0 : index
    %62 = vector.load %arg7[%c1_40, %c0_41] : memref<5x256xf32, #tpu.memory_space<vmem>>, vector<1x256xf32>
    %63 = vector.broadcast %62 : vector<1x256xf32> to vector<8x256xf32>
    %64 = arith.addf %61, %63 : vector<8x256xf32>
    %65 = arith.addf %64, %45 : vector<8x256xf32>
    %66 = arith.truncf %65 : vector<8x256xf32> to vector<8x256xbf16>
    %c1_42 = arith.constant 1 : index
    %c0_43 = arith.constant 0 : index
    %c0_44 = arith.constant 0 : index
    %67 = vector.load %arg8[%c1_42, %c0_43, %c0_44] : memref<5x256x128xbf16, #tpu.memory_space<vmem>>, vector<1x256x128xbf16>
    %68 = vector.shape_cast %67 : vector<1x256x128xbf16> to vector<256x128xbf16>
    %cst_45 = arith.constant dense<0.000000e+00> : vector<8x128xf32>
    %69 = tpu.matmul %66, %68, %cst_45 {dimension_numbers = #tpu.dot_dimension_numbers<[1], [0], [0], [1], [0, 0, 1, 1], [], []>} : vector<8x256xbf16>, vector<256x128xbf16>, vector<8x128xf32> -> vector<8x128xf32>
    %c1_46 = arith.constant 1 : index
    %c0_47 = arith.constant 0 : index
    %70 = vector.load %arg9[%c1_46, %c0_47] : memref<5x128xf32, #tpu.memory_space<vmem>>, vector<1x128xf32>
    %71 = vector.broadcast %70 : vector<1x128xf32> to vector<8x128xf32>
    %72 = arith.addf %69, %71 : vector<8x128xf32>
    %cst_48 = arith.constant 0.000000e+00 : f32
    %73 = vector.broadcast %cst_48 : f32 to vector<8x128xf32>
    %74 = arith.cmpf ogt, %72, %73 : vector<8x128xf32>
    %cst_49 = arith.constant 0.00999999977 : f32
    %75 = vector.broadcast %cst_49 : f32 to vector<8x128xf32>
    %76 = arith.mulf %75, %72 : vector<8x128xf32>
    %77 = arith.select %74, %72, %76 : vector<8x128xi1>, vector<8x128xf32>
    %78 = arith.truncf %77 : vector<8x128xf32> to vector<8x128xbf16>
    %79 = vector.extract_strided_slice %10 {offsets = [0, 512], sizes = [8, 256], strides = [1, 1]} : vector<8x1280xf32> to vector<8x256xf32>
    %80 = arith.truncf %79 : vector<8x256xf32> to vector<8x256xbf16>
    %c2 = arith.constant 2 : index
    %c0_50 = arith.constant 0 : index
    %c0_51 = arith.constant 0 : index
    %81 = vector.load %arg4[%c2, %c0_50, %c0_51] : memref<5x256x256xbf16, #tpu.memory_space<vmem>>, vector<1x256x256xbf16>
    %82 = vector.shape_cast %81 : vector<1x256x256xbf16> to vector<256x256xbf16>
    %cst_52 = arith.constant dense<0.000000e+00> : vector<8x256xf32>
    %83 = tpu.matmul %80, %82, %cst_52 {dimension_numbers = #tpu.dot_dimension_numbers<[1], [0], [0], [1], [0, 0, 1, 1], [], []>} : vector<8x256xbf16>, vector<256x256xbf16>, vector<8x256xf32> -> vector<8x256xf32>
    %c2_53 = arith.constant 2 : index
    %c0_54 = arith.constant 0 : index
    %84 = vector.load %arg5[%c2_53, %c0_54] : memref<5x256xf32, #tpu.memory_space<vmem>>, vector<1x256xf32>
    %85 = vector.broadcast %84 : vector<1x256xf32> to vector<8x256xf32>
    %86 = arith.addf %83, %85 : vector<8x256xf32>
    %cst_55 = arith.constant 0.000000e+00 : f32
    %87 = vector.broadcast %cst_55 : f32 to vector<8x256xf32>
    %88 = arith.cmpf ogt, %86, %87 : vector<8x256xf32>
    %cst_56 = arith.constant 0.00999999977 : f32
    %89 = vector.broadcast %cst_56 : f32 to vector<8x256xf32>
    %90 = arith.mulf %89, %86 : vector<8x256xf32>
    %91 = arith.select %88, %86, %90 : vector<8x256xi1>, vector<8x256xf32>
    %92 = arith.truncf %91 : vector<8x256xf32> to vector<8x256xbf16>
    %c2_57 = arith.constant 2 : index
    %c0_58 = arith.constant 0 : index
    %c0_59 = arith.constant 0 : index
    %93 = vector.load %arg6[%c2_57, %c0_58, %c0_59] : memref<5x256x256xbf16, #tpu.memory_space<vmem>>, vector<1x256x256xbf16>
    %94 = vector.shape_cast %93 : vector<1x256x256xbf16> to vector<256x256xbf16>
    %cst_60 = arith.constant dense<0.000000e+00> : vector<8x256xf32>
    %95 = tpu.matmul %92, %94, %cst_60 {dimension_numbers = #tpu.dot_dimension_numbers<[1], [0], [0], [1], [0, 0, 1, 1], [], []>} : vector<8x256xbf16>, vector<256x256xbf16>, vector<8x256xf32> -> vector<8x256xf32>
    %c2_61 = arith.constant 2 : index
    %c0_62 = arith.constant 0 : index
    %96 = vector.load %arg7[%c2_61, %c0_62] : memref<5x256xf32, #tpu.memory_space<vmem>>, vector<1x256xf32>
    %97 = vector.broadcast %96 : vector<1x256xf32> to vector<8x256xf32>
    %98 = arith.addf %95, %97 : vector<8x256xf32>
    %99 = arith.addf %98, %79 : vector<8x256xf32>
    %100 = arith.truncf %99 : vector<8x256xf32> to vector<8x256xbf16>
    %c2_63 = arith.constant 2 : index
    %c0_64 = arith.constant 0 : index
    %c0_65 = arith.constant 0 : index
    %101 = vector.load %arg8[%c2_63, %c0_64, %c0_65] : memref<5x256x128xbf16, #tpu.memory_space<vmem>>, vector<1x256x128xbf16>
    %102 = vector.shape_cast %101 : vector<1x256x128xbf16> to vector<256x128xbf16>
    %cst_66 = arith.constant dense<0.000000e+00> : vector<8x128xf32>
    %103 = tpu.matmul %100, %102, %cst_66 {dimension_numbers = #tpu.dot_dimension_numbers<[1], [0], [0], [1], [0, 0, 1, 1], [], []>} : vector<8x256xbf16>, vector<256x128xbf16>, vector<8x128xf32> -> vector<8x128xf32>
    %c2_67 = arith.constant 2 : index
    %c0_68 = arith.constant 0 : index
    %104 = vector.load %arg9[%c2_67, %c0_68] : memref<5x128xf32, #tpu.memory_space<vmem>>, vector<1x128xf32>
    %105 = vector.broadcast %104 : vector<1x128xf32> to vector<8x128xf32>
    %106 = arith.addf %103, %105 : vector<8x128xf32>
    %cst_69 = arith.constant 0.000000e+00 : f32
    %107 = vector.broadcast %cst_69 : f32 to vector<8x128xf32>
    %108 = arith.cmpf ogt, %106, %107 : vector<8x128xf32>
    %cst_70 = arith.constant 0.00999999977 : f32
    %109 = vector.broadcast %cst_70 : f32 to vector<8x128xf32>
    %110 = arith.mulf %109, %106 : vector<8x128xf32>
    %111 = arith.select %108, %106, %110 : vector<8x128xi1>, vector<8x128xf32>
    %112 = arith.truncf %111 : vector<8x128xf32> to vector<8x128xbf16>
    %113 = vector.extract_strided_slice %10 {offsets = [0, 768], sizes = [8, 256], strides = [1, 1]} : vector<8x1280xf32> to vector<8x256xf32>
    %114 = arith.truncf %113 : vector<8x256xf32> to vector<8x256xbf16>
    %c3 = arith.constant 3 : index
    %c0_71 = arith.constant 0 : index
    %c0_72 = arith.constant 0 : index
    %115 = vector.load %arg4[%c3, %c0_71, %c0_72] : memref<5x256x256xbf16, #tpu.memory_space<vmem>>, vector<1x256x256xbf16>
    %116 = vector.shape_cast %115 : vector<1x256x256xbf16> to vector<256x256xbf16>
    %cst_73 = arith.constant dense<0.000000e+00> : vector<8x256xf32>
    %117 = tpu.matmul %114, %116, %cst_73 {dimension_numbers = #tpu.dot_dimension_numbers<[1], [0], [0], [1], [0, 0, 1, 1], [], []>} : vector<8x256xbf16>, vector<256x256xbf16>, vector<8x256xf32> -> vector<8x256xf32>
    %c3_74 = arith.constant 3 : index
    %c0_75 = arith.constant 0 : index
    %118 = vector.load %arg5[%c3_74, %c0_75] : memref<5x256xf32, #tpu.memory_space<vmem>>, vector<1x256xf32>
    %119 = vector.broadcast %118 : vector<1x256xf32> to vector<8x256xf32>
    %120 = arith.addf %117, %119 : vector<8x256xf32>
    %cst_76 = arith.constant 0.000000e+00 : f32
    %121 = vector.broadcast %cst_76 : f32 to vector<8x256xf32>
    %122 = arith.cmpf ogt, %120, %121 : vector<8x256xf32>
    %cst_77 = arith.constant 0.00999999977 : f32
    %123 = vector.broadcast %cst_77 : f32 to vector<8x256xf32>
    %124 = arith.mulf %123, %120 : vector<8x256xf32>
    %125 = arith.select %122, %120, %124 : vector<8x256xi1>, vector<8x256xf32>
    %126 = arith.truncf %125 : vector<8x256xf32> to vector<8x256xbf16>
    %c3_78 = arith.constant 3 : index
    %c0_79 = arith.constant 0 : index
    %c0_80 = arith.constant 0 : index
    %127 = vector.load %arg6[%c3_78, %c0_79, %c0_80] : memref<5x256x256xbf16, #tpu.memory_space<vmem>>, vector<1x256x256xbf16>
    %128 = vector.shape_cast %127 : vector<1x256x256xbf16> to vector<256x256xbf16>
    %cst_81 = arith.constant dense<0.000000e+00> : vector<8x256xf32>
    %129 = tpu.matmul %126, %128, %cst_81 {dimension_numbers = #tpu.dot_dimension_numbers<[1], [0], [0], [1], [0, 0, 1, 1], [], []>} : vector<8x256xbf16>, vector<256x256xbf16>, vector<8x256xf32> -> vector<8x256xf32>
    %c3_82 = arith.constant 3 : index
    %c0_83 = arith.constant 0 : index
    %130 = vector.load %arg7[%c3_82, %c0_83] : memref<5x256xf32, #tpu.memory_space<vmem>>, vector<1x256xf32>
    %131 = vector.broadcast %130 : vector<1x256xf32> to vector<8x256xf32>
    %132 = arith.addf %129, %131 : vector<8x256xf32>
    %133 = arith.addf %132, %113 : vector<8x256xf32>
    %134 = arith.truncf %133 : vector<8x256xf32> to vector<8x256xbf16>
    %c3_84 = arith.constant 3 : index
    %c0_85 = arith.constant 0 : index
    %c0_86 = arith.constant 0 : index
    %135 = vector.load %arg8[%c3_84, %c0_85, %c0_86] : memref<5x256x128xbf16, #tpu.memory_space<vmem>>, vector<1x256x128xbf16>
    %136 = vector.shape_cast %135 : vector<1x256x128xbf16> to vector<256x128xbf16>
    %cst_87 = arith.constant dense<0.000000e+00> : vector<8x128xf32>
    %137 = tpu.matmul %134, %136, %cst_87 {dimension_numbers = #tpu.dot_dimension_numbers<[1], [0], [0], [1], [0, 0, 1, 1], [], []>} : vector<8x256xbf16>, vector<256x128xbf16>, vector<8x128xf32> -> vector<8x128xf32>
    %c3_88 = arith.constant 3 : index
    %c0_89 = arith.constant 0 : index
    %138 = vector.load %arg9[%c3_88, %c0_89] : memref<5x128xf32, #tpu.memory_space<vmem>>, vector<1x128xf32>
    %139 = vector.broadcast %138 : vector<1x128xf32> to vector<8x128xf32>
    %140 = arith.addf %137, %139 : vector<8x128xf32>
    %cst_90 = arith.constant 0.000000e+00 : f32
    %141 = vector.broadcast %cst_90 : f32 to vector<8x128xf32>
    %142 = arith.cmpf ogt, %140, %141 : vector<8x128xf32>
    %cst_91 = arith.constant 0.00999999977 : f32
    %143 = vector.broadcast %cst_91 : f32 to vector<8x128xf32>
    %144 = arith.mulf %143, %140 : vector<8x128xf32>
    %145 = arith.select %142, %140, %144 : vector<8x128xi1>, vector<8x128xf32>
    %146 = arith.truncf %145 : vector<8x128xf32> to vector<8x128xbf16>
    %147 = vector.extract_strided_slice %10 {offsets = [0, 1024], sizes = [8, 256], strides = [1, 1]} : vector<8x1280xf32> to vector<8x256xf32>
    %148 = arith.truncf %147 : vector<8x256xf32> to vector<8x256xbf16>
    %c4 = arith.constant 4 : index
    %c0_92 = arith.constant 0 : index
    %c0_93 = arith.constant 0 : index
    %149 = vector.load %arg4[%c4, %c0_92, %c0_93] : memref<5x256x256xbf16, #tpu.memory_space<vmem>>, vector<1x256x256xbf16>
    %150 = vector.shape_cast %149 : vector<1x256x256xbf16> to vector<256x256xbf16>
    %cst_94 = arith.constant dense<0.000000e+00> : vector<8x256xf32>
    %151 = tpu.matmul %148, %150, %cst_94 {dimension_numbers = #tpu.dot_dimension_numbers<[1], [0], [0], [1], [0, 0, 1, 1], [], []>} : vector<8x256xbf16>, vector<256x256xbf16>, vector<8x256xf32> -> vector<8x256xf32>
    %c4_95 = arith.constant 4 : index
    %c0_96 = arith.constant 0 : index
    %152 = vector.load %arg5[%c4_95, %c0_96] : memref<5x256xf32, #tpu.memory_space<vmem>>, vector<1x256xf32>
    %153 = vector.broadcast %152 : vector<1x256xf32> to vector<8x256xf32>
    %154 = arith.addf %151, %153 : vector<8x256xf32>
    %cst_97 = arith.constant 0.000000e+00 : f32
    %155 = vector.broadcast %cst_97 : f32 to vector<8x256xf32>
    %156 = arith.cmpf ogt, %154, %155 : vector<8x256xf32>
    %cst_98 = arith.constant 0.00999999977 : f32
    %157 = vector.broadcast %cst_98 : f32 to vector<8x256xf32>
    %158 = arith.mulf %157, %154 : vector<8x256xf32>
    %159 = arith.select %156, %154, %158 : vector<8x256xi1>, vector<8x256xf32>
    %160 = arith.truncf %159 : vector<8x256xf32> to vector<8x256xbf16>
    %c4_99 = arith.constant 4 : index
    %c0_100 = arith.constant 0 : index
    %c0_101 = arith.constant 0 : index
    %161 = vector.load %arg6[%c4_99, %c0_100, %c0_101] : memref<5x256x256xbf16, #tpu.memory_space<vmem>>, vector<1x256x256xbf16>
    %162 = vector.shape_cast %161 : vector<1x256x256xbf16> to vector<256x256xbf16>
    %cst_102 = arith.constant dense<0.000000e+00> : vector<8x256xf32>
    %163 = tpu.matmul %160, %162, %cst_102 {dimension_numbers = #tpu.dot_dimension_numbers<[1], [0], [0], [1], [0, 0, 1, 1], [], []>} : vector<8x256xbf16>, vector<256x256xbf16>, vector<8x256xf32> -> vector<8x256xf32>
    %c4_103 = arith.constant 4 : index
    %c0_104 = arith.constant 0 : index
    %164 = vector.load %arg7[%c4_103, %c0_104] : memref<5x256xf32, #tpu.memory_space<vmem>>, vector<1x256xf32>
    %165 = vector.broadcast %164 : vector<1x256xf32> to vector<8x256xf32>
    %166 = arith.addf %163, %165 : vector<8x256xf32>
    %167 = arith.addf %166, %147 : vector<8x256xf32>
    %168 = arith.truncf %167 : vector<8x256xf32> to vector<8x256xbf16>
    %c4_105 = arith.constant 4 : index
    %c0_106 = arith.constant 0 : index
    %c0_107 = arith.constant 0 : index
    %169 = vector.load %arg8[%c4_105, %c0_106, %c0_107] : memref<5x256x128xbf16, #tpu.memory_space<vmem>>, vector<1x256x128xbf16>
    %170 = vector.shape_cast %169 : vector<1x256x128xbf16> to vector<256x128xbf16>
    %cst_108 = arith.constant dense<0.000000e+00> : vector<8x128xf32>
    %171 = tpu.matmul %168, %170, %cst_108 {dimension_numbers = #tpu.dot_dimension_numbers<[1], [0], [0], [1], [0, 0, 1, 1], [], []>} : vector<8x256xbf16>, vector<256x128xbf16>, vector<8x128xf32> -> vector<8x128xf32>
    %c4_109 = arith.constant 4 : index
    %c0_110 = arith.constant 0 : index
    %172 = vector.load %arg9[%c4_109, %c0_110] : memref<5x128xf32, #tpu.memory_space<vmem>>, vector<1x128xf32>
    %173 = vector.broadcast %172 : vector<1x128xf32> to vector<8x128xf32>
    %174 = arith.addf %171, %173 : vector<8x128xf32>
    %cst_111 = arith.constant 0.000000e+00 : f32
    %175 = vector.broadcast %cst_111 : f32 to vector<8x128xf32>
    %176 = arith.cmpf ogt, %174, %175 : vector<8x128xf32>
    %cst_112 = arith.constant 0.00999999977 : f32
    %177 = vector.broadcast %cst_112 : f32 to vector<8x128xf32>
    %178 = arith.mulf %177, %174 : vector<8x128xf32>
    %179 = arith.select %176, %174, %178 : vector<8x128xi1>, vector<8x128xf32>
    %180 = arith.truncf %179 : vector<8x128xf32> to vector<8x128xbf16>
    %181 = tpu.concatenate %44, %78, %112, %146, %180 in 1 : vector<8x128xbf16>, vector<8x128xbf16>, vector<8x128xbf16>, vector<8x128xbf16>, vector<8x128xbf16> -> vector<8x640xbf16>
    %c0_113 = arith.constant 0 : index
    %c0_114 = arith.constant 0 : index
    %182 = vector.load %arg10[%c0_113, %c0_114] : memref<640x128xbf16, #tpu.memory_space<vmem>>, vector<640x128xbf16>
    %cst_115 = arith.constant dense<0.000000e+00> : vector<8x128xf32>
    %183 = tpu.matmul %181, %182, %cst_115 {dimension_numbers = #tpu.dot_dimension_numbers<[1], [0], [0], [1], [0, 0, 1, 1], [], []>} : vector<8x640xbf16>, vector<640x128xbf16>, vector<8x128xf32> -> vector<8x128xf32>
    %c0_116 = arith.constant 0 : index
    %c0_117 = arith.constant 0 : index
    %184 = vector.load %arg11[%c0_116, %c0_117] : memref<1x128xf32, #tpu.memory_space<vmem>>, vector<1x128xf32>
    %185 = vector.broadcast %184 : vector<1x128xf32> to vector<8x128xf32>
    %186 = arith.addf %183, %185 : vector<8x128xf32>
    %c0_118 = arith.constant 0 : index
    %c0_119 = arith.constant 0 : index
    %187 = vector.load %arg12[%c0_118, %c0_119] : memref<8x128xf32, #tpu.memory_space<vmem>>, vector<8x128xf32>
    tpu.vector_store %arg12[%c0_118, %c0_119], %186 {strides = array<i32>} : memref<8x128xf32, #tpu.memory_space<vmem>>, vector<8x128xf32>,
    return
  }
  func.func @transform_0(%arg0: i32) -> (i32, i32) {
    %c0_i32 = arith.constant 0 : i32
    %c0_i32_0 = arith.constant 0 : i32
    return %arg0, %c0_i32 : i32, i32
  }
  func.func @transform_1(%arg0: i32) -> (i32, i32) {
    %c0_i32 = arith.constant 0 : i32
    %c0_i32_0 = arith.constant 0 : i32
    %c0_i32_1 = arith.constant 0 : i32
    return %c0_i32, %c0_i32_0 : i32, i32
  }
  func.func @transform_2(%arg0: i32) -> (i32, i32) {
    %c0_i32 = arith.constant 0 : i32
    %c0_i32_0 = arith.constant 0 : i32
    %c0_i32_1 = arith.constant 0 : i32
    return %c0_i32, %c0_i32_0 : i32, i32
  }
  func.func @transform_3(%arg0: i32) -> (i32, i32, i32) {
    %c0_i32 = arith.constant 0 : i32
    %c0_i32_0 = arith.constant 0 : i32
    %c0_i32_1 = arith.constant 0 : i32
    %c0_i32_2 = arith.constant 0 : i32
    return %c0_i32, %c0_i32_0, %c0_i32_1 : i32, i32, i32
  }
  func.func @transform_4(%arg0: i32) -> (i32, i32) {
    %c0_i32 = arith.constant 0 : i32
    %c0_i32_0 = arith.constant 0 : i32
    %c0_i32_1 = arith.constant 0 : i32
    return %c0_i32, %c0_i32_0 : i32, i32
  }
  func.func @transform_5(%arg0: i32) -> (i32, i32, i32) {
    %c0_i32 = arith.constant 0 : i32
    %c0_i32_0 = arith.constant 0 : i32
    %c0_i32_1 = arith.constant 0 : i32
    %c0_i32_2 = arith.constant 0 : i32
    return %c0_i32, %c0_i32_0, %c0_i32_1 : i32, i32, i32
  }
  func.func @transform_6(%arg0: i32) -> (i32, i32) {
    %c0_i32 = arith.constant 0 : i32
    %c0_i32_0 = arith.constant 0 : i32
    %c0_i32_1 = arith.constant 0 : i32
    return %c0_i32, %c0_i32_0 : i32, i32
  }
  func.func @transform_7(%arg0: i32) -> (i32, i32, i32) {
    %c0_i32 = arith.constant 0 : i32
    %c0_i32_0 = arith.constant 0 : i32
    %c0_i32_1 = arith.constant 0 : i32
    %c0_i32_2 = arith.constant 0 : i32
    return %c0_i32, %c0_i32_0, %c0_i32_1 : i32, i32, i32
  }
  func.func @transform_8(%arg0: i32) -> (i32, i32) {
    %c0_i32 = arith.constant 0 : i32
    %c0_i32_0 = arith.constant 0 : i32
    %c0_i32_1 = arith.constant 0 : i32
    return %c0_i32, %c0_i32_0 : i32, i32
  }
  func.func @transform_9(%arg0: i32) -> (i32, i32) {
    %c0_i32 = arith.constant 0 : i32
    %c0_i32_0 = arith.constant 0 : i32
    %c0_i32_1 = arith.constant 0 : i32
    return %c0_i32, %c0_i32_0 : i32, i32
  }
  func.func @transform_10(%arg0: i32) -> (i32, i32) {
    %c0_i32 = arith.constant 0 : i32
    %c0_i32_0 = arith.constant 0 : i32
    %c0_i32_1 = arith.constant 0 : i32
    return %c0_i32, %c0_i32_0 : i32, i32
  }
  func.func @transform_11(%arg0: i32) -> (i32, i32) {
    %c0_i32 = arith.constant 0 : i32
    %c0_i32_0 = arith.constant 0 : i32
    return %arg0, %c0_i32 : i32, i32
  }
}

</mosaic_0001>

<bundles_post_ra>
// kernel: forward.1
= control target key start
LH: loop header
LB: loop body
LE: loop exit
PB: predicated region body
PF: predicated region fallthrough
CT: control target
= control target key end

     0   :  { %16 = vsyncpa [#allocation3], 0  ;;  %s8751_s0 = inlined_call_operand.vmem [shape: bf16[8,256], index: 0, kind: input, shape index: {}]   ;;  %s8752_s1 = inlined_call_operand.hbm [shape: bf16[256,1280], index: 1, kind: input, shape index: {}]   ;;  %s8753_s2 = inlined_call_operand.vmem [shape: f32[1,1280], index: 2, kind: input, shape index: {}]   ;;  %s8754_s3 = inlined_call_operand.hbm [shape: bf16[5,256,256], index: 3, kind: input, shape index: {}]   ;;  %s8755_s4 = inlined_call_operand.vmem [shape: f32[5,256], index: 4, kind: input, shape index: {}]   ;;  %s8756_s5 = inlined_call_operand.hbm [shape: bf16[5,256,256], index: 5, kind: input, shape index: {}]   ;;  %s8757_s6 = inlined_call_operand.vmem [shape: f32[5,256], index: 6, kind: input, shape index: {}]   ;;  %s8758_s7 = inlined_call_operand.hbm [shape: bf16[5,256,128], index: 7, kind: input, shape index: {}]   ;;  %s8759_s8 = inlined_call_operand.vmem [shape: f32[5,128], index: 8, kind: input, shape index: {}]   ;;  %s8760_s9 = inlined_call_operand.hbm [shape: bf16[640,128], index: 9, kind: input, shape index: {}]   ;;  %s8761_s10 = inlined_call_operand.vmem [shape: f32[1,128], index: 10, kind: input, shape index: {}]   ;;  %s8762_s11 = inlined_call_operand.hbm [shape: f32[8,128], index: 11, kind: output, shape index: {}]  }
   0x1   :  { %17 = vsyncpa [#allocation6], 0 }
   0x2   :  { %18 = vsyncpa [#allocation9], 0  ;;  %s41_s19 = sshll.u32 %s8754_s3, 4  ;;  %s42_s19 = int_to_ptr.hbm [resolvable:$true] %s41_s19 }
   0x3   :  { %19 = vsyncpa [#allocation4], 0  ;;  %s8376_s20 = smov [#allocation5]   ;;  %s71_s24 = sshll.u32 %s8758_s7, 4  ;;  %s72_s24 = int_to_ptr.hbm [resolvable:$true] %s71_s24 }
   0x4   :  { %s43_s21 = sshll.u32 %s8376_s20, 4  ;;  %s8377_s25 = smov 128   ;;  %s44_s21 = int_to_ptr.vmem [resolvable:$true] %s43_s21 }
   0x5   :  { %s8378_s26 = smov 8   ;;  %s8379_s27 = smov [#allocation8]  }
   0x6   :  { %49 = dma.hbm_to_vmem [thread:$0]  %s42_s19, 20480, %s44_s21, [#allocation6], %s8377_s25, %s8377_s25, %s8378_s26  }
   0x7   :  { %s73_s28 = sshll.u32 %s8379_s27, 4  ;;  %s8380_s29 = smov 64   ;;  %s74_s28 = int_to_ptr.vmem [resolvable:$true] %s73_s28 }
   0x8   :  { %s8381_s30 = smov 4   ;;  %s26_s13 = sshll.u32 %s8752_s1, 4  ;;  %s27_s13 = int_to_ptr.hbm [resolvable:$true] %s26_s13 }
   0x9   :  { %79 = dma.hbm_to_vmem [thread:$0]  %s72_s24, 10240, %s74_s28, [#allocation9], %s8380_s29, %s8380_s29, %s8381_s30  }
   0xa   :  { %s8382_s14 = smov [#allocation2]   ;;  %s56_s17 = sshll.u32 %s8756_s5, 4  ;;  %s57_s17 = int_to_ptr.hbm [resolvable:$true] %s56_s17 }
   0xb   :  { %s28_s15 = sshll.u32 %s8382_s14, 4  ;;  %s8383_s18 = smov 640   ;;  %s29_s15 = int_to_ptr.vmem [resolvable:$true] %s28_s15 }
   0xc   :  { %s8384_s19 = smov 40   ;;  %s8385_s20 = smov [#allocation7]  }
   0xd   :  { %34 = dma.hbm_to_vmem [thread:$0]  %s27_s13, 20480, %s29_s15, [#allocation3], %s8383_s18, %s8383_s18, %s8384_s19  }
   0xe   :  { %s58_s21 = sshll.u32 %s8385_s20, 4  ;;  %s86_s24 = sshll.u32 %s8760_s9, 4  ;;  %s59_s21 = int_to_ptr.vmem [resolvable:$true] %s58_s21  ;;  %s87_s24 = int_to_ptr.hbm [resolvable:$true] %s86_s24 }
   0xf   :  { %64 = dma.hbm_to_vmem [thread:$0]  %s57_s17, 20480, %s59_s21, [#allocation6], %s8377_s25, %s8377_s25, %s8378_s26  }
  0x10   :  { %s8386_s1 = smov [#allocation10]  }
  0x11   :  { %s88_s27 = sshll.u32 %s8386_s1, 4  ;;  %s89_s27 = int_to_ptr.vmem [resolvable:$true] %s88_s27 }
  0x12   :  { %94 = dma.hbm_to_vmem [thread:$0]  %s87_s24, 5120, %s89_s27, [#allocation9], %s8380_s29, %s8380_s29, %s8381_s30  }
  0x13   :  { %8368 = dma.done.wait [#allocation3], 20480  }
  0x14   :  { %8369 = vsyncadd [#allocation3], 4294946816 }
  0x15   :  { %8370 = dma.done.wait [#allocation6], 40960  }
  0x16   :  { %8371 = vsyncadd [#allocation6], 4294926336 }
  0x17   :  { %8372 = dma.done.wait [#allocation9], 15360  }
  0x18   :  { %8373 = vsyncadd [#allocation9], 4294951936  ;;  %v5480_v0 = vld [vmem:[#allocation2 + $0x230] sm:$0xf]  ;;  %v7681_v1 = vld [vmem:[#allocation2 + $0x254] sm:$0xf0] }
  0x19   :  { %v5800_v2 = vld [vmem:[#allocation2 + $0x4b0] sm:$0xf]  ;;  %v5481_v3 = vor.u32 %v7681_v1, %v5480_v0  ;;  %v7761_v4 = vld [vmem:[#allocation2 + $0x4d4] sm:$0xf0]  ;;  %v7676_v5 = vld [vmem:[#allocation2 + $0x234] sm:$0xf] }
  0x1a   :  { %v5482_v6 = vld [vmem:[#allocation2 + $0x258] sm:$0xf0]  ;;  %v5801_v7 = vor.u32 %v7761_v4, %v5800_v2  ;;  %v7756_v9 = vld [vmem:[#allocation2 + $0x4b4] sm:$0xf]  ;;  %v5440_v11 = vld [vmem:[#allocation2 + $0x1e0] sm:$0xf] }
  0x1b   :  { %v5485_v8 = vor.u32 %v7676_v5, %v5482_v6  ;;  %v5802_v10 = vld [vmem:[#allocation2 + $0x4d8] sm:$0xf0]  ;;  %1109 = vmatpush.bf16.msra.mxu0 %v5481_v3  ;;  %v7671_v13 = vld [vmem:[#allocation2 + $0x204] sm:$0xf0]  ;;  %v5760_v14 = vld [vmem:[#allocation2 + $0x460] sm:$0xf] }
  0x1c   :  { %v5805_v12 = vor.u32 %v7756_v9, %v5802_v10  ;;  %v7751_v15 = vld [vmem:[#allocation2 + $0x484] sm:$0xf0]  ;;  %1122 = vmatpush.bf16.msra.mxu1 %v5801_v7  ;;  %v5441_v16 = vor.u32 %v7671_v13, %v5440_v11  ;;  %v7666_v18 = vld [vmem:[#allocation2 + $0x1e4] sm:$0xf]  ;;  %v5442_v19 = vld [vmem:[#allocation2 + $0x208] sm:$0xf0] }
  0x1d   :  { %1135 = vmatpush.bf16.msra.mxu2 %v5485_v8  ;;  %v5761_v17 = vor.u32 %v7751_v15, %v5760_v14  ;;  %v7746_v20 = vld [vmem:[#allocation2 + $0x464] sm:$0xf]  ;;  %v5445_v21 = vor.u32 %v7666_v18, %v5442_v19  ;;  %v5762_v22 = vld [vmem:[#allocation2 + $0x488] sm:$0xf0]  ;;  %v5400_v23 = vld [vmem:[#allocation2 + $0x190] sm:$0xf] }
  0x1e   :  { %1148 = vmatpush.bf16.msra.mxu3 %v5805_v12  ;;  %v7661_v24 = vld [vmem:[#allocation2 + $0x1b4] sm:$0xf0]  ;;  %v5765_v25 = vor.u32 %v7746_v20, %v5762_v22  ;;  %v5720_v26 = vld [vmem:[#allocation2 + $0x410] sm:$0xf]  ;;  %v7656_v28 = vld [vmem:[#allocation2 + $0x194] sm:$0xf] }
  0x1f   :  { %v7741_v27 = vld [vmem:[#allocation2 + $0x434] sm:$0xf0]  ;;  %1110 = vmatpush.bf16.msra.mxu0 %v5441_v16  ;;  %v5401_v29 = vor.u32 %v7661_v24, %v5400_v23  ;;  %v5402_v30 = vld [vmem:[#allocation2 + $0x1b8] sm:$0xf0]  ;;  %v7736_v31 = vld [vmem:[#allocation2 + $0x414] sm:$0xf] }
  0x20   :  { %v5722_v32 = vld [vmem:[#allocation2 + $0x438] sm:$0xf0]  ;;  %1123 = vmatpush.bf16.msra.mxu1 %v5761_v17  ;;  %v5721_v33 = vor.u32 %v7741_v27, %v5720_v26  ;;  %v5405_v34 = vor.u32 %v7656_v28, %v5402_v30  ;;  %v5360_v35 = vld [vmem:[#allocation2 + $0x140] sm:$0xf]  ;;  %v7651_v36 = vld [vmem:[#allocation2 + $0x164] sm:$0xf0] }
  0x21   :  { %1136 = vmatpush.bf16.msra.mxu2 %v5445_v21  ;;  %v5680_v37 = vld [vmem:[#allocation2 + $0x3c0] sm:$0xf]  ;;  %v5725_v38 = vor.u32 %v7736_v31, %v5722_v32  ;;  %v7731_v39 = vld [vmem:[#allocation2 + $0x3e4] sm:$0xf0]  ;;  %v7646_v40 = vld [vmem:[#allocation2 + $0x144] sm:$0xf]  ;;  %v5361_v44 = vor.u32 %v7651_v36, %v5360_v35 }
  0x22   :  { %1149 = vmatpush.bf16.msra.mxu3 %v5765_v25  ;;  %v5362_v41 = vld [vmem:[#allocation2 + $0x168] sm:$0xf0]  ;;  %v7726_v42 = vld [vmem:[#allocation2 + $0x3c4] sm:$0xf]  ;;  %v5681_v45 = vor.u32 %v7731_v39, %v5680_v37  ;;  %v5320_v47 = vld [vmem:[#allocation2 + $0xf0] sm:$0xf] }
  0x23   :  { %v5682_v43 = vld [vmem:[#allocation2 + $0x3e8] sm:$0xf0]  ;;  %1111 = vmatpush.bf16.msra.mxu0 %v5401_v29  ;;  %v5365_v46 = vor.u32 %v7646_v40, %v5362_v41  ;;  %v7641_v48 = vld [vmem:[#allocation2 + $0x114] sm:$0xf0]  ;;  %v5640_v49 = vld [vmem:[#allocation2 + $0x370] sm:$0xf] }
  0x24   :  { %1124 = vmatpush.bf16.msra.mxu1 %v5721_v33  ;;  %v5685_v50 = vor.u32 %v7726_v42, %v5682_v43  ;;  %v7721_v51 = vld [vmem:[#allocation2 + $0x394] sm:$0xf0]  ;;  %v7636_v52 = vld [vmem:[#allocation2 + $0xf4] sm:$0xf]  ;;  %v5322_v53 = vld [vmem:[#allocation2 + $0x118] sm:$0xf0]  ;;  %v5321_v56 = vor.u32 %v7641_v48, %v5320_v47 }
  0x25   :  { %1137 = vmatpush.bf16.msra.mxu2 %v5405_v34  ;;  %v7716_v54 = vld [vmem:[#allocation2 + $0x374] sm:$0xf]  ;;  %v5642_v55 = vld [vmem:[#allocation2 + $0x398] sm:$0xf0]  ;;  %v5641_v57 = vor.u32 %v7721_v51, %v5640_v49  ;;  %v5325_v58 = vor.u32 %v7636_v52, %v5322_v53  ;;  %v5280_v59 = vld [vmem:[#allocation2 + $0xa0] sm:$0xf] }
  0x26   :  { %1150 = vmatpush.bf16.msra.mxu3 %v5725_v38  ;;  %v7631_v60 = vld [vmem:[#allocation2 + $0xc4] sm:$0xf0]  ;;  %v5600_v61 = vld [vmem:[#allocation2 + $0x320] sm:$0xf]  ;;  %v5645_v62 = vor.u32 %v7716_v54, %v5642_v55  ;;  %v7626_v0 = vld [vmem:[#allocation2 + $0xa4] sm:$0xf] }
  0x27   :  { %1112 = vmatpush.bf16.msra.mxu0 %v5361_v44  ;;  %v7711_v63 = vld [vmem:[#allocation2 + $0x344] sm:$0xf0]  ;;  %v5282_v1 = vld [vmem:[#allocation2 + $0xc8] sm:$0xf0]  ;;  %v7706_v2 = vld [vmem:[#allocation2 + $0x324] sm:$0xf]  ;;  %v5281_v4 = vor.u32 %v7631_v60, %v5280_v59 }
  0x28   :  { %1125 = vmatpush.bf16.msra.mxu1 %v5681_v45  ;;  %v5602_v3 = vld [vmem:[#allocation2 + $0x348] sm:$0xf0]  ;;  %v5601_v5 = vor.u32 %v7711_v63, %v5600_v61  ;;  %v5285_v6 = vor.u32 %v7626_v0, %v5282_v1  ;;  %v5240_v7 = vld [vmem:[#allocation2 + $0x50] sm:$0xf]  ;;  %v7621_v8 = vld [vmem:[#allocation2 + $0x74] sm:$0xf0] }
  0x29   :  { %1138 = vmatpush.bf16.msra.mxu2 %v5365_v46  ;;  %v5560_v9 = vld [vmem:[#allocation2 + $0x2d0] sm:$0xf]  ;;  %v5605_v10 = vor.u32 %v7706_v2, %v5602_v3  ;;  %v7701_v11 = vld [vmem:[#allocation2 + $0x2f4] sm:$0xf0]  ;;  %v7616_v12 = vld [vmem:[#allocation2 + $0x54] sm:$0xf]  ;;  %v5241_v16 = vor.u32 %v7621_v8, %v5240_v7 }
  0x2a   :  { %1151 = vmatpush.bf16.msra.mxu3 %v5685_v50  ;;  %v5242_v13 = vld [vmem:[#allocation2 + $0x78] sm:$0xf0]  ;;  %v7696_v14 = vld [vmem:[#allocation2 + $0x2d4] sm:$0xf]  ;;  %v5200_v17 = vld [vmem:[#allocation2] sm:$0xf]  ;;  %v5561_v20 = vor.u32 %v7701_v11, %v5560_v9 }
  0x2b   :  { %1113 = vmatpush.bf16.msra.mxu0 %v5321_v56  ;;  %v5562_v15 = vld [vmem:[#allocation2 + $0x2f8] sm:$0xf0]  ;;  %v7611_v18 = vld [vmem:[#allocation2 + $0x24] sm:$0xf0]  ;;  %v5520_v19 = vld [vmem:[#allocation2 + $0x280] sm:$0xf]  ;;  %v5245_v21 = vor.u32 %v7616_v12, %v5242_v13 }
  0x2c   :  { %1126 = vmatpush.bf16.msra.mxu1 %v5641_v57  ;;  %v7691_v22 = vld [vmem:[#allocation2 + $0x2a4] sm:$0xf0]  ;;  %v7606_v23 = vld [vmem:[#allocation2 + $0x4] sm:$0xf]  ;;  %v5565_v25 = vor.u32 %v7696_v14, %v5562_v15  ;;  %v5202_v26 = vld [vmem:[#allocation2 + $0x28] sm:$0xf0]  ;;  %v5201_v32 = vor.u32 %v7611_v18, %v5200_v17 }
  0x2d   :  { %1139 = vmatpush.bf16.msra.mxu2 %v5325_v58  ;;  %v117_v24 = vld [vmem:[%s8751_s0] sm:$0xff]  ;;  %v5522_v28 = vld [vmem:[#allocation2 + $0x2a8] sm:$0xf0]  ;;  %v5488_v29 = vld [vmem:[#allocation2 + $0x238] sm:$0xf]  ;;  %v5521_v37 = vor.u32 %v7691_v22, %v5520_v19  ;;  %v5205_v38 = vor.u32 %v7606_v23, %v5202_v26  ;;  %s8387_s3 = smov [#allocation11]  }
  0x2e   :  { %1152 = vmatpush.bf16.msra.mxu3 %v5645_v62  ;;  %v7686_v27 = vld [vmem:[#allocation2 + $0x284] sm:$0xf]  ;;  %v7682_v30 = vld [vmem:[#allocation2 + $0x25c] sm:$0xf0]  ;;  %v5808_v31 = vld [vmem:[#allocation2 + $0x4b8] sm:$0xf]  ;;  %v303_v36 = vunpack.c.l.b16 %v117_v24  ;;  %v304_v41 = vunpack.c.h.b16 %v117_v24 }
  0x2f   :  { %1114 = vmatpush.bf16.msra.mxu0 %v5281_v4  ;;  %v7762_v33 = vld [vmem:[#allocation2 + $0x4dc] sm:$0xf0]  ;;  %v7677_v34 = vld [vmem:[#allocation2 + $0x23c] sm:$0xf]  ;;  %v5490_v35 = vld [vmem:[#allocation2 + $0x260] sm:$0xf0]  ;;  %v5525_v42 = vor.u32 %v7686_v27, %v5522_v28  ;;  %v5489_v43 = vor.u32 %v7682_v30, %v5488_v29 }
  0x30   :  { %1127 = vmatpush.bf16.msra.mxu1 %v5601_v5  ;;  %v7757_v39 = vld [vmem:[#allocation2 + $0x4bc] sm:$0xf]  ;;  %v5810_v40 = vld [vmem:[#allocation2 + $0x4e0] sm:$0xf0]  ;;  %v5809_v44 = vor.u32 %v7762_v33, %v5808_v31  ;;  %v5493_v45 = vor.u32 %v7677_v34, %v5490_v35  ;;  %v5448_v46 = vld [vmem:[#allocation2 + $0x1e8] sm:$0xf]  ;;  %v8466_v50 = vpack.c.b16 %v303_v36, %v303_v36  ;;  %v8468_v54 = vpack.c.b16 %v304_v41, %v304_v41 }
  0x31   :  { %1140 = vmatpush.bf16.msra.mxu2 %v5285_v6  ;;  %v7672_v47 = vld [vmem:[#allocation2 + $0x20c] sm:$0xf0]  ;;  %v5768_v48 = vld [vmem:[#allocation2 + $0x468] sm:$0xf]  ;;  %v5813_v49 = vor.u32 %v7757_v39, %v5810_v40  ;;  %v7667_v52 = vld [vmem:[#allocation2 + $0x1ec] sm:$0xf] }
  0x32   :  { %1153 = vmatpush.bf16.msra.mxu3 %v5605_v10  ;;  %v7752_v51 = vld [vmem:[#allocation2 + $0x48c] sm:$0xf0]  ;;  %v5450_v53 = vld [vmem:[#allocation2 + $0x210] sm:$0xf0]  ;;  %v7747_v55 = vld [vmem:[#allocation2 + $0x46c] sm:$0xf]  ;;  %v5449_v57 = vor.u32 %v7672_v47, %v5448_v46 }
  0x33   :  { %1115 = vmatpush.bf16.msra.mxu0 %v5241_v16  ;;  %v5770_v56 = vld [vmem:[#allocation2 + $0x490] sm:$0xf0]  ;;  %v5769_v58 = vor.u32 %v7752_v51, %v5768_v48  ;;  %v5453_v59 = vor.u32 %v7667_v52, %v5450_v53  ;;  %v5408_v60 = vld [vmem:[#allocation2 + $0x198] sm:$0xf]  ;;  %v7662_v61 = vld [vmem:[#allocation2 + $0x1bc] sm:$0xf0] }
  0x34   :  { %1128 = vmatpush.bf16.msra.mxu1 %v5561_v20  ;;  %v5728_v62 = vld [vmem:[#allocation2 + $0x418] sm:$0xf]  ;;  %v5773_v63 = vor.u32 %v7747_v55, %v5770_v56  ;;  %v7742_v0 = vld [vmem:[#allocation2 + $0x43c] sm:$0xf0]  ;;  %v7657_v1 = vld [vmem:[#allocation2 + $0x19c] sm:$0xf]  ;;  %v5409_v5 = vor.u32 %v7662_v61, %v5408_v60 }
  0x35   :  { %1141 = vmatpush.bf16.msra.mxu2 %v5245_v21  ;;  %v5410_v2 = vld [vmem:[#allocation2 + $0x1c0] sm:$0xf0]  ;;  %v7737_v3 = vld [vmem:[#allocation2 + $0x41c] sm:$0xf]  ;;  %v5729_v6 = vor.u32 %v7742_v0, %v5728_v62  ;;  %v5368_v8 = vld [vmem:[#allocation2 + $0x148] sm:$0xf] }
  0x36   :  { %1154 = vmatpush.bf16.msra.mxu3 %v5565_v25  ;;  %v5730_v4 = vld [vmem:[#allocation2 + $0x440] sm:$0xf0]  ;;  %v5413_v7 = vor.u32 %v7657_v1, %v5410_v2  ;;  %v7652_v9 = vld [vmem:[#allocation2 + $0x16c] sm:$0xf0]  ;;  %v5688_v10 = vld [vmem:[#allocation2 + $0x3c8] sm:$0xf] }
  0x37   :  { %1116 = vmatpush.bf16.msra.mxu0 %v5201_v32  ;;  %v5733_v11 = vor.u32 %v7737_v3, %v5730_v4  ;;  %v7732_v12 = vld [vmem:[#allocation2 + $0x3ec] sm:$0xf0]  ;;  %v7647_v13 = vld [vmem:[#allocation2 + $0x14c] sm:$0xf]  ;;  %v5370_v14 = vld [vmem:[#allocation2 + $0x170] sm:$0xf0]  ;;  %v5369_v17 = vor.u32 %v7652_v9, %v5368_v8 }
  0x38   :  { %1129 = vmatpush.bf16.msra.mxu1 %v5521_v37  ;;  %v7727_v15 = vld [vmem:[#allocation2 + $0x3cc] sm:$0xf]  ;;  %v5690_v16 = vld [vmem:[#allocation2 + $0x3f0] sm:$0xf0]  ;;  %v5689_v18 = vor.u32 %v7732_v12, %v5688_v10  ;;  %v5373_v19 = vor.u32 %v7647_v13, %v5370_v14  ;;  %v5328_v20 = vld [vmem:[#allocation2 + $0xf8] sm:$0xf] }
  0x39   :  { %1142 = vmatpush.bf16.msra.mxu2 %v5205_v38  ;;  %v7642_v21 = vld [vmem:[#allocation2 + $0x11c] sm:$0xf0]  ;;  %v5648_v22 = vld [vmem:[#allocation2 + $0x378] sm:$0xf]  ;;  %v5693_v23 = vor.u32 %v7727_v15, %v5690_v16  ;;  %v7637_v25 = vld [vmem:[#allocation2 + $0xfc] sm:$0xf] }
  0x3a   :  { %1155 = vmatpush.bf16.msra.mxu3 %v5525_v42  ;;  %1117 = vmatmul.bf16.vlgmr.msra.gmra.mxu0 %v8466_v50  ;;  %v7722_v24 = vld [vmem:[#allocation2 + $0x39c] sm:$0xf0]  ;;  %v5330_v26 = vld [vmem:[#allocation2 + $0x120] sm:$0xf0]  ;;  %v7717_v27 = vld [vmem:[#allocation2 + $0x37c] sm:$0xf]  ;;  %v5329_v29 = vor.u32 %v7642_v21, %v5328_v20 }
  0x3b   :  { %1161 = vmatpush.bf16.msrb.mxu0 %v5489_v43  ;;  %1130 = vmatmul.bf16.vlgmr.msra.gmra.mxu1 %v8468_v54  ;;  %v5650_v28 = vld [vmem:[#allocation2 + $0x3a0] sm:$0xf0]  ;;  %v5649_v30 = vor.u32 %v7722_v24, %v5648_v22  ;;  %v5333_v31 = vor.u32 %v7637_v25, %v5330_v26  ;;  %v5288_v32 = vld [vmem:[#allocation2 + $0xa8] sm:$0xf]  ;;  %v7632_v33 = vld [vmem:[#allocation2 + $0xcc] sm:$0xf0] }
  0x3c   :  { %1174 = vmatpush.bf16.msrb.mxu1 %v5809_v44  ;;  %1143 = vmatmul.bf16.vlgmr.msra.gmra.mxu2 %v8466_v50  ;;  %v5608_v34 = vld [vmem:[#allocation2 + $0x328] sm:$0xf]  ;;  %v5653_v35 = vor.u32 %v7717_v27, %v5650_v28  ;;  %v7712_v36 = vld [vmem:[#allocation2 + $0x34c] sm:$0xf0]  ;;  %v7627_v37 = vld [vmem:[#allocation2 + $0xac] sm:$0xf]  ;;  %v5289_v41 = vor.u32 %v7632_v33, %v5288_v32 }
  0x3d   :  { %1187 = vmatpush.bf16.msrb.mxu2 %v5493_v45  ;;  %1156 = vmatmul.bf16.vlgmr.msra.gmra.mxu3 %v8468_v54  ;;  %v5290_v38 = vld [vmem:[#allocation2 + $0xd0] sm:$0xf0]  ;;  %v7707_v39 = vld [vmem:[#allocation2 + $0x32c] sm:$0xf]  ;;  %v5609_v42 = vor.u32 %v7712_v36, %v5608_v34  ;;  %v5248_v44 = vld [vmem:[#allocation2 + $0x58] sm:$0xf] }
  0x3e   :  { %1200 = vmatpush.bf16.msrb.mxu3 %v5813_v49  ;;  %v5610_v40 = vld [vmem:[#allocation2 + $0x350] sm:$0xf0]  ;;  %v5293_v43 = vor.u32 %v7627_v37, %v5290_v38  ;;  %v7622_v45 = vld [vmem:[#allocation2 + $0x7c] sm:$0xf0]  ;;  %v5568_v46 = vld [vmem:[#allocation2 + $0x2d8] sm:$0xf] }
  0x3f   :  { %1162 = vmatpush.bf16.msrb.mxu0 %v5449_v57  ;;  %v5613_v47 = vor.u32 %v7707_v39, %v5610_v40  ;;  %v7702_v48 = vld [vmem:[#allocation2 + $0x2fc] sm:$0xf0]  ;;  %v7617_v49 = vld [vmem:[#allocation2 + $0x5c] sm:$0xf]  ;;  %v5250_v51 = vld [vmem:[#allocation2 + $0x80] sm:$0xf0]  ;;  %v5249_v55 = vor.u32 %v7622_v45, %v5248_v44 }
  0x40   :  { %1175 = vmatpush.bf16.msrb.mxu1 %v5769_v58  ;;  %v7697_v52 = vld [vmem:[#allocation2 + $0x2dc] sm:$0xf]  ;;  %v5570_v53 = vld [vmem:[#allocation2 + $0x300] sm:$0xf0]  ;;  %v5208_v56 = vld [vmem:[#allocation2 + $0x8] sm:$0xf]  ;;  %v5569_v58 = vor.u32 %v7702_v48, %v5568_v46 }
  0x41   :  { %1188 = vmatpush.bf16.msrb.mxu2 %v5453_v59  ;;  %v7612_v57 = vld [vmem:[#allocation2 + $0x2c] sm:$0xf0]  ;;  %v5253_v59 = vor.u32 %v7617_v49, %v5250_v51  ;;  %v5528_v60 = vld [vmem:[#allocation2 + $0x288] sm:$0xf]  ;;  %v7607_v62 = vld [vmem:[#allocation2 + $0xc] sm:$0xf] }
  0x42   :  { %1201 = vmatpush.bf16.msrb.mxu3 %v5773_v63  ;;  %v7692_v61 = vld [vmem:[#allocation2 + $0x2ac] sm:$0xf0]  ;;  %v5573_v63 = vor.u32 %v7697_v52, %v5570_v53  ;;  %v5210_v0 = vld [vmem:[#allocation2 + $0x30] sm:$0xf0]  ;;  %v7687_v1 = vld [vmem:[#allocation2 + $0x28c] sm:$0xf] }
  0x43   :  { %1163 = vmatpush.bf16.msrb.mxu0 %v5409_v5  ;;  %v5530_v2 = vld [vmem:[#allocation2 + $0x2b0] sm:$0xf0]  ;;  %v5496_v3 = vld [vmem:[#allocation2 + $0x240] sm:$0xf]  ;;  %v7683_v4 = vld [vmem:[#allocation2 + $0x264] sm:$0xf0]  ;;  %v5529_v10 = vor.u32 %v7692_v61, %v5528_v60 }
  0x44   :  { %1176 = vmatpush.bf16.msrb.mxu1 %v5729_v6  ;;  %v5816_v5 = vld [vmem:[#allocation2 + $0x4c0] sm:$0xf]  ;;  %v5209_v6 = vor.u32 %v7612_v57, %v5208_v56  ;;  %v7678_v8 = vld [vmem:[#allocation2 + $0x244] sm:$0xf]  ;;  %v5498_v9 = vld [vmem:[#allocation2 + $0x268] sm:$0xf0]  ;;  %v5533_v14 = vor.u32 %v7687_v1, %v5530_v2  ;;  %v5497_v15 = vor.u32 %v7683_v4, %v5496_v3 }
  0x45   :  { %1189 = vmatpush.bf16.msrb.mxu2 %v5413_v7  ;;  %v7763_v7 = vld [vmem:[#allocation2 + $0x4e4] sm:$0xf0]  ;;  %v7758_v12 = vld [vmem:[#allocation2 + $0x4c4] sm:$0xf]  ;;  %v5818_v13 = vld [vmem:[#allocation2 + $0x4e8] sm:$0xf0] }
  0x46   :  { %1202 = vmatpush.bf16.msrb.mxu3 %v5733_v11  ;;  %v5213_v11 = vor.u32 %v7607_v62, %v5210_v0  ;;  %v5817_v16 = vor.u32 %v7763_v7, %v5816_v5  ;;  %v5776_v20 = vld [vmem:[#allocation2 + $0x470] sm:$0xf]  ;;  %v5821_v21 = vor.u32 %v7758_v12, %v5818_v13  ;;  %v7753_v22 = vld [vmem:[#allocation2 + $0x494] sm:$0xf0]  ;;  %v5458_v24 = vld [vmem:[#allocation2 + $0x218] sm:$0xf0] }
  0x47   :  { %1164 = vmatpush.bf16.msrb.mxu0 %v5369_v17  ;;  %v5501_v17 = vor.u32 %v7678_v8, %v5498_v9  ;;  %v7748_v25 = vld [vmem:[#allocation2 + $0x474] sm:$0xf]  ;;  %v5778_v26 = vld [vmem:[#allocation2 + $0x498] sm:$0xf0]  ;;  %v5777_v28 = vor.u32 %v7753_v22, %v5776_v20  ;;  %v5736_v32 = vld [vmem:[#allocation2 + $0x420] sm:$0xf] }
  0x48   :  { %1177 = vmatpush.bf16.msrb.mxu1 %v5689_v18  ;;  %v5456_v18 = vld [vmem:[#allocation2 + $0x1f0] sm:$0xf]  ;;  %v5781_v33 = vor.u32 %v7748_v25, %v5778_v26  ;;  %v7743_v34 = vld [vmem:[#allocation2 + $0x444] sm:$0xf0]  ;;  %v5418_v36 = vld [vmem:[#allocation2 + $0x1c8] sm:$0xf0] }
  0x49   :  { %1190 = vmatpush.bf16.msrb.mxu2 %v5373_v19  ;;  %v7673_v19 = vld [vmem:[#allocation2 + $0x214] sm:$0xf0]  ;;  %v7738_v37 = vld [vmem:[#allocation2 + $0x424] sm:$0xf]  ;;  %v5738_v38 = vld [vmem:[#allocation2 + $0x448] sm:$0xf0]  ;;  %v5737_v40 = vor.u32 %v7743_v34, %v5736_v32 }
  0x4a   :  { %1203 = vmatpush.bf16.msrb.mxu3 %v5693_v23  ;;  %v7668_v23 = vld [vmem:[#allocation2 + $0x1f4] sm:$0xf]  ;;  %v5457_v27 = vor.u32 %v7673_v19, %v5456_v18  ;;  %v5696_v44 = vld [vmem:[#allocation2 + $0x3d0] sm:$0xf]  ;;  %v5741_v45 = vor.u32 %v7738_v37, %v5738_v38  ;;  %v7733_v46 = vld [vmem:[#allocation2 + $0x3f4] sm:$0xf0] }
  0x4b   :  { %1165 = vmatpush.bf16.msrb.mxu0 %v5329_v29  ;;  %v5461_v29 = vor.u32 %v7668_v23, %v5458_v24  ;;  %v5378_v48 = vld [vmem:[#allocation2 + $0x178] sm:$0xf0]  ;;  %v7728_v49 = vld [vmem:[#allocation2 + $0x3d4] sm:$0xf]  ;;  %v5697_v53 = vor.u32 %v7733_v46, %v5696_v44  ;;  %v5336_v56 = vld [vmem:[#allocation2 + $0x100] sm:$0xf] }
  0x4c   :  { %1178 = vmatpush.bf16.msrb.mxu1 %v5649_v30  ;;  %v5416_v30 = vld [vmem:[#allocation2 + $0x1a0] sm:$0xf]  ;;  %v5698_v51 = vld [vmem:[#allocation2 + $0x3f8] sm:$0xf0]  ;;  %v7643_v57 = vld [vmem:[#allocation2 + $0x124] sm:$0xf0] }
  0x4d   :  { %1191 = vmatpush.bf16.msrb.mxu2 %v5333_v31  ;;  %v7663_v31 = vld [vmem:[#allocation2 + $0x1c4] sm:$0xf0]  ;;  %v7638_v61 = vld [vmem:[#allocation2 + $0x104] sm:$0xf]  ;;  %v5338_v62 = vld [vmem:[#allocation2 + $0x128] sm:$0xf0]  ;;  %v5337_v1 = vor.u32 %v7643_v57, %v5336_v56 }
  0x4e   :  { %1204 = vmatpush.bf16.msrb.mxu3 %v5653_v35  ;;  %v7658_v35 = vld [vmem:[#allocation2 + $0x1a4] sm:$0xf]  ;;  %v5417_v39 = vor.u32 %v7663_v31, %v5416_v30  ;;  %v7723_v60 = vld [vmem:[#allocation2 + $0x3a4] sm:$0xf0]  ;;  %v5658_v0 = vld [vmem:[#allocation2 + $0x3a8] sm:$0xf0]  ;;  %v5341_v5 = vor.u32 %v7638_v61, %v5338_v62 }
  0x4f   :  { %1166 = vmatpush.bf16.msrb.mxu0 %v5289_v41  ;;  %v5421_v41 = vor.u32 %v7658_v35, %v5418_v36  ;;  %v5296_v2 = vld [vmem:[#allocation2 + $0xb0] sm:$0xf]  ;;  %v7633_v3 = vld [vmem:[#allocation2 + $0xd4] sm:$0xf0]  ;;  %v7628_v8 = vld [vmem:[#allocation2 + $0xb4] sm:$0xf] }
  0x50   :  { %1179 = vmatpush.bf16.msrb.mxu1 %v5609_v42  ;;  %v5376_v42 = vld [vmem:[#allocation2 + $0x150] sm:$0xf]  ;;  %v7713_v7 = vld [vmem:[#allocation2 + $0x354] sm:$0xf0]  ;;  %v5618_v12 = vld [vmem:[#allocation2 + $0x358] sm:$0xf0]  ;;  %v5297_v13 = vor.u32 %v7633_v3, %v5296_v2 }
  0x51   :  { %1192 = vmatpush.bf16.msrb.mxu2 %v5293_v43  ;;  %v7653_v43 = vld [vmem:[#allocation2 + $0x174] sm:$0xf0]  ;;  %v5576_v18 = vld [vmem:[#allocation2 + $0x2e0] sm:$0xf]  ;;  %v7703_v20 = vld [vmem:[#allocation2 + $0x304] sm:$0xf0] }
  0x52   :  { %1205 = vmatpush.bf16.msrb.mxu3 %v5613_v47  ;;  %v7648_v47 = vld [vmem:[#allocation2 + $0x154] sm:$0xf]  ;;  %v5377_v52 = vor.u32 %v7653_v43, %v5376_v42  ;;  %v5258_v22 = vld [vmem:[#allocation2 + $0x88] sm:$0xf0]  ;;  %v7698_v23 = vld [vmem:[#allocation2 + $0x2e4] sm:$0xf] }
  0x53   :  { %1167 = vmatpush.bf16.msrb.mxu0 %v5249_v55  ;;  %v5381_v55 = vor.u32 %v7648_v47, %v5378_v48  ;;  %v5578_v24 = vld [vmem:[#allocation2 + $0x308] sm:$0xf0]  ;;  %v5216_v26 = vld [vmem:[#allocation2 + $0x10] sm:$0xf]  ;;  %v7693_v31 = vld [vmem:[#allocation2 + $0x2b4] sm:$0xf0] }
  0x54   :  { %1180 = vmatpush.bf16.msrb.mxu1 %v5569_v58  ;;  %v5656_v58 = vld [vmem:[#allocation2 + $0x380] sm:$0xf]  ;;  %v5536_v30 = vld [vmem:[#allocation2 + $0x290] sm:$0xf]  ;;  %v7608_v32 = vld [vmem:[#allocation2 + $0x14] sm:$0xf] }
  0x55   :  { %1193 = vmatpush.bf16.msrb.mxu2 %v5253_v59  ;;  %v5701_v59 = vor.u32 %v7728_v49, %v5698_v51  ;;  %v5657_v4 = vor.u32 %v7723_v60, %v5656_v58  ;;  %v5218_v34 = vld [vmem:[#allocation2 + $0x38] sm:$0xf0]  ;;  %v7688_v35 = vld [vmem:[#allocation2 + $0x294] sm:$0xf]  ;;  %v5504_v37 = vld [vmem:[#allocation2 + $0x248] sm:$0xf]  ;;  %v5537_v44 = vor.u32 %v7693_v31, %v5536_v30 }
  0x56   :  { %1206 = vmatpush.bf16.msrb.mxu3 %v5573_v63  ;;  %v7718_v63 = vld [vmem:[#allocation2 + $0x384] sm:$0xf]  ;;  %v5538_v36 = vld [vmem:[#allocation2 + $0x2b8] sm:$0xf0]  ;;  %v7684_v38 = vld [vmem:[#allocation2 + $0x26c] sm:$0xf0] }
  0x57   :  { %1168 = vmatpush.bf16.msrb.mxu0 %v5209_v6  ;;  %v5616_v6 = vld [vmem:[#allocation2 + $0x330] sm:$0xf]  ;;  %v5661_v9 = vor.u32 %v7718_v63, %v5658_v0  ;;  %v7679_v42 = vld [vmem:[#allocation2 + $0x24c] sm:$0xf]  ;;  %v5506_v43 = vld [vmem:[#allocation2 + $0x270] sm:$0xf0]  ;;  %v5541_v48 = vor.u32 %v7688_v35, %v5538_v36  ;;  %v5505_v49 = vor.u32 %v7684_v38, %v5504_v37 }
  0x58   :  { %1181 = vmatpush.bf16.msrb.mxu1 %v5529_v10  ;;  %v5298_v10 = vld [vmem:[#allocation2 + $0xd8] sm:$0xf0]  ;;  %v7759_v46 = vld [vmem:[#allocation2 + $0x4cc] sm:$0xf]  ;;  %v5826_v47 = vld [vmem:[#allocation2 + $0x4f0] sm:$0xf0] }
  0x59   :  { %1194 = vmatpush.bf16.msrb.mxu2 %v5213_v11  ;;  %v7708_v11 = vld [vmem:[#allocation2 + $0x334] sm:$0xf]  ;;  %v5784_v56 = vld [vmem:[#allocation2 + $0x478] sm:$0xf]  ;;  %v5829_v57 = vor.u32 %v7759_v46, %v5826_v47  ;;  %v7754_v58 = vld [vmem:[#allocation2 + $0x49c] sm:$0xf0] }
  0x5a   :  { %1207 = vmatpush.bf16.msrb.mxu3 %v5533_v14  ;;  %1169 = vmatmul.bf16.vlgmr.msrb.gmra.mxu0 %v8466_v50  ;;  %v5617_v14 = vor.u32 %v7713_v7, %v5616_v6  ;;  %v5621_v19 = vor.u32 %v7708_v11, %v5618_v12  ;;  %v5466_v60 = vld [vmem:[#allocation2 + $0x220] sm:$0xf0]  ;;  %v7749_v61 = vld [vmem:[#allocation2 + $0x47c] sm:$0xf]  ;;  %v5785_v0 = vor.u32 %v7754_v58, %v5784_v56  ;;  %v5424_v2 = vld [vmem:[#allocation2 + $0x1a8] sm:$0xf] }
  0x5b   :  { %1213 = vmatpush.bf16.msra.mxu0 %v5497_v15  ;;  %1182 = vmatmul.bf16.vlgmr.msrb.gmra.mxu1 %v8468_v54  ;;  %v5301_v15 = vor.u32 %v7628_v8, %v5298_v10  ;;  %v5786_v62 = vld [vmem:[#allocation2 + $0x4a0] sm:$0xf0]  ;;  %v7664_v3 = vld [vmem:[#allocation2 + $0x1cc] sm:$0xf0]  ;;  %v7659_v7 = vld [vmem:[#allocation2 + $0x1ac] sm:$0xf] }
  0x5c   :  { %1226 = vmatpush.bf16.msra.mxu1 %v5817_v16  ;;  %1195 = vmatmul.bf16.vlgmr.msrb.gmra.mxu2 %v8466_v50  ;;  %v5256_v16 = vld [vmem:[#allocation2 + $0x60] sm:$0xf]  ;;  %v7744_v6 = vld [vmem:[#allocation2 + $0x44c] sm:$0xf0]  ;;  %v5426_v8 = vld [vmem:[#allocation2 + $0x1d0] sm:$0xf0]  ;;  %v5425_v11 = vor.u32 %v7664_v3, %v5424_v2 }
  0x5d   :  { %1239 = vmatpush.bf16.msra.mxu2 %v5501_v17  ;;  %1208 = vmatmul.bf16.vlgmr.msrb.gmra.mxu3 %v8468_v54  ;;  %v7623_v17 = vld [vmem:[#allocation2 + $0x84] sm:$0xf0]  ;;  %v5746_v10 = vld [vmem:[#allocation2 + $0x450] sm:$0xf0]  ;;  %v7724_v30 = vld [vmem:[#allocation2 + $0x3ac] sm:$0xf0] }
  0x5e   :  { %1252 = vmatpush.bf16.msra.mxu3 %v5821_v21  ;;  %v7618_v21 = vld [vmem:[#allocation2 + $0x64] sm:$0xf]  ;;  %v5257_v25 = vor.u32 %v7623_v17, %v5256_v16  ;;  %v5704_v16 = vld [vmem:[#allocation2 + $0x3d8] sm:$0xf]  ;;  %v7639_v31 = vld [vmem:[#allocation2 + $0x10c] sm:$0xf] }
  0x5f   :  { %1214 = vmatpush.bf16.msra.mxu0 %v5457_v27  ;;  %v7613_v27 = vld [vmem:[#allocation2 + $0x34] sm:$0xf0]  ;;  %v5626_v46 = vld [vmem:[#allocation2 + $0x360] sm:$0xf0]  ;;  %v7704_v56 = vld [vmem:[#allocation2 + $0x30c] sm:$0xf0] }
  0x60   :  { %1227 = vmatpush.bf16.msra.mxu1 %v5777_v28  ;;  %v5577_v28 = vor.u32 %v7703_v20, %v5576_v18  ;;  %v7734_v18 = vld [vmem:[#allocation2 + $0x3fc] sm:$0xf0]  ;;  %v5386_v20 = vld [vmem:[#allocation2 + $0x180] sm:$0xf0]  ;;  %v5304_v38 = vld [vmem:[#allocation2 + $0xb8] sm:$0xf] }
  0x61   :  { %1240 = vmatpush.bf16.msra.mxu2 %v5461_v29  ;;  %v5261_v29 = vor.u32 %v7618_v21, %v5258_v22  ;;  %v7729_v21 = vld [vmem:[#allocation2 + $0x3dc] sm:$0xf]  ;;  %v5706_v22 = vld [vmem:[#allocation2 + $0x400] sm:$0xf0]  ;;  %v5266_v58 = vld [vmem:[#allocation2 + $0x90] sm:$0xf0] }
  0x62   :  { %1253 = vmatpush.bf16.msra.mxu3 %v5781_v33  ;;  %v5581_v33 = vor.u32 %v7698_v23, %v5578_v24  ;;  %v5705_v24 = vor.u32 %v7734_v18, %v5704_v16  ;;  %v5544_v2 = vld [vmem:[#allocation2 + $0x298] sm:$0xf]  ;;  %v7694_v3 = vld [vmem:[#allocation2 + $0x2bc] sm:$0xf0]  ;;  %v7760_v18 = vld [vmem:[#allocation2 + $0x4d4] sm:$0xf] }
  0x63   :  { %1215 = vmatpush.bf16.msra.mxu0 %v5417_v39  ;;  %v5824_v39 = vld [vmem:[#allocation2 + $0x4c8] sm:$0xf]  ;;  %v5545_v16 = vor.u32 %v7694_v3, %v5544_v2  ;;  %v7725_v2 = vld [vmem:[#allocation2 + $0x3b4] sm:$0xf0]  ;;  %v7640_v3 = vld [vmem:[#allocation2 + $0x114] sm:$0xf] }
  0x64   :  { %1228 = vmatpush.bf16.msra.mxu1 %v5737_v40  ;;  %v5217_v40 = vor.u32 %v7613_v27, %v5216_v26  ;;  %v5344_v26 = vld [vmem:[#allocation2 + $0x108] sm:$0xf]  ;;  %v7644_v27 = vld [vmem:[#allocation2 + $0x12c] sm:$0xf0]  ;;  %s5184_s12 = sshll.u32 %s8387_s3, 4  ;;  %s5186_s14 = sshll.u32 %s8762_s11, 4  ;;  %s5185_s12 = int_to_ptr.vmem [resolvable:$true] %s5184_s12  ;;  %s5187_s14 = int_to_ptr.hbm [resolvable:$true] %s5186_s14 }
  0x65   :  { %1241 = vmatpush.bf16.msra.mxu2 %v5421_v41  ;;  %v7764_v41 = vld [vmem:[#allocation2 + $0x4ec] sm:$0xf0]  ;;  %v5345_v35 = vor.u32 %v7644_v27, %v5344_v26  ;;  %v5792_v26 = vld [vmem:[#allocation2 + $0x480] sm:$0xf] }
  0x66   :  { %1254 = vmatpush.bf16.msra.mxu3 %v5741_v45  ;;  %v5221_v45 = vor.u32 %v7608_v32, %v5218_v34  ;;  %v5825_v51 = vor.u32 %v7764_v41, %v5824_v39  ;;  %v5346_v32 = vld [vmem:[#allocation2 + $0x130] sm:$0xf0]  ;;  %v7634_v39 = vld [vmem:[#allocation2 + $0xdc] sm:$0xf0] }
  0x67   :  { %1216 = vmatpush.bf16.msra.mxu0 %v5377_v52  ;;  %v5509_v52 = vor.u32 %v7679_v42, %v5506_v43  ;;  %v5666_v34 = vld [vmem:[#allocation2 + $0x3b0] sm:$0xf0]  ;;  %v5349_v37 = vor.u32 %v7639_v31, %v5346_v32  ;;  %v7714_v42 = vld [vmem:[#allocation2 + $0x35c] sm:$0xf0]  ;;  %v7629_v43 = vld [vmem:[#allocation2 + $0xbc] sm:$0xf]  ;;  %v5305_v47 = vor.u32 %v7634_v39, %v5304_v38 }
  0x68   :  { %1229 = vmatpush.bf16.msra.mxu1 %v5697_v53  ;;  %v5464_v53 = vld [vmem:[#allocation2 + $0x1f8] sm:$0xf]  ;;  %v7750_v31 = vld [vmem:[#allocation2 + $0x484] sm:$0xf]  ;;  %v5794_v32 = vld [vmem:[#allocation2 + $0x4a8] sm:$0xf0] }
  0x69   :  { %1242 = vmatpush.bf16.msra.mxu2 %v5381_v55  ;;  %v7674_v55 = vld [vmem:[#allocation2 + $0x21c] sm:$0xf0]  ;;  %v5752_v38 = vld [vmem:[#allocation2 + $0x430] sm:$0xf]  ;;  %v5797_v39 = vor.u32 %v7750_v31, %v5794_v32 }
  0x6a   :  { %1255 = vmatpush.bf16.msra.mxu3 %v5701_v59  ;;  %v7669_v59 = vld [vmem:[#allocation2 + $0x1fc] sm:$0xf]  ;;  %v5465_v63 = vor.u32 %v7674_v55, %v5464_v53  ;;  %v5584_v53 = vld [vmem:[#allocation2 + $0x2e8] sm:$0xf]  ;;  %v5232_v32 = vld [vmem:[#allocation2 + $0x20] sm:$0xf] }
  0x6b   :  { %1217 = vmatpush.bf16.msra.mxu0 %v5337_v1  ;;  %v5469_v1 = vor.u32 %v7669_v59, %v5466_v60  ;;  %v7699_v59 = vld [vmem:[#allocation2 + $0x2ec] sm:$0xf]  ;;  %v5586_v60 = vld [vmem:[#allocation2 + $0x310] sm:$0xf0] }
  0x6c   :  { %1230 = vmatpush.bf16.msra.mxu1 %v5657_v4  ;;  %v5744_v4 = vld [vmem:[#allocation2 + $0x428] sm:$0xf] }
  0x6d   :  { %1243 = vmatpush.bf16.msra.mxu2 %v5341_v5  ;;  %v5789_v5 = vor.u32 %v7749_v61, %v5786_v62  ;;  %v5745_v12 = vor.u32 %v7744_v6, %v5744_v4  ;;  %v5224_v62 = vld [vmem:[#allocation2 + $0x18] sm:$0xf]  ;;  %v7609_v4 = vld [vmem:[#allocation2 + $0x1c] sm:$0xf]  ;;  %v5226_v6 = vld [vmem:[#allocation2 + $0x40] sm:$0xf0] }
  0x6e   :  { %1256 = vmatpush.bf16.msra.mxu3 %v5661_v9  ;;  %v7739_v9 = vld [vmem:[#allocation2 + $0x42c] sm:$0xf] }
  0x6f   :  { %1218 = vmatpush.bf16.msra.mxu0 %v5297_v13  ;;  %v5429_v13 = vor.u32 %v7659_v7, %v5426_v8  ;;  %v5749_v17 = vor.u32 %v7739_v9, %v5746_v10  ;;  %v7689_v7 = vld [vmem:[#allocation2 + $0x29c] sm:$0xf]  ;;  %v5546_v8 = vld [vmem:[#allocation2 + $0x2c0] sm:$0xf0]  ;;  %v5512_v9 = vld [vmem:[#allocation2 + $0x250] sm:$0xf] }
  0x70   :  { %1231 = vmatpush.bf16.msra.mxu1 %v5617_v14  ;;  %v5384_v14 = vld [vmem:[#allocation2 + $0x158] sm:$0xf] }
  0x71   :  { %1244 = vmatpush.bf16.msra.mxu2 %v5301_v15  ;;  %v7654_v15 = vld [vmem:[#allocation2 + $0x17c] sm:$0xf0]  ;;  %v7685_v10 = vld [vmem:[#allocation2 + $0x274] sm:$0xf0] }
  0x72   :  { %1257 = vmatpush.bf16.msra.mxu3 %v5621_v19  ;;  %v7649_v19 = vld [vmem:[#allocation2 + $0x15c] sm:$0xf]  ;;  %v5385_v23 = vor.u32 %v7654_v15, %v5384_v14  ;;  %v7680_v14 = vld [vmem:[#allocation2 + $0x254] sm:$0xf] }
  0x73   :  { %1219 = vmatpush.bf16.msra.mxu0 %v5257_v25  ;;  %v5389_v25 = vor.u32 %v7649_v19, %v5386_v20  ;;  %v5514_v15 = vld [vmem:[#allocation2 + $0x278] sm:$0xf0]  ;;  %v5549_v20 = vor.u32 %v7689_v7, %v5546_v8 }
  0x74   :  { %1232 = vmatpush.bf16.msra.mxu1 %v5577_v28  ;;  %v5664_v28 = vld [vmem:[#allocation2 + $0x388] sm:$0xf]  ;;  %v5834_v19 = vld [vmem:[#allocation2 + $0x4f8] sm:$0xf0] }
  0x75   :  { %1245 = vmatpush.bf16.msra.mxu2 %v5261_v29  ;;  %v5709_v29 = vor.u32 %v7729_v21, %v5706_v22  ;;  %v5665_v36 = vor.u32 %v7724_v30, %v5664_v28  ;;  %v5513_v21 = vor.u32 %v7685_v10, %v5512_v9  ;;  %v5837_v27 = vor.u32 %v7760_v18, %v5834_v19  ;;  %v7755_v28 = vld [vmem:[#allocation2 + $0x4a4] sm:$0xf0]  ;;  %v5474_v30 = vld [vmem:[#allocation2 + $0x228] sm:$0xf0]  ;;  %v5312_v10 = vld [vmem:[#allocation2 + $0xc0] sm:$0xf] }
  0x76   :  { %1258 = vmatpush.bf16.msra.mxu3 %v5581_v33  ;;  %v7719_v33 = vld [vmem:[#allocation2 + $0x38c] sm:$0xf] }
  0x77   :  { %1220 = vmatpush.bf16.msra.mxu0 %v5217_v40  ;;  %v5624_v40 = vld [vmem:[#allocation2 + $0x338] sm:$0xf]  ;;  %v5669_v41 = vor.u32 %v7719_v33, %v5666_v34  ;;  %v5793_v34 = vor.u32 %v7755_v28, %v5792_v26  ;;  %v5634_v18 = vld [vmem:[#allocation2 + $0x368] sm:$0xf0]  ;;  %v5274_v28 = vld [vmem:[#allocation2 + $0x98] sm:$0xf0] }
  0x78   :  { %1233 = vmatpush.bf16.msra.mxu1 %v5537_v44  ;;  %v5306_v44 = vld [vmem:[#allocation2 + $0xe0] sm:$0xf0]  ;;  %v7705_v26 = vld [vmem:[#allocation2 + $0x314] sm:$0xf0] }
  0x79   :  { %1246 = vmatpush.bf16.msra.mxu2 %v5221_v45  ;;  %v7709_v45 = vld [vmem:[#allocation2 + $0x33c] sm:$0xf] }
  0x7a   :  { %1259 = vmatpush.bf16.msra.mxu3 %v5541_v48  ;;  %1221 = vmatmul.bf16.vlgmr.msra.gmra.mxu0 %v8466_v50  ;;  %v5625_v48 = vor.u32 %v7714_v42, %v5624_v40  ;;  %v5629_v55 = vor.u32 %v7709_v45, %v5626_v46  ;;  %v7745_v40 = vld [vmem:[#allocation2 + $0x454] sm:$0xf0]  ;;  %v5434_v42 = vld [vmem:[#allocation2 + $0x1d8] sm:$0xf0] }
  0x7b   :  { %1265 = vmatpush.bf16.msrb.mxu0 %v5505_v49  ;;  %1234 = vmatmul.bf16.vlgmr.msra.gmra.mxu1 %v8468_v54  ;;  %v5309_v49 = vor.u32 %v7629_v43, %v5306_v44  ;;  %v7740_v43 = vld [vmem:[#allocation2 + $0x434] sm:$0xf]  ;;  %v5754_v44 = vld [vmem:[#allocation2 + $0x458] sm:$0xf0]  ;;  %v5753_v46 = vor.u32 %v7745_v40, %v5752_v38  ;;  %v7610_v38 = vld [vmem:[#allocation2 + $0x24] sm:$0xf] }
  0x7c   :  { %1278 = vmatpush.bf16.msrb.mxu1 %v5825_v51  ;;  %1247 = vmatmul.bf16.vlgmr.msra.gmra.mxu2 %v8466_v50  ;;  %v5264_v51 = vld [vmem:[#allocation2 + $0x68] sm:$0xf]  ;;  %v5234_v40 = vld [vmem:[#allocation2 + $0x48] sm:$0xf0] }
  0x7d   :  { %1291 = vmatpush.bf16.msrb.mxu2 %v5509_v52  ;;  %1260 = vmatmul.bf16.vlgmr.msra.gmra.mxu3 %v8468_v54  ;;  %v7624_v52 = vld [vmem:[#allocation2 + $0x8c] sm:$0xf0] }
  0x7e   :  { %1304 = vmatpush.bf16.msrb.mxu3 %v5829_v57  ;;  %v7619_v57 = vld [vmem:[#allocation2 + $0x6c] sm:$0xf]  ;;  %v5265_v61 = vor.u32 %v7624_v52, %v5264_v51  ;;  %v5712_v51 = vld [vmem:[#allocation2 + $0x3e0] sm:$0xf]  ;;  %v5757_v52 = vor.u32 %v7740_v43, %v5754_v44  ;;  %v5896_v43 = vld [vmem:[#allocation5 + $0x70] sm:$0xf] }
  0x7f   :  { %1266 = vmatpush.bf16.msrb.mxu0 %v5465_v63  ;;  %v7614_v63 = vld [vmem:[#allocation2 + $0x3c] sm:$0xf0]  ;;  %v7781_v44 = vld [vmem:[#allocation5 + $0x74] sm:$0xf0] }
  0x80   :  { %1279 = vmatpush.bf16.msrb.mxu1 %v5785_v0  ;;  %v5585_v0 = vor.u32 %v7704_v56, %v5584_v53  ;;  %v7735_v53 = vld [vmem:[#allocation2 + $0x404] sm:$0xf0]  ;;  %v5394_v56 = vld [vmem:[#allocation2 + $0x188] sm:$0xf0] }
  0x81   :  { %1292 = vmatpush.bf16.msrb.mxu2 %v5469_v1  ;;  %v5269_v1 = vor.u32 %v7619_v57, %v5266_v58  ;;  %v7730_v57 = vld [vmem:[#allocation2 + $0x3e4] sm:$0xf]  ;;  %v5714_v58 = vld [vmem:[#allocation2 + $0x408] sm:$0xf0] }
  0x82   :  { %1305 = vmatpush.bf16.msrb.mxu3 %v5789_v5  ;;  %v5589_v5 = vor.u32 %v7699_v59, %v5586_v60  ;;  %v5713_v60 = vor.u32 %v7735_v53, %v5712_v51  ;;  %v7796_v53 = vld [vmem:[#allocation5 + $0xf4] sm:$0xf] }
  0x83   :  { %1267 = vmatpush.bf16.msrb.mxu0 %v5425_v11  ;;  %v5832_v11 = vld [vmem:[#allocation2 + $0x4d0] sm:$0xf] }
  0x84   :  { %1280 = vmatpush.bf16.msrb.mxu1 %v5745_v12  ;;  %v5225_v12 = vor.u32 %v7614_v63, %v5224_v62  ;;  %v5352_v62 = vld [vmem:[#allocation2 + $0x110] sm:$0xf]  ;;  %v7645_v63 = vld [vmem:[#allocation2 + $0x134] sm:$0xf0] }
  0x85   :  { %1293 = vmatpush.bf16.msrb.mxu2 %v5429_v13  ;;  %v7765_v13 = vld [vmem:[#allocation2 + $0x4f4] sm:$0xf0]  ;;  %v5353_v7 = vor.u32 %v7645_v63, %v5352_v62  ;;  %v5952_v62 = vld [vmem:[#allocation5 + $0xe0] sm:$0xf] }
  0x86   :  { %1306 = vmatpush.bf16.msrb.mxu3 %v5749_v17  ;;  %v5229_v17 = vor.u32 %v7609_v4, %v5226_v6  ;;  %v5833_v22 = vor.u32 %v7765_v13, %v5832_v11  ;;  %v5354_v4 = vld [vmem:[#allocation2 + $0x138] sm:$0xf0]  ;;  %v7635_v11 = vld [vmem:[#allocation2 + $0xe4] sm:$0xf0] }
  0x87   :  { %1268 = vmatpush.bf16.msrb.mxu0 %v5385_v23  ;;  %v5517_v23 = vor.u32 %v7680_v14, %v5514_v15  ;;  %v5674_v6 = vld [vmem:[#allocation2 + $0x3b8] sm:$0xf0]  ;;  %v5357_v9 = vor.u32 %v7640_v3, %v5354_v4  ;;  %v7715_v14 = vld [vmem:[#allocation2 + $0x364] sm:$0xf0]  ;;  %v7630_v15 = vld [vmem:[#allocation2 + $0xc4] sm:$0xf]  ;;  %v5313_v19 = vor.u32 %v7635_v11, %v5312_v10 }
  0x88   :  { %1281 = vmatpush.bf16.msrb.mxu1 %v5705_v24  ;;  %v5472_v24 = vld [vmem:[#allocation2 + $0x200] sm:$0xf]  ;;  %v7794_v3 = vld [vmem:[#allocation5 + $0xe4] sm:$0xf]  ;;  %v5954_v4 = vld [vmem:[#allocation5 + $0xe8] sm:$0xf0] }
  0x89   :  { %1294 = vmatpush.bf16.msrb.mxu2 %v5389_v25  ;;  %v7675_v25 = vld [vmem:[#allocation2 + $0x224] sm:$0xf0]  ;;  %v5944_v10 = vld [vmem:[#allocation5 + $0xd0] sm:$0xf]  ;;  %v5957_v11 = vor.u32 %v7794_v3, %v5954_v4 }
  0x8a   :  { %1307 = vmatpush.bf16.msrb.mxu3 %v5709_v29  ;;  %v7670_v29 = vld [vmem:[#allocation2 + $0x204] sm:$0xf]  ;;  %v5473_v33 = vor.u32 %v7675_v25, %v5472_v24  ;;  %v5592_v24 = vld [vmem:[#allocation2 + $0x2f0] sm:$0xf] }
  0x8b   :  { %1269 = vmatpush.bf16.msrb.mxu0 %v5345_v35  ;;  %v5477_v35 = vor.u32 %v7670_v29, %v5474_v30  ;;  %v7700_v29 = vld [vmem:[#allocation2 + $0x2f4] sm:$0xf]  ;;  %v5594_v30 = vld [vmem:[#allocation2 + $0x318] sm:$0xf0]  ;;  %v5848_v4 = vld [vmem:[#allocation5 + $0x10] sm:$0xf] }
  0x8c   :  { %1282 = vmatpush.bf16.msrb.mxu1 %v5665_v36  ;;  %v5432_v36 = vld [vmem:[#allocation2 + $0x1b0] sm:$0xf] }
  0x8d   :  { %1295 = vmatpush.bf16.msrb.mxu2 %v5349_v37  ;;  %v7665_v37 = vld [vmem:[#allocation2 + $0x1d4] sm:$0xf0] }
  0x8e   :  { %1308 = vmatpush.bf16.msrb.mxu3 %v5669_v41  ;;  %v7660_v41 = vld [vmem:[#allocation2 + $0x1b4] sm:$0xf]  ;;  %v5433_v45 = vor.u32 %v7665_v37, %v5432_v36  ;;  %v5552_v36 = vld [vmem:[#allocation2 + $0x2a0] sm:$0xf]  ;;  %v7695_v37 = vld [vmem:[#allocation2 + $0x2c4] sm:$0xf0] }
  0x8f   :  { %1270 = vmatpush.bf16.msrb.mxu0 %v5305_v47  ;;  %v5437_v47 = vor.u32 %v7660_v41, %v5434_v42  ;;  %v7690_v41 = vld [vmem:[#allocation2 + $0x2a4] sm:$0xf]  ;;  %v5554_v42 = vld [vmem:[#allocation2 + $0x2c8] sm:$0xf0]  ;;  %v5553_v51 = vor.u32 %v7695_v37, %v5552_v36  ;;  %v7789_v36 = vld [vmem:[#allocation5 + $0xb4] sm:$0xf0] }
  0x90   :  { %1283 = vmatpush.bf16.msrb.mxu1 %v5625_v48  ;;  %v5392_v48 = vld [vmem:[#allocation2 + $0x160] sm:$0xf] }
  0x91   :  { %1296 = vmatpush.bf16.msrb.mxu2 %v5309_v49  ;;  %v7655_v49 = vld [vmem:[#allocation2 + $0x184] sm:$0xf0] }
  0x92   :  { %1309 = vmatpush.bf16.msrb.mxu3 %v5629_v55  ;;  %v7650_v55 = vld [vmem:[#allocation2 + $0x164] sm:$0xf]  ;;  %v5393_v59 = vor.u32 %v7655_v49, %v5392_v48  ;;  %v7780_v48 = vld [vmem:[#allocation5 + $0x74] sm:$0xf]  ;;  %v5898_v49 = vld [vmem:[#allocation5 + $0x78] sm:$0xf0] }
  0x93   :  { %1271 = vmatpush.bf16.msrb.mxu0 %v5265_v61  ;;  %v5397_v61 = vor.u32 %v7650_v55, %v5394_v56  ;;  %v5962_v55 = vld [vmem:[#allocation5 + $0xf8] sm:$0xf0]  ;;  %v5557_v56 = vor.u32 %v7690_v41, %v5554_v42  ;;  %v7788_v42 = vld [vmem:[#allocation5 + $0xb4] sm:$0xf] }
  0x94   :  { %1284 = vmatpush.bf16.msrb.mxu1 %v5585_v0  ;;  %v5672_v0 = vld [vmem:[#allocation2 + $0x390] sm:$0xf]  ;;  %v5965_v63 = vor.u32 %v7796_v53, %v5962_v55 }
  0x95   :  { %1297 = vmatpush.bf16.msrb.mxu2 %v5269_v1  ;;  %v5717_v1 = vor.u32 %v7730_v57, %v5714_v58  ;;  %v5673_v8 = vor.u32 %v7725_v2, %v5672_v0  ;;  %v5897_v57 = vor.u32 %v7781_v44, %v5896_v43  ;;  %v7795_v0 = vld [vmem:[#allocation5 + $0xe4] sm:$0xf0]  ;;  %v5890_v2 = vld [vmem:[#allocation5 + $0x68] sm:$0xf0]  ;;  %v5930_v43 = vld [vmem:[#allocation5 + $0xb8] sm:$0xf0] }
  0x96   :  { %1310 = vmatpush.bf16.msrb.mxu3 %v5589_v5  ;;  %v7720_v5 = vld [vmem:[#allocation2 + $0x394] sm:$0xf]  ;;  %v5933_v53 = vor.u32 %v7788_v42, %v5930_v43 }
  0x97   :  { %1272 = vmatpush.bf16.msrb.mxu0 %v5225_v12  ;;  %v5632_v12 = vld [vmem:[#allocation2 + $0x340] sm:$0xf]  ;;  %v5677_v13 = vor.u32 %v7720_v5, %v5674_v6  ;;  %v5953_v6 = vor.u32 %v7795_v0, %v5952_v62 }
  0x98   :  { %1285 = vmatpush.bf16.msrb.mxu1 %v5545_v16  ;;  %v5314_v16 = vld [vmem:[#allocation2 + $0xe8] sm:$0xf0] }
  0x99   :  { %1298 = vmatpush.bf16.msrb.mxu2 %v5229_v17  ;;  %v7710_v17 = vld [vmem:[#allocation2 + $0x344] sm:$0xf] }
  0x9a   :  { %1311 = vmatpush.bf16.msrb.mxu3 %v5549_v20  ;;  %1273 = vmatmul.bf16.vlgmr.msrb.gmra.mxu0 %v8466_v50  ;;  %v5633_v20 = vor.u32 %v7715_v14, %v5632_v12  ;;  %v5637_v25 = vor.u32 %v7710_v17, %v5634_v18  ;;  %v7793_v12 = vld [vmem:[#allocation5 + $0xd4] sm:$0xf0]  ;;  %v5882_v14 = vld [vmem:[#allocation5 + $0x58] sm:$0xf0] }
  0x9b   :  { %1317 = vmatpush.bf16.msra.mxu0 %v5513_v21  ;;  %1286 = vmatmul.bf16.vlgmr.msrb.gmra.mxu1 %v8468_v54  ;;  %v5317_v21 = vor.u32 %v7630_v15, %v5314_v16  ;;  %v7792_v15 = vld [vmem:[#allocation5 + $0xd4] sm:$0xf]  ;;  %v5946_v16 = vld [vmem:[#allocation5 + $0xd8] sm:$0xf0]  ;;  %v5945_v18 = vor.u32 %v7793_v12, %v5944_v10 }
  0x9c   :  { %1330 = vmatpush.bf16.msra.mxu1 %v5833_v22  ;;  %1299 = vmatmul.bf16.vlgmr.msrb.gmra.mxu2 %v8466_v50  ;;  %v5272_v22 = vld [vmem:[#allocation2 + $0x70] sm:$0xf]  ;;  %v7768_v10 = vld [vmem:[#allocation5 + $0x14] sm:$0xf] }
  0x9d   :  { %1343 = vmatpush.bf16.msra.mxu2 %v5517_v23  ;;  %1312 = vmatmul.bf16.vlgmr.msrb.gmra.mxu3 %v8468_v54  ;;  %v7625_v23 = vld [vmem:[#allocation2 + $0x94] sm:$0xf0]  ;;  %v7784_v12 = vld [vmem:[#allocation5 + $0x94] sm:$0xf] }
  0x9e   :  { %1356 = vmatpush.bf16.msra.mxu3 %v5837_v27  ;;  %v7620_v27 = vld [vmem:[#allocation2 + $0x74] sm:$0xf]  ;;  %v5273_v31 = vor.u32 %v7625_v23, %v5272_v22  ;;  %v5936_v22 = vld [vmem:[#allocation5 + $0xc0] sm:$0xf]  ;;  %v5949_v23 = vor.u32 %v7792_v15, %v5946_v16  ;;  %v7767_v16 = vld [vmem:[#allocation5 + $0x4] sm:$0xf0] }
  0x9f   :  { %1318 = vmatpush.bf16.msra.mxu0 %v5473_v33  ;;  %v7615_v33 = vld [vmem:[#allocation2 + $0x44] sm:$0xf0]  ;;  %v5840_v15 = vld [vmem:[#allocation5] sm:$0xf] }
  0xa0   :  { %1331 = vmatpush.bf16.msra.mxu1 %v5793_v34  ;;  %v5593_v34 = vor.u32 %v7705_v26, %v5592_v24  ;;  %v7791_v24 = vld [vmem:[#allocation5 + $0xc4] sm:$0xf0]  ;;  %v5874_v26 = vld [vmem:[#allocation5 + $0x48] sm:$0xf0] }
  0xa1   :  { %1344 = vmatpush.bf16.msra.mxu2 %v5477_v35  ;;  %v5277_v35 = vor.u32 %v7620_v27, %v5274_v28  ;;  %v7790_v27 = vld [vmem:[#allocation5 + $0xc4] sm:$0xf]  ;;  %v5938_v28 = vld [vmem:[#allocation5 + $0xc8] sm:$0xf0] }
  0xa2   :  { %1357 = vmatpush.bf16.msra.mxu3 %v5797_v39  ;;  %v5597_v39 = vor.u32 %v7700_v29, %v5594_v30  ;;  %v5864_v30 = vld [vmem:[#allocation5 + $0x30] sm:$0xf]  ;;  %v5941_v37 = vor.u32 %v7790_v27, %v5938_v28  ;;  %v5842_v27 = vld [vmem:[#allocation5 + $0x8] sm:$0xf0]  ;;  %v7782_v28 = vld [vmem:[#allocation5 + $0x84] sm:$0xf] }
  0xa3   :  { %1319 = vmatpush.bf16.msra.mxu0 %v5433_v45  ;;  %v5960_v45 = vld [vmem:[#allocation5 + $0xf0] sm:$0xf] }
  0xa4   :  { %1332 = vmatpush.bf16.msra.mxu1 %v5753_v46  ;;  %v5233_v46 = vor.u32 %v7615_v33, %v5232_v32 }
  0xa5   :  { %1345 = vmatpush.bf16.msra.mxu2 %v5437_v47  ;;  %v7797_v47 = vld [vmem:[#allocation5 + $0xf4] sm:$0xf0] }
  0xa6   :  { %1358 = vmatpush.bf16.msra.mxu3 %v5757_v52  ;;  %v5237_v52 = vor.u32 %v7610_v38, %v5234_v40  ;;  %v5961_v58 = vor.u32 %v7797_v47, %v5960_v45  ;;  %v5866_v40 = vld [vmem:[#allocation5 + $0x38] sm:$0xf0] }
  0xa7   :  { %1320 = vmatpush.bf16.msra.mxu0 %v5393_v59  ;;  %v5901_v59 = vor.u32 %v7780_v48, %v5898_v49  ;;  %v5856_v48 = vld [vmem:[#allocation5 + $0x20] sm:$0xf]  ;;  %v7771_v49 = vld [vmem:[#allocation5 + $0x24] sm:$0xf0] }
  0xa8   :  { %1333 = vmatpush.bf16.msra.mxu1 %v5713_v60  ;;  %v5888_v60 = vld [vmem:[#allocation5 + $0x60] sm:$0xf]  ;;  %v5857_v62 = vor.u32 %v7771_v49, %v5856_v48 }
  0xa9   :  { %1346 = vmatpush.bf16.msra.mxu2 %v5397_v61  ;;  %v7779_v61 = vld [vmem:[#allocation5 + $0x64] sm:$0xf0] }
  0xaa   :  { %1359 = vmatpush.bf16.msra.mxu3 %v5717_v1  ;;  %v7778_v1 = vld [vmem:[#allocation5 + $0x64] sm:$0xf]  ;;  %v5889_v5 = vor.u32 %v7779_v61, %v5888_v60  ;;  %v5922_v61 = vld [vmem:[#allocation5 + $0xa8] sm:$0xf0] }
  0xab   :  { %1321 = vmatpush.bf16.msra.mxu0 %v5353_v7  ;;  %v5893_v7 = vor.u32 %v7778_v1, %v5890_v2  ;;  %v7786_v60 = vld [vmem:[#allocation5 + $0xa4] sm:$0xf] }
  0xac   :  { %1334 = vmatpush.bf16.msra.mxu1 %v5673_v8  ;;  %v5880_v8 = vld [vmem:[#allocation5 + $0x50] sm:$0xf] }
  0xad   :  { %1347 = vmatpush.bf16.msra.mxu2 %v5357_v9  ;;  %v7777_v9 = vld [vmem:[#allocation5 + $0x54] sm:$0xf0] }
  0xae   :  { %1360 = vmatpush.bf16.msra.mxu3 %v5677_v13  ;;  %v7776_v13 = vld [vmem:[#allocation5 + $0x54] sm:$0xf]  ;;  %v5881_v17 = vor.u32 %v7777_v9, %v5880_v8  ;;  %v5925_v8 = vor.u32 %v7786_v60, %v5922_v61  ;;  %v7785_v9 = vld [vmem:[#allocation5 + $0x94] sm:$0xf0] }
  0xaf   :  { %1322 = vmatpush.bf16.msra.mxu0 %v5313_v19  ;;  %v5885_v19 = vor.u32 %v7776_v13, %v5882_v14  ;;  %v5914_v13 = vld [vmem:[#allocation5 + $0x98] sm:$0xf0] }
  0xb0   :  { %1335 = vmatpush.bf16.msra.mxu1 %v5633_v20  ;;  %v5872_v20 = vld [vmem:[#allocation5 + $0x40] sm:$0xf] }
  0xb1   :  { %1348 = vmatpush.bf16.msra.mxu2 %v5317_v21  ;;  %v7775_v21 = vld [vmem:[#allocation5 + $0x44] sm:$0xf0] }
  0xb2   :  { %1361 = vmatpush.bf16.msra.mxu3 %v5637_v25  ;;  %v7774_v25 = vld [vmem:[#allocation5 + $0x44] sm:$0xf] }
  0xb3   :  { %1323 = vmatpush.bf16.msra.mxu0 %v5273_v31  ;;  %v5937_v31 = vor.u32 %v7791_v24, %v5936_v22  ;;  %v5877_v32 = vor.u32 %v7774_v25, %v5874_v26  ;;  %v7783_v22 = vld [vmem:[#allocation5 + $0x84] sm:$0xf0]  ;;  %v5917_v25 = vor.u32 %v7784_v12, %v5914_v13  ;;  %v7826_v13 = vld [vmem:[#allocation7 + $0xe4] sm:$0xf] }
  0xb4   :  { %1336 = vmatpush.bf16.msra.mxu1 %v5593_v34  ;;  %v7773_v34 = vld [vmem:[#allocation5 + $0x34] sm:$0xf0] }
  0xb5   :  { %1349 = vmatpush.bf16.msra.mxu2 %v5277_v35  ;;  %v5928_v35 = vld [vmem:[#allocation5 + $0xb0] sm:$0xf]  ;;  %v5865_v44 = vor.u32 %v7773_v34, %v5864_v30 }
  0xb6   :  { %1362 = vmatpush.bf16.msra.mxu3 %v5597_v39  ;;  %v7772_v39 = vld [vmem:[#allocation5 + $0x34] sm:$0xf]  ;;  %v5929_v45 = vor.u32 %v7789_v36, %v5928_v35 }
  0xb7   :  { %1324 = vmatpush.bf16.msra.mxu0 %v5233_v46  ;;  %v1118_v29 = vpop.f32.mrf.mxu0  ;;  %v5869_v46 = vor.u32 %v7772_v39, %v5866_v40 }
  0xb8   :  { %1337 = vmatpush.bf16.msra.mxu1 %v5553_v51  ;;  %v1131_v33 = vpop.f32.mrf.mxu1  ;;  %v5920_v51 = vld [vmem:[#allocation5 + $0xa0] sm:$0xf] }
  0xb9   :  { %1350 = vmatpush.bf16.msra.mxu2 %v5237_v52 }
  0xba   :  { %1363 = vmatpush.bf16.msra.mxu3 %v5557_v56  ;;  %1325 = vmatmul.bf16.vlgmr.msra.gmra.mxu0 %v8466_v50 }
  0xbb   :  { %1599 = vmatpush.bf16.msrb.mxu0 %v5897_v57  ;;  %1338 = vmatmul.bf16.vlgmr.msra.gmra.mxu1 %v8468_v54  ;;  %v7787_v57 = vld [vmem:[#allocation5 + $0xa4] sm:$0xf0] }
  0xbc   :  { %1612 = vmatpush.bf16.msrb.mxu1 %v5961_v58  ;;  %1351 = vmatmul.bf16.vlgmr.msra.gmra.mxu2 %v8466_v50  ;;  %v8493_v50 = vld [vmem:[%s8753_s2] sm:$0xff]  ;;  %v5921_v1 = vor.u32 %v7787_v57, %v5920_v51 }
  0xbd   :  { %1625 = vmatpush.bf16.msrb.mxu2 %v5901_v59  ;;  %1364 = vmatmul.bf16.vlgmr.msra.gmra.mxu3 %v8468_v54  ;;  %v5873_v54 = vor.u32 %v7775_v21, %v5872_v20  ;;  %v282_v38 = vperm.slane %v8493_v50, 0  ;;  %v283_v41 = vperm.slane %v8493_v50, 1  ;;  %v7770_v58 = vld [vmem:[#allocation5 + $0x24] sm:$0xf]  ;;  %v5858_v59 = vld [vmem:[#allocation5 + $0x28] sm:$0xf0] }
  0xbe   :  { %1638 = vmatpush.bf16.msrb.mxu3 %v5965_v63  ;;  %v5861_v2 = vor.u32 %v7770_v58, %v5858_v59  ;;  %v287_v57 = vperm.slane %v8493_v50, 5 }
  0xbf   :  { %1600 = vmatpush.bf16.msrb.mxu0 %v5889_v5  ;;  %v1144_v47 = vpop.f32.mrf.mxu2  ;;  %v1119_v52 = vadd.f32 %v1118_v29, %v282_v38  ;;  %v1120_v63 = vpop.f32.mrf.mxu0  ;;  %v7769_v5 = vld [vmem:[#allocation5 + $0x14] sm:$0xf0]  ;;  %v5841_v29 = vor.u32 %v7767_v16, %v5840_v15 }
  0xc0   :  { %1613 = vmatpush.bf16.msrb.mxu1 %v5953_v6  ;;  %v1145_v55 = vadd.f32 %v1144_v47, %v283_v41  ;;  %v1157_v56 = vpop.f32.mrf.mxu3  ;;  %v1133_v3 = vpop.f32.mrf.mxu1  ;;  %v5912_v6 = vld [vmem:[#allocation5 + $0x90] sm:$0xf]  ;;  %v5849_v14 = vor.u32 %v7769_v5, %v5848_v4  ;;  %v285_v41 = vperm.slane %v8493_v50, 3  ;;  %v6026_v63 = vld [vmem:[#allocation7 + $0x78] sm:$0xf0] }
  0xc1   :  { %1626 = vmatpush.bf16.msrb.mxu2 %v5893_v7  ;;  %v1132_v7 = vadd.f32 %v1131_v33, %v1119_v52  ;;  %v286_v52 = vperm.slane %v8493_v50, 4  ;;  %v7810_v4 = vld [vmem:[#allocation7 + $0x64] sm:$0xf]  ;;  %v6018_v5 = vld [vmem:[#allocation7 + $0x68] sm:$0xf0] }
  0xc2   :  { %1639 = vmatpush.bf16.msrb.mxu3 %v5957_v11  ;;  %v1158_v0 = vadd.f32 %v1157_v56, %v1145_v55  ;;  %v5850_v11 = vld [vmem:[#allocation5 + $0x18] sm:$0xf0] }
  0xc3   :  { %1601 = vmatpush.bf16.msrb.mxu0 %v5881_v17  ;;  %v5904_v17 = vld [vmem:[#allocation5 + $0x80] sm:$0xf]  ;;  %v5853_v20 = vor.u32 %v7768_v10, %v5850_v11  ;;  %v1379_v24 = vmul.f32 0.01, %v1132_v7  ;;  %vm1369_vm1 = vcmp.gt.f32.partialorder %v1132_v7, 0.0 }
  0xc4   :  { %1614 = vmatpush.bf16.msrb.mxu1 %v5945_v18  ;;  %v1380_v18 = vmul.f32 0.01, %v1158_v0  ;;  %vm1370_vm0 = vcmp.gt.f32.partialorder %v1158_v0, 0.0  ;;  %v6010_v10 = vld [vmem:[#allocation7 + $0x58] sm:$0xf0] }
  0xc5   :  { %1627 = vmatpush.bf16.msrb.mxu2 %v5885_v19  ;;  %v5913_v19 = vor.u32 %v7785_v9, %v5912_v6  ;;  %v8499_v33 = vsel %vm1369_vm1, %v1132_v7, %v1379_v24  ;;  %v7828_v6 = vld [vmem:[#allocation7 + $0xf4] sm:$0xf]  ;;  %v6021_v7 = vor.u32 %v7810_v4, %v6018_v5  ;;  %v288_v24 = vperm.slane %v8493_v50, 6 }
  0xc6   :  { %1640 = vmatpush.bf16.msrb.mxu3 %v5949_v23  ;;  %v7766_v23 = vld [vmem:[#allocation5 + $0x4] sm:$0xf]  ;;  %v8497_v30 = vsel %vm1370_vm0, %v1158_v0, %v1380_v18  ;;  %v1399_v36 = vpack.c.bf16 %v8499_v33, %v8499_v33  ;;  %v7808_v9 = vld [vmem:[#allocation7 + $0x54] sm:$0xf]  ;;  %v7813_v18 = vld [vmem:[#allocation7 + $0x74] sm:$0xf0] }
  0xc7   :  { %1602 = vmatpush.bf16.msrb.mxu0 %v5873_v54  ;;  %v1146_v21 = vpop.f32.mrf.mxu2  ;;  %v5906_v54 = vld [vmem:[#allocation5 + $0x88] sm:$0xf0]  ;;  %v1400_v35 = vpack.c.bf16 %v8497_v30, %v8497_v30  ;;  %v6013_v16 = vor.u32 %v7808_v9, %v6010_v10  ;;  %v6000_v9 = vld [vmem:[#allocation7 + $0x40] sm:$0xf] }
  0xc8   :  { %1615 = vmatpush.bf16.msrb.mxu1 %v5937_v31  ;;  %v1159_v26 = vpop.f32.mrf.mxu3  ;;  %v5905_v31 = vor.u32 %v7783_v22, %v5904_v17  ;;  %v5909_v34 = vor.u32 %v7782_v28, %v5906_v54  ;;  %v6024_v17 = vld [vmem:[#allocation7 + $0x70] sm:$0xf]  ;;  %v6002_v21 = vld [vmem:[#allocation7 + $0x48] sm:$0xf0] }
  0xc9   :  { %1628 = vmatpush.bf16.msrb.mxu2 %v5877_v32  ;;  %v5845_v32 = vor.u32 %v7766_v23, %v5842_v27  ;;  %v6025_v22 = vor.u32 %v7813_v18, %v6024_v17  ;;  %v6074_v26 = vld [vmem:[#allocation7 + $0xd8] sm:$0xf0]  ;;  %v7825_v17 = vld [vmem:[#allocation7 + $0xd4] sm:$0xf0]  ;;  %v7798_v18 = vld [vmem:[#allocation7 + $0x4] sm:$0xf] }
  0xca   :  { %1641 = vmatpush.bf16.msrb.mxu3 %v5941_v37  ;;  %v284_v37 = vperm.slane %v8493_v50, 2 }
  0xcb   :  { %1603 = vmatpush.bf16.msrb.mxu0 %v5865_v44 }
  0xcc   :  { %1616 = vmatpush.bf16.msrb.mxu1 %v5929_v45 }
  0xcd   :  { %1629 = vmatpush.bf16.msrb.mxu2 %v5869_v46 }
  0xce   :  { %1642 = vmatpush.bf16.msrb.mxu3 %v5933_v53 }
  0xcf   :  { %1604 = vmatpush.bf16.msrb.mxu0 %v5857_v62  ;;  %v7812_v62 = vld [vmem:[#allocation7 + $0x74] sm:$0xf] }
  0xd0   :  { %1617 = vmatpush.bf16.msrb.mxu1 %v5921_v1  ;;  %v6029_v0 = vor.u32 %v7812_v62, %v6026_v63 }
  0xd1   :  { %1630 = vmatpush.bf16.msrb.mxu2 %v5861_v2 }
  0xd2   :  { %1643 = vmatpush.bf16.msrb.mxu3 %v5925_v8  ;;  %v6090_v8 = vld [vmem:[#allocation7 + $0xf8] sm:$0xf0] }
  0xd3   :  { %1605 = vmatpush.bf16.msrb.mxu0 %v5849_v14  ;;  %v6093_v12 = vor.u32 %v7828_v6, %v6090_v8  ;;  %v6082_v14 = vld [vmem:[#allocation7 + $0xe8] sm:$0xf0]  ;;  %v5978_v8 = vld [vmem:[#allocation7 + $0x18] sm:$0xf0] }
  0xd4   :  { %1618 = vmatpush.bf16.msrb.mxu1 %v5913_v19  ;;  %v6085_v19 = vor.u32 %v7826_v13, %v6082_v14  ;;  %v6050_v13 = vld [vmem:[#allocation7 + $0xa8] sm:$0xf0] }
  0xd5   :  { %1631 = vmatpush.bf16.msrb.mxu2 %v5853_v20  ;;  %v7806_v20 = vld [vmem:[#allocation7 + $0x44] sm:$0xf] }
  0xd6   :  { %1644 = vmatpush.bf16.msrb.mxu3 %v5917_v25  ;;  %v6005_v23 = vor.u32 %v7806_v20, %v6002_v21  ;;  %v7824_v25 = vld [vmem:[#allocation7 + $0xd4] sm:$0xf]  ;;  %v5992_v20 = vld [vmem:[#allocation7 + $0x30] sm:$0xf]  ;;  %v7805_v21 = vld [vmem:[#allocation7 + $0x34] sm:$0xf0] }
  0xd7   :  { %1606 = vmatpush.bf16.msrb.mxu0 %v5841_v29  ;;  %v1170_v38 = vpop.f32.mrf.mxu0  ;;  %v6077_v28 = vor.u32 %v7824_v25, %v6074_v26  ;;  %v7861_v25 = vld [vmem:[#allocation5 + $0x174] sm:$0xf0]  ;;  %v7816_v26 = vld [vmem:[#allocation7 + $0x94] sm:$0xf] }
  0xd8   :  { %1619 = vmatpush.bf16.msrb.mxu1 %v5905_v31  ;;  %v1171_v39 = vadd.f32 %v1170_v38, %v284_v37  ;;  %v1183_v40 = vpop.f32.mrf.mxu1  ;;  %v289_v31 = vperm.slane %v8493_v50, 7  ;;  %v7804_v37 = vld [vmem:[#allocation7 + $0x34] sm:$0xf]  ;;  %v5994_v38 = vld [vmem:[#allocation7 + $0x38] sm:$0xf0] }
  0xd9   :  { %1632 = vmatpush.bf16.msrb.mxu2 %v5845_v32 }
  0xda   :  { %1645 = vmatpush.bf16.msrb.mxu3 %v5909_v34  ;;  %1607 = vmatmul.bf16.vlgmr.msrb.gmra.mxu0 %v1399_v36  ;;  %v8507_v42 = vadd.f32 %v1183_v40, %v1171_v39  ;;  %v5997_v39 = vor.u32 %v7804_v37, %v5994_v38  ;;  %v6016_v40 = vld [vmem:[#allocation7 + $0x60] sm:$0xf]  ;;  %v7859_v38 = vld [vmem:[#allocation5 + $0x164] sm:$0xf0] }
  0xdb   :  { %1620 = vmatmul.bf16.vlgmr.msrb.gmra.mxu1 %v1400_v35  ;;  %1857 = vmatpush.bf16.msra.mxu0 %v6025_v22  ;;  %v6209_v37 = vld [vmem:[#allocation5 + $0x160] sm:$0xf] }
  0xdc   :  { %1633 = vmatmul.bf16.vlgmr.msrb.gmra.mxu2 %v1399_v36  ;;  %vm1371_vm4 = vcmp.gt.f32.partialorder %v8507_v42, 0.0 }
  0xdd   :  { %1646 = vmatmul.bf16.vlgmr.msrb.gmra.mxu3 %v1400_v35  ;;  %1883 = vmatpush.bf16.msra.mxu2 %v6029_v0  ;;  %v6058_v0 = vld [vmem:[#allocation7 + $0xb8] sm:$0xf0] }
  0xde   :  { %1896 = vmatpush.bf16.msra.mxu3 %v6093_v12  ;;  %v7818_v12 = vld [vmem:[#allocation7 + $0xa4] sm:$0xf] }
  0xdf   :  { %v1196_v43 = vpop.f32.mrf.mxu2  ;;  %v1172_v47 = vpop.f32.mrf.mxu0 }
  0xe0   :  { %v1197_v44 = vadd.f32 %v1196_v43, %v285_v41  ;;  %v1209_v45 = vpop.f32.mrf.mxu3  ;;  %v1185_v48 = vpop.f32.mrf.mxu1  ;;  %v7811_v41 = vld [vmem:[#allocation7 + $0x64] sm:$0xf0] }
  0xe1   :  { %1884 = vmatpush.bf16.msra.mxu2 %v6021_v7  ;;  %v7822_v48 = vld [vmem:[#allocation7 + $0xc4] sm:$0xf]  ;;  %v7800_v7 = vld [vmem:[#allocation7 + $0x14] sm:$0xf] }
  0xe2   :  { %v8509_v46 = vadd.f32 %v1209_v45, %v1197_v44  ;;  %1897 = vmatpush.bf16.msra.mxu3 %v6085_v19  ;;  %v6017_v45 = vor.u32 %v7811_v41, %v6016_v40  ;;  %v5981_v10 = vor.u32 %v7800_v7, %v5978_v8  ;;  %v5970_v19 = vld [vmem:[#allocation7 + $0x8] sm:$0xf0]  ;;  %v6210_v41 = vor.u32 %v7859_v38, %v6209_v37 }
  0xe4   :  { %1858 = vmatpush.bf16.msra.mxu0 %v6017_v45  ;;  %v7814_v45 = vld [vmem:[#allocation7 + $0x84] sm:$0xf]  ;;  %vm1372_vm5 = vcmp.gt.f32.partialorder %v8509_v46, 0.0 }
  0xe5   :  { %1885 = vmatpush.bf16.msra.mxu2 %v6013_v16  ;;  %v6072_v16 = vld [vmem:[#allocation7 + $0xd0] sm:$0xf] }
  0xe6   :  { %1898 = vmatpush.bf16.msra.mxu3 %v6077_v28  ;;  %v6073_v22 = vor.u32 %v7825_v17, %v6072_v16  ;;  %v7855_v16 = vld [vmem:[#allocation5 + $0x144] sm:$0xf0] }
  0xe7   :  { %v1198_v49 = vpop.f32.mrf.mxu2 }
  0xe8   :  { %v1211_v51 = vpop.f32.mrf.mxu3  ;;  %v6066_v49 = vld [vmem:[#allocation7 + $0xc8] sm:$0xf0] }
  0xe9   :  { %1886 = vmatpush.bf16.msra.mxu2 %v6005_v23  ;;  %v6069_v50 = vor.u32 %v7822_v48, %v6066_v49  ;;  %v6088_v51 = vld [vmem:[#allocation7 + $0xf0] sm:$0xf]  ;;  %v5973_v23 = vor.u32 %v7798_v18, %v5970_v19  ;;  %v7817_v19 = vld [vmem:[#allocation7 + $0x94] sm:$0xf0] }
  0xea   :  { %v6056_v49 = vld [vmem:[#allocation7 + $0xb0] sm:$0xf] }
  0xeb   :  { %1899 = vmatpush.bf16.msra.mxu3 %v6069_v50  ;;  %v7821_v50 = vld [vmem:[#allocation7 + $0xb4] sm:$0xf0]  ;;  %v6040_v18 = vld [vmem:[#allocation7 + $0x90] sm:$0xf] }
  0xed   :  { %1887 = vmatpush.bf16.msra.mxu2 %v5997_v39 }
  0xf7   :  { %v1222_v53 = vpop.f32.mrf.mxu0 }
  0xf8   :  { %v1223_v55 = vadd.f32 %v1222_v53, %v286_v52  ;;  %v1235_v56 = vpop.f32.mrf.mxu1  ;;  %v7829_v52 = vld [vmem:[#allocation7 + $0xf4] sm:$0xf0]  ;;  %v7802_v53 = vld [vmem:[#allocation7 + $0x24] sm:$0xf] }
  0xfa   :  { %v8513_v58 = vadd.f32 %v1235_v56, %v1223_v55  ;;  %v5986_v55 = vld [vmem:[#allocation7 + $0x28] sm:$0xf0]  ;;  %v6089_v56 = vor.u32 %v7829_v52, %v6088_v51  ;;  %v6281_v51 = vld [vmem:[#allocation5 + $0x1f0] sm:$0xf] }
  0xfc   :  { %1870 = vmatpush.bf16.msra.mxu1 %v6089_v56  ;;  %vm1373_vm7 = vcmp.gt.f32.partialorder %v8513_v58, 0.0 }
  0xff   :  { %v1248_v59 = vpop.f32.mrf.mxu2  ;;  %v1224_v2 = vpop.f32.mrf.mxu0 }
 0x100   :  { %v1249_v60 = vadd.f32 %v1248_v59, %v287_v57  ;;  %v1261_v61 = vpop.f32.mrf.mxu3  ;;  %v1237_v3 = vpop.f32.mrf.mxu1  ;;  %v5989_v57 = vor.u32 %v7802_v53, %v5986_v55  ;;  %v6008_v59 = vld [vmem:[#allocation7 + $0x50] sm:$0xf]  ;;  %v6080_v2 = vld [vmem:[#allocation7 + $0xe0] sm:$0xf]  ;;  %v6057_v53 = vor.u32 %v7821_v50, %v6056_v49  ;;  %v7877_v55 = vld [vmem:[#allocation5 + $0x1f4] sm:$0xf0] }
 0x101   :  { %v7827_v3 = vld [vmem:[#allocation7 + $0xe4] sm:$0xf0]  ;;  %v6282_v56 = vor.u32 %v7877_v55, %v6281_v51  ;;  %v6169_v51 = vld [vmem:[#allocation5 + $0x110] sm:$0xf] }
 0x102   :  { %v8515_v1 = vadd.f32 %v1261_v61, %v1249_v60  ;;  %v7809_v60 = vld [vmem:[#allocation7 + $0x54] sm:$0xf0]  ;;  %v7820_v61 = vld [vmem:[#allocation7 + $0xb4] sm:$0xf]  ;;  %1888 = vmatpush.bf16.msra.mxu2 %v5989_v57  ;;  %v6081_v6 = vor.u32 %v7827_v3, %v6080_v2  ;;  %v5976_v57 = vld [vmem:[#allocation7 + $0x10] sm:$0xf] }
 0x103   :  { %v6009_v63 = vor.u32 %v7809_v60, %v6008_v59  ;;  %v6061_v5 = vor.u32 %v7820_v61, %v6058_v0  ;;  %v7801_v59 = vld [vmem:[#allocation7 + $0x14] sm:$0xf0]  ;;  %v6201_v60 = vld [vmem:[#allocation5 + $0x150] sm:$0xf]  ;;  %v6048_v2 = vld [vmem:[#allocation7 + $0xa0] sm:$0xf] }
 0x104   :  { %1871 = vmatpush.bf16.msra.mxu1 %v6081_v6  ;;  %v5977_v61 = vor.u32 %v7801_v59, %v5976_v57  ;;  %v7819_v3 = vld [vmem:[#allocation7 + $0xa4] sm:$0xf0]  ;;  %v6161_v59 = vld [vmem:[#allocation5 + $0x100] sm:$0xf]  ;;  %vm1374_vm9 = vcmp.gt.f32.partialorder %v8515_v1, 0.0 }
 0x105   :  { %1859 = vmatpush.bf16.msra.mxu0 %v6009_v63  ;;  %1900 = vmatpush.bf16.msra.mxu3 %v6061_v5  ;;  %v6049_v8 = vor.u32 %v7819_v3, %v6048_v2  ;;  %v7867_v57 = vld [vmem:[#allocation5 + $0x1a4] sm:$0xf0] }
 0x106   :  { %1889 = vmatpush.bf16.msra.mxu2 %v5981_v10  ;;  %v1433_v3 = vld [vmem:[%s8755_s4] ss:$8 sm:$0x3] }
 0x107   :  { %v1250_v11 = vpop.f32.mrf.mxu2 }
 0x108   :  { %v1263_v15 = vpop.f32.mrf.mxu3  ;;  %v7807_v11 = vld [vmem:[#allocation7 + $0x44] sm:$0xf0]  ;;  %1872 = vmatpush.bf16.msra.mxu1 %v6073_v22  ;;  %v6041_v22 = vor.u32 %v7817_v19, %v6040_v18  ;;  %v7844_v18 = vld [vmem:[#allocation8 + $0x70] sm:$0xff] }
 0x109   :  { %v6001_v14 = vor.u32 %v7807_v11, %v6000_v9  ;;  %v6053_v15 = vor.u32 %v7818_v12, %v6050_v13  ;;  %v7875_v9 = vld [vmem:[#allocation5 + $0x1e4] sm:$0xf0]  ;;  %v5968_v11 = vld [vmem:[#allocation7] sm:$0xf] }
 0x10a   :  { %1890 = vmatpush.bf16.msra.mxu2 %v5973_v23  ;;  %v7799_v12 = vld [vmem:[#allocation7 + $0x4] sm:$0xf0]  ;;  %v6193_v13 = vld [vmem:[#allocation5 + $0x140] sm:$0xf]  ;;  %v7873_v23 = vld [vmem:[#allocation5 + $0x1d4] sm:$0xf0] }
 0x10b   :  { %1860 = vmatpush.bf16.msra.mxu0 %v6001_v14  ;;  %1901 = vmatpush.bf16.msra.mxu3 %v6053_v15  ;;  %v5969_v15 = vor.u32 %v7799_v12, %v5968_v11  ;;  %v6194_v17 = vor.u32 %v7855_v16, %v6193_v13  ;;  %v7837_v11 = vld [vmem:[#allocation8 + $0x38] sm:$0xff]  ;;  %v7836_v13 = vld [vmem:[#allocation8 + $0x30] sm:$0xff]  ;;  %v1436_v16 = vperm.slane %v1433_v3, 1 }
 0x117   :  { %v1274_v27 = vpop.f32.mrf.mxu0 }
 0x118   :  { %v1275_v54 = vadd.f32 %v1274_v27, %v288_v24  ;;  %v1287_v29 = vpop.f32.mrf.mxu1  ;;  %v6217_v24 = vld [vmem:[#allocation5 + $0x170] sm:$0xf]  ;;  %v5993_v27 = vor.u32 %v7805_v21, %v5992_v20 }
 0x119   :  { %v6218_v28 = vor.u32 %v7861_v25, %v6217_v24  ;;  %v6265_v20 = vld [vmem:[#allocation5 + $0x1d0] sm:$0xf] }
 0x11a   :  { %v8519_v32 = vadd.f32 %v1287_v29, %v1275_v54  ;;  %v6042_v54 = vld [vmem:[#allocation7 + $0x98] sm:$0xf0]  ;;  %v6064_v29 = vld [vmem:[#allocation7 + $0xc0] sm:$0xf]  ;;  %1861 = vmatpush.bf16.msra.mxu0 %v5993_v27  ;;  %v6185_v27 = vld [vmem:[#allocation5 + $0x130] sm:$0xf] }
 0x11b   :  { %2275 = vmatpush.bf16.msrb.mxu2 %v6218_v28  ;;  %v7853_v28 = vld [vmem:[#allocation5 + $0x134] sm:$0xf0] }
 0x11c   :  { %vm1375_vm11 = vcmp.gt.f32.partialorder %v8519_v32, 0.0 }
 0x11f   :  { %v1300_v34 = vpop.f32.mrf.mxu2  ;;  %v1276_v44 = vpop.f32.mrf.mxu0  ;;  %2276 = vmatpush.bf16.msrb.mxu2 %v6210_v41  ;;  %v6177_v41 = vld [vmem:[#allocation5 + $0x120] sm:$0xf] }
 0x120   :  { %v1301_v35 = vadd.f32 %v1300_v34, %v289_v31  ;;  %v1313_v36 = vpop.f32.mrf.mxu3  ;;  %v1289_v47 = vpop.f32.mrf.mxu1  ;;  %v7823_v31 = vld [vmem:[#allocation7 + $0xc4] sm:$0xf0]  ;;  %v6045_v34 = vor.u32 %v7816_v26, %v6042_v54  ;;  %v6266_v26 = vor.u32 %v7873_v23, %v6265_v20  ;;  %v6186_v54 = vor.u32 %v7853_v28, %v6185_v27 }
 0x121   :  { %v6065_v39 = vor.u32 %v7823_v31, %v6064_v29  ;;  %v279_v44 = vld [vmem:[%s8753_s2 + $0x8] sm:$0x3]  ;;  %v6034_v47 = vld [vmem:[#allocation7 + $0x88] sm:$0xf0] }
 0x122   :  { %v8521_v43 = vadd.f32 %v1313_v36, %v1301_v35  ;;  %v5984_v35 = vld [vmem:[#allocation7 + $0x20] sm:$0xf]  ;;  %v7803_v36 = vld [vmem:[#allocation7 + $0x24] sm:$0xf0]  ;;  %1902 = vmatpush.bf16.msra.mxu3 %v6045_v34  ;;  %v6037_v48 = vor.u32 %v7814_v45, %v6034_v47  ;;  %v290_v52 = vperm.slane %v279_v44, 0  ;;  %v291_v7 = vperm.slane %v279_v44, 1 }
 0x123   :  { %v5985_v40 = vor.u32 %v7803_v36, %v5984_v35  ;;  %1873 = vmatpush.bf16.msra.mxu1 %v6065_v39  ;;  %v6032_v34 = vld [vmem:[#allocation7 + $0x80] sm:$0xf]  ;;  %v7815_v35 = vld [vmem:[#allocation7 + $0x84] sm:$0xf0]  ;;  %v6249_v47 = vld [vmem:[#allocation5 + $0x1b0] sm:$0xf] }
 0x124   :  { %v6257_v36 = vld [vmem:[#allocation5 + $0x1c0] sm:$0xf]  ;;  %v6033_v38 = vor.u32 %v7815_v35, %v6032_v34  ;;  %v7871_v39 = vld [vmem:[#allocation5 + $0x1c4] sm:$0xf0]  ;;  %vm1376_vm13 = vcmp.gt.f32.partialorder %v8521_v43, 0.0 }
 0x125   :  { %1862 = vmatpush.bf16.msra.mxu0 %v5985_v40  ;;  %v6258_v40 = vor.u32 %v7871_v39, %v6257_v36  ;;  %v7851_v44 = vld [vmem:[#allocation5 + $0x124] sm:$0xf0]  ;;  %v7842_v35 = vld [vmem:[#allocation8 + $0x60] sm:$0xff] }
 0x126   :  { %1903 = vmatpush.bf16.msra.mxu3 %v6037_v48  ;;  %v6178_v45 = vor.u32 %v7851_v44, %v6177_v41  ;;  %v7869_v48 = vld [vmem:[#allocation5 + $0x1b4] sm:$0xf0]  ;;  %v7843_v27 = vld [vmem:[#allocation8 + $0x68] sm:$0xff]  ;;  %v7832_v44 = vld [vmem:[#allocation8 + $0x10] sm:$0xff] }
 0x127   :  { %v1302_v62 = vpop.f32.mrf.mxu2  ;;  %1874 = vmatpush.bf16.msra.mxu1 %v6057_v53  ;;  %v6250_v50 = vor.u32 %v7869_v48, %v6249_v47  ;;  %v6241_v53 = vld [vmem:[#allocation5 + $0x1a0] sm:$0xf]  ;;  %v7841_v41 = vld [vmem:[#allocation8 + $0x58] sm:$0xff]  ;;  %v7840_v47 = vld [vmem:[#allocation8 + $0x50] sm:$0xff] }
 0x128   :  { %v1315_v4 = vpop.f32.mrf.mxu3  ;;  %v7857_v62 = vld [vmem:[#allocation5 + $0x154] sm:$0xf0]  ;;  %v7831_v48 = vld [vmem:[#allocation8 + $0x8] sm:$0xff] }
 0x129   :  { %v6202_v0 = vor.u32 %v7857_v62, %v6201_v60  ;;  %v6273_v4 = vld [vmem:[#allocation5 + $0x1e0] sm:$0xf]  ;;  %1863 = vmatpush.bf16.msra.mxu0 %v5977_v61  ;;  %v7847_v60 = vld [vmem:[#allocation5 + $0x104] sm:$0xf0]  ;;  %v6242_v61 = vor.u32 %v7867_v57, %v6241_v53  ;;  %v6233_v62 = vld [vmem:[#allocation5 + $0x190] sm:$0xf] }
 0x12a   :  { %2288 = vmatpush.bf16.msrb.mxu3 %v6282_v56  ;;  %v6274_v10 = vor.u32 %v7875_v9, %v6273_v4  ;;  %v6225_v4 = vld [vmem:[#allocation5 + $0x180] sm:$0xf]  ;;  %v7839_v53 = vld [vmem:[#allocation8 + $0x48] sm:$0xff]  ;;  %v7858_v57 = vld [vmem:[#allocation5 + $0x164] sm:$0xf] }
 0x12b   :  { %2277 = vmatpush.bf16.msrb.mxu2 %v6202_v0  ;;  %1875 = vmatpush.bf16.msra.mxu1 %v6049_v8  ;;  %v6162_v0 = vor.u32 %v7847_v60, %v6161_v59  ;;  %v6211_v59 = vld [vmem:[#allocation5 + $0x168] sm:$0xf0] }
 0x12d   :  { %1864 = vmatpush.bf16.msra.mxu0 %v5969_v15  ;;  %v7845_v15 = vld [vmem:[#allocation8 + $0x78] sm:$0xff] }
 0x12e   :  { %2289 = vmatpush.bf16.msrb.mxu3 %v6274_v10 }
 0x12f   :  { %2278 = vmatpush.bf16.msrb.mxu2 %v6194_v17  ;;  %1876 = vmatpush.bf16.msra.mxu1 %v6041_v22 }
 0x131   :  { %2043 = vmatpush.bf16.msrb.mxu0 %v7837_v11  ;;  %v7876_v11 = vld [vmem:[#allocation5 + $0x1f4] sm:$0xf] }
 0x132   :  { %2290 = vmatpush.bf16.msrb.mxu3 %v6266_v26 }
 0x133   :  { %2279 = vmatpush.bf16.msrb.mxu2 %v6186_v54  ;;  %1877 = vmatpush.bf16.msra.mxu1 %v6033_v38  ;;  %v7834_v54 = vld [vmem:[#allocation8 + $0x20] sm:$0xff]  ;;  %v7833_v38 = vld [vmem:[#allocation8 + $0x18] sm:$0xff] }
 0x135   :  { %2044 = vmatpush.bf16.msrb.mxu0 %v7836_v13  ;;  %v6346_v13 = vld [vmem:[#allocation7 + $0x170] sm:$0xf] }
 0x136   :  { %2291 = vmatpush.bf16.msrb.mxu3 %v6258_v40  ;;  %v1381_v40 = vmul.f32 0.01, %v8507_v42 }
 0x137   :  { %v1326_v63 = vpop.f32.mrf.mxu0  ;;  %2280 = vmatpush.bf16.msrb.mxu2 %v6178_v45  ;;  %2056 = vmatpush.bf16.msrb.mxu1 %v7845_v15 }
 0x138   :  { %v1327_v5 = vadd.f32 %v1326_v63, %v290_v52  ;;  %v1339_v6 = vpop.f32.mrf.mxu1  ;;  %v7849_v52 = vld [vmem:[#allocation5 + $0x114] sm:$0xf0]  ;;  %v8536_v45 = vsel %vm1371_vm4, %v8507_v42, %v1381_v40  ;;  %v7830_v42 = vld [vmem:[#allocation8] sm:$0xff]  ;;  %v6259_v40 = vld [vmem:[#allocation5 + $0x1c8] sm:$0xf0] }
 0x139   :  { %v6170_v56 = vor.u32 %v7849_v52, %v6169_v51  ;;  %v7865_v63 = vld [vmem:[#allocation5 + $0x194] sm:$0xf0]  ;;  %v7860_v51 = vld [vmem:[#allocation5 + $0x174] sm:$0xf]  ;;  %v6219_v52 = vld [vmem:[#allocation5 + $0x178] sm:$0xf0] }
 0x13a   :  { %v8526_v14 = vadd.f32 %v1339_v6, %v1327_v5  ;;  %2292 = vmatpush.bf16.msrb.mxu3 %v6250_v50  ;;  %v6234_v2 = vor.u32 %v7865_v63, %v6233_v62  ;;  %v7863_v5 = vld [vmem:[#allocation5 + $0x184] sm:$0xf0]  ;;  %v1382_v50 = vmul.f32 0.01, %v8509_v46  ;;  %v7856_v62 = vld [vmem:[#allocation5 + $0x154] sm:$0xf] }
 0x13b   :  { %2281 = vmatpush.bf16.msrb.mxu2 %v6170_v56  ;;  %v6226_v6 = vor.u32 %v7863_v5, %v6225_v4  ;;  %2057 = vmatpush.bf16.msrb.mxu1 %v7844_v18  ;;  %v6222_v56 = vor.u32 %v7860_v51, %v6219_v52  ;;  %v6203_v63 = vld [vmem:[#allocation5 + $0x158] sm:$0xf0]  ;;  %v7852_v4 = vld [vmem:[#allocation5 + $0x134] sm:$0xf] }
 0x13c   :  { %v6187_v5 = vld [vmem:[#allocation5 + $0x138] sm:$0xf0]  ;;  %v7848_v18 = vld [vmem:[#allocation5 + $0x114] sm:$0xf]  ;;  %vm1377_vm15 = vcmp.gt.f32.partialorder %v8526_v14, 0.0 }
 0x13d   :  { %v6251_v51 = vld [vmem:[#allocation5 + $0x1b8] sm:$0xf0] }
 0x13e   :  { %2293 = vmatpush.bf16.msrb.mxu3 %v6242_v61  ;;  %v6214_v61 = vor.u32 %v7858_v57, %v6211_v59  ;;  %v7866_v57 = vld [vmem:[#allocation5 + $0x1a4] sm:$0xf]  ;;  %v6243_v59 = vld [vmem:[#allocation5 + $0x1a8] sm:$0xf0] }
 0x13f   :  { %v1352_v21 = vpop.f32.mrf.mxu2  ;;  %v1328_v31 = vpop.f32.mrf.mxu0  ;;  %2282 = vmatpush.bf16.msrb.mxu2 %v6162_v0  ;;  %2058 = vmatpush.bf16.msrb.mxu1 %v7843_v27  ;;  %v6206_v0 = vor.u32 %v7856_v62, %v6203_v63  ;;  %v7846_v27 = vld [vmem:[#allocation5 + $0x104] sm:$0xf]  ;;  %v6306_v62 = vld [vmem:[#allocation7 + $0x120] sm:$0xf]  ;;  %v7883_v63 = vld [vmem:[#allocation7 + $0x124] sm:$0xf0] }
 0x140   :  { %v1353_v24 = vadd.f32 %v1352_v21, %v291_v7  ;;  %v1365_v25 = vpop.f32.mrf.mxu3  ;;  %v1341_v37 = vpop.f32.mrf.mxu1  ;;  %v1435_v7 = vperm.slane %v1433_v3, 0  ;;  %v7835_v21 = vld [vmem:[#allocation8 + $0x28] sm:$0xff] }
 0x141   :  { %2045 = vmatpush.bf16.msrb.mxu0 %v7835_v21  ;;  %v7874_v21 = vld [vmem:[#allocation5 + $0x1e4] sm:$0xf] }
 0x142   :  { %v8528_v29 = vadd.f32 %v1365_v25, %v1353_v24  ;;  %2294 = vmatpush.bf16.msrb.mxu3 %v6234_v2  ;;  %v7854_v2 = vld [vmem:[#allocation5 + $0x144] sm:$0xf] }
 0x143   :  { %2059 = vmatpush.bf16.msrb.mxu1 %v7842_v35  ;;  %v6330_v35 = vld [vmem:[#allocation7 + $0x150] sm:$0xf] }
 0x144   :  { %vm1378_vm1 = vcmp.gt.f32.partialorder %v8528_v29, 0.0 }
 0x145   :  { %2046 = vmatpush.bf16.msrb.mxu0 %v7834_v54  ;;  %v7872_v54 = vld [vmem:[#allocation5 + $0x1d4] sm:$0xf] }
 0x146   :  { %2295 = vmatpush.bf16.msrb.mxu3 %v6226_v6  ;;  %v6190_v6 = vor.u32 %v7852_v4, %v6187_v5  ;;  %v6298_v4 = vld [vmem:[#allocation7 + $0x110] sm:$0xf]  ;;  %v7881_v5 = vld [vmem:[#allocation7 + $0x114] sm:$0xf0] }
 0x147   :  { %v1354_v49 = vpop.f32.mrf.mxu2  ;;  %2060 = vmatpush.bf16.msrb.mxu1 %v7841_v41 }
 0x148   :  { %v1367_v55 = vpop.f32.mrf.mxu3  ;;  %v8540_v49 = vpack.c.bf16 %v8536_v45, %v8536_v45 }
 0x149   :  { %2047 = vmatpush.bf16.msrb.mxu0 %v7833_v38  ;;  %v8546_v55 = vsel %vm1372_vm5, %v8509_v46, %v1382_v50  ;;  %v6195_v46 = vld [vmem:[#allocation5 + $0x148] sm:$0xf0]  ;;  %v7868_v50 = vld [vmem:[#allocation5 + $0x1b4] sm:$0xf] }
 0x14a   :  { %v8550_v60 = vpack.c.bf16 %v8546_v55, %v8546_v55  ;;  %v6198_v3 = vor.u32 %v7854_v2, %v6195_v46  ;;  %v6254_v52 = vor.u32 %v7868_v50, %v6251_v51  ;;  %v7864_v2 = vld [vmem:[#allocation5 + $0x194] sm:$0xf]  ;;  %v6235_v46 = vld [vmem:[#allocation5 + $0x198] sm:$0xf0] }
 0x14b   :  { %2061 = vmatpush.bf16.msrb.mxu1 %v7840_v47  ;;  %v7887_v47 = vld [vmem:[#allocation7 + $0x144] sm:$0xf0] }
 0x14c   :  { %v8561_v51 = vld [vmem:[%s8755_s4 + $0x1] ss:$8 sm:$0x3] }
 0x14d   :  { %2048 = vmatpush.bf16.msrb.mxu0 %v7832_v44  ;;  %v6322_v44 = vld [vmem:[#allocation7 + $0x140] sm:$0xf] }
 0x14f   :  { %2062 = vmatpush.bf16.msrb.mxu1 %v7839_v53  ;;  %v6314_v53 = vld [vmem:[#allocation7 + $0x130] sm:$0xf] }
 0x151   :  { %2049 = vmatpush.bf16.msrb.mxu0 %v7831_v48  ;;  %v6323_v48 = vor.u32 %v7887_v47, %v6322_v44 }
 0x155   :  { %2050 = vmatpush.bf16.msrb.mxu0 %v7830_v42  ;;  %v7885_v42 = vld [vmem:[#allocation7 + $0x134] sm:$0xf0] }
 0x157   :  { %v1608_v8 = vpop.f32.mrf.mxu0 }
 0x158   :  { %v1609_v9 = vadd.f32 %v1608_v8, %v1435_v7  ;;  %v1621_v10 = vpop.f32.mrf.mxu1  ;;  %v7838_v7 = vld [vmem:[#allocation8 + $0x40] sm:$0xff] }
 0x159   :  { %v7850_v8 = vld [vmem:[#allocation5 + $0x124] sm:$0xf]  ;;  %2063 = vmatpush.bf16.msrb.mxu1 %v7838_v7  ;;  %v1691_v7 = vld [vmem:[%s8757_s6] ss:$8 sm:$0x3] }
 0x15a   :  { %v1622_v12 = vadd.f32 %v1621_v10, %v1609_v9  ;;  %v6179_v9 = vld [vmem:[#allocation5 + $0x128] sm:$0xf0] }
 0x15b   :  { %v6182_v10 = vor.u32 %v7850_v8, %v6179_v9  ;;  %v7862_v8 = vld [vmem:[#allocation5 + $0x184] sm:$0xf]  ;;  %v6227_v9 = vld [vmem:[#allocation5 + $0x188] sm:$0xf0] }
 0x15c   :  { %vm1651_vm2 = vcmp.gt.f32.partialorder %v1622_v12, 0.0  ;;  %v1653_v17 = vmul.f32 0.01, %v1622_v12 }
 0x15e   :  { %v1655_v19 = vsel %vm1651_vm2, %v1622_v12, %v1653_v17  ;;  %v6283_v12 = vld [vmem:[#allocation5 + $0x1f8] sm:$0xf0] }
 0x15f   :  { %v1634_v20 = vpop.f32.mrf.mxu2  ;;  %v1657_v22 = vpack.c.bf16 %v1655_v19, %v1655_v19  ;;  %v1610_v25 = vpop.f32.mrf.mxu0  ;;  %v6286_v15 = vor.u32 %v7876_v11, %v6283_v12  ;;  %v6171_v19 = vld [vmem:[#allocation5 + $0x118] sm:$0xf0]  ;;  %v6230_v11 = vor.u32 %v7862_v8, %v6227_v9  ;;  %v6290_v12 = vld [vmem:[#allocation7 + $0x100] sm:$0xf]  ;;  %v7878_v9 = vld [vmem:[#allocation7 + $0x104] sm:$0xf] }
 0x160   :  { %v1635_v23 = vadd.f32 %v1634_v20, %v1436_v16  ;;  %v1647_v24 = vpop.f32.mrf.mxu3  ;;  %v1623_v26 = vpop.f32.mrf.mxu1  ;;  %v7893_v16 = vld [vmem:[#allocation7 + $0x174] sm:$0xf0]  ;;  %v6174_v20 = vor.u32 %v7848_v18, %v6171_v19  ;;  %v7891_v25 = vld [vmem:[#allocation7 + $0x164] sm:$0xf0] }
 0x161   :  { %1865 = vmatmul.bf16.vlgmr.msra.gmra.mxu0 %v1657_v22  ;;  %1891 = vmatmul.bf16.vlgmr.msra.gmra.mxu2 %v1657_v22  ;;  %v6347_v17 = vor.u32 %v7893_v16, %v6346_v13  ;;  %v6275_v22 = vld [vmem:[#allocation5 + $0x1e8] sm:$0xf0]  ;;  %v7879_v13 = vld [vmem:[#allocation7 + $0x104] sm:$0xf0]  ;;  %v1693_v16 = vperm.slane %v1691_v7, 0 }
 0x162   :  { %v1648_v28 = vadd.f32 %v1647_v24, %v1635_v23  ;;  %2301 = vmatpush.bf16.msra.mxu0 %v6222_v56  ;;  %v6338_v23 = vld [vmem:[#allocation7 + $0x160] sm:$0xf]  ;;  %v6278_v24 = vor.u32 %v7874_v21, %v6275_v22  ;;  %v6315_v56 = vor.u32 %v7885_v42, %v6314_v53  ;;  %v1694_v21 = vperm.slane %v1691_v7, 1 }
 0x163   :  { %2535 = vmatpush.bf16.msra.mxu2 %v6347_v17  ;;  %v6339_v26 = vor.u32 %v7891_v25, %v6338_v23  ;;  %v7892_v23 = vld [vmem:[#allocation7 + $0x174] sm:$0xf]  ;;  %v2111_v42 = vperm.slane %v8561_v51, 0 }
 0x164   :  { %vm1652_vm3 = vcmp.gt.f32.partialorder %v1648_v28, 0.0  ;;  %v1654_v31 = vmul.f32 0.01, %v1648_v28 }
 0x166   :  { %v1656_v34 = vsel %vm1652_vm3, %v1648_v28, %v1654_v31  ;;  %2302 = vmatpush.bf16.msra.mxu0 %v6214_v61  ;;  %v6163_v28 = vld [vmem:[#allocation5 + $0x108] sm:$0xf0]  ;;  %v6246_v61 = vor.u32 %v7866_v57, %v6243_v59 }
 0x167   :  { %v1658_v36 = vpack.c.bf16 %v1656_v34, %v1656_v34  ;;  %v1636_v37 = vpop.f32.mrf.mxu2  ;;  %2536 = vmatpush.bf16.msra.mxu2 %v6339_v26  ;;  %v6166_v31 = vor.u32 %v7846_v27, %v6163_v28  ;;  %v6267_v34 = vld [vmem:[#allocation5 + $0x1d8] sm:$0xf0] }
 0x168   :  { %v1649_v39 = vpop.f32.mrf.mxu3  ;;  %v6270_v37 = vor.u32 %v7872_v54, %v6267_v34  ;;  %v7890_v54 = vld [vmem:[#allocation7 + $0x164] sm:$0xf] }
 0x169   :  { %1878 = vmatmul.bf16.vlgmr.msra.gmra.mxu1 %v1658_v36  ;;  %1904 = vmatmul.bf16.vlgmr.msra.gmra.mxu3 %v1658_v36  ;;  %v7889_v36 = vld [vmem:[#allocation7 + $0x154] sm:$0xf0]  ;;  %v7870_v39 = vld [vmem:[#allocation5 + $0x1c4] sm:$0xf] }
 0x16a   :  { %2303 = vmatpush.bf16.msra.mxu0 %v6206_v0  ;;  %2314 = vmatpush.bf16.msra.mxu1 %v6286_v15  ;;  %v6331_v38 = vor.u32 %v7889_v36, %v6330_v35  ;;  %v6262_v41 = vor.u32 %v7870_v39, %v6259_v40  ;;  %v6307_v0 = vor.u32 %v7883_v63, %v6306_v62  ;;  %v7888_v40 = vld [vmem:[#allocation7 + $0x154] sm:$0xf]  ;;  %v6308_v62 = vld [vmem:[#allocation7 + $0x128] sm:$0xf0] }
 0x16b   :  { %v6291_v15 = vor.u32 %v7879_v13, %v6290_v12  ;;  %v6539_v12 = vld [vmem:[#allocation5 + $0x270] sm:$0xf]  ;;  %v7941_v13 = vld [vmem:[#allocation5 + $0x274] sm:$0xf0] }
 0x16c   :  { %2537 = vmatpush.bf16.msra.mxu2 %v6331_v38 }
 0x16e   :  { %2304 = vmatpush.bf16.msra.mxu0 %v6198_v3  ;;  %2315 = vmatpush.bf16.msra.mxu1 %v6278_v24  ;;  %v6238_v3 = vor.u32 %v7864_v2, %v6235_v46  ;;  %v6348_v24 = vld [vmem:[#allocation7 + $0x178] sm:$0xf0] }
 0x16f   :  { %v6351_v26 = vor.u32 %v7892_v23, %v6348_v24  ;;  %v6404_v23 = vld [vmem:[#allocation7 + $0x1e8] sm:$0xf0]  ;;  %v7937_v24 = vld [vmem:[#allocation5 + $0x254] sm:$0xf0] }
 0x170   :  { %2538 = vmatpush.bf16.msra.mxu2 %v6323_v48  ;;  %v6324_v48 = vld [vmem:[#allocation7 + $0x148] sm:$0xf0] }
 0x171   :  { %2283 = vmatmul.bf16.vlgmr.msrb.gmra.mxu2 %v8540_v49 }
 0x172   :  { %2305 = vmatpush.bf16.msra.mxu0 %v6190_v6  ;;  %2316 = vmatpush.bf16.msra.mxu1 %v6270_v37  ;;  %v6299_v6 = vor.u32 %v7881_v5, %v6298_v4  ;;  %v6300_v5 = vld [vmem:[#allocation7 + $0x118] sm:$0xf0] }
 0x174   :  { %2539 = vmatpush.bf16.msra.mxu2 %v6315_v56  ;;  %v6316_v56 = vld [vmem:[#allocation7 + $0x138] sm:$0xf0] }
 0x176   :  { %2306 = vmatpush.bf16.msra.mxu0 %v6182_v10  ;;  %2317 = vmatpush.bf16.msra.mxu1 %v6262_v41  ;;  %v6332_v41 = vld [vmem:[#allocation7 + $0x158] sm:$0xf0] }
 0x177   :  { %v6335_v47 = vor.u32 %v7888_v40, %v6332_v41  ;;  %v6507_v41 = vld [vmem:[#allocation5 + $0x230] sm:$0xf] }
 0x178   :  { %2540 = vmatpush.bf16.msra.mxu2 %v6307_v0 }
 0x179   :  { %2296 = vmatmul.bf16.vlgmr.msrb.gmra.mxu3 %v8550_v60 }
 0x17a   :  { %2307 = vmatpush.bf16.msra.mxu0 %v6174_v20  ;;  %2318 = vmatpush.bf16.msra.mxu1 %v6254_v52 }
 0x17c   :  { %2541 = vmatpush.bf16.msra.mxu2 %v6299_v6 }
 0x17e   :  { %2308 = vmatpush.bf16.msra.mxu0 %v6166_v31  ;;  %2319 = vmatpush.bf16.msra.mxu1 %v6246_v61  ;;  %v6340_v31 = vld [vmem:[#allocation7 + $0x168] sm:$0xf0]  ;;  %v7882_v61 = vld [vmem:[#allocation7 + $0x124] sm:$0xf] }
 0x17f   :  { %v6343_v38 = vor.u32 %v7890_v54, %v6340_v31  ;;  %v6311_v46 = vor.u32 %v7882_v61, %v6308_v62  ;;  %v6396_v54 = vld [vmem:[#allocation7 + $0x1d8] sm:$0xf0] }
 0x180   :  { %2542 = vmatpush.bf16.msra.mxu2 %v6291_v15  ;;  %v6540_v15 = vor.u32 %v7941_v13, %v6539_v12  ;;  %v6364_v12 = vld [vmem:[#allocation7 + $0x198] sm:$0xf0] }
 0x182   :  { %2320 = vmatpush.bf16.msra.mxu1 %v6238_v3  ;;  %v7880_v3 = vld [vmem:[#allocation7 + $0x114] sm:$0xf] }
 0x183   :  { %v6303_v8 = vor.u32 %v7880_v3, %v6300_v5  ;;  %v6402_v3 = vld [vmem:[#allocation7 + $0x1e0] sm:$0xf] }
 0x186   :  { %2321 = vmatpush.bf16.msra.mxu1 %v6230_v11 }
 0x1de   :  { %v1866_v10 = vpop.f32.mrf.mxu0 }
 0x1df   :  { %v1867_v17 = vadd.f32 %v1866_v10, %v1693_v16  ;;  %v6292_v10 = vld [vmem:[#allocation7 + $0x108] sm:$0xf0]  ;;  %v6531_v16 = vld [vmem:[#allocation5 + $0x260] sm:$0xf] }
 0x1e4   :  { %v1892_v18 = vpop.f32.mrf.mxu2 }
 0x1e5   :  { %v1893_v28 = vadd.f32 %v1892_v18, %v1694_v21  ;;  %v7908_v18 = vld [vmem:[#allocation7 + $0x1f4] sm:$0xf] }
 0x1e6   :  { %v1879_v19 = vpop.f32.mrf.mxu1  ;;  %v1868_v22 = vpop.f32.mrf.mxu0 }
 0x1e7   :  { %v1880_v20 = vadd.f32 %v1879_v19, %v1867_v17  ;;  %v7939_v17 = vld [vmem:[#allocation5 + $0x264] sm:$0xf0]  ;;  %v6412_v19 = vld [vmem:[#allocation7 + $0x1f8] sm:$0xf0] }
 0x1e8   :  { %v6532_v21 = vor.u32 %v7939_v17, %v6531_v16  ;;  %v6415_v22 = vor.u32 %v7908_v18, %v6412_v19  ;;  %v7894_v17 = vld [vmem:[#allocation7 + $0x184] sm:$0xf]  ;;  %v6356_v18 = vld [vmem:[#allocation7 + $0x188] sm:$0xf0] }
 0x1e9   :  { %v1909_v25 = vadd.f32 %v1880_v20, %v8499_v33  ;;  %v7886_v33 = vld [vmem:[#allocation7 + $0x144] sm:$0xf]  ;;  %v6359_v19 = vor.u32 %v7894_v17, %v6356_v18 }
 0x1ea   :  { %v6327_v53 = vor.u32 %v7886_v33, %v6324_v48  ;;  %v7906_v20 = vld [vmem:[#allocation7 + $0x1e4] sm:$0xf]  ;;  %v6499_v48 = vld [vmem:[#allocation5 + $0x220] sm:$0xf] }
 0x1eb   :  { %v1911_v27 = vpack.c.bf16 %v1909_v25, %v1909_v25  ;;  %v6410_v25 = vld [vmem:[#allocation7 + $0x1f0] sm:$0xf] }
 0x1ec   :  { %v1905_v34 = vpop.f32.mrf.mxu3  ;;  %v1894_v36 = vpop.f32.mrf.mxu2 }
 0x1ed   :  { %v1906_v35 = vadd.f32 %v1905_v34, %v1893_v28  ;;  %2051 = vmatmul.bf16.vlgmr.msrb.gmra.mxu0 %v1911_v27  ;;  %v7909_v27 = vld [vmem:[#allocation7 + $0x1f4] sm:$0xf0]  ;;  %v7904_v28 = vld [vmem:[#allocation7 + $0x1d4] sm:$0xf]  ;;  %v7935_v36 = vld [vmem:[#allocation5 + $0x244] sm:$0xf0] }
 0x1ee   :  { %2561 = vmatpush.bf16.msrb.mxu0 %v6351_v26  ;;  %v1881_v37 = vpop.f32.mrf.mxu1  ;;  %v6407_v26 = vor.u32 %v7906_v20, %v6404_v23  ;;  %v6411_v31 = vor.u32 %v7909_v27, %v6410_v25  ;;  %v6378_v20 = vld [vmem:[#allocation7 + $0x1b0] sm:$0xf]  ;;  %v6370_v25 = vld [vmem:[#allocation7 + $0x1a0] sm:$0xf] }
 0x1ef   :  { %v1910_v39 = vadd.f32 %v1906_v35, %v8497_v30  ;;  %v7884_v30 = vld [vmem:[#allocation7 + $0x134] sm:$0xf]  ;;  %v6515_v35 = vld [vmem:[#allocation5 + $0x240] sm:$0xf]  ;;  %v6399_v37 = vor.u32 %v7904_v28, %v6396_v54  ;;  %v7955_v54 = vld [vmem:[#allocation5 + $0x2e4] sm:$0xf0] }
 0x1f0   :  { %v6319_v57 = vor.u32 %v7884_v30, %v6316_v56  ;;  %2548 = vmatpush.bf16.msra.mxu3 %v6411_v31  ;;  %v6516_v40 = vor.u32 %v7935_v36, %v6515_v35  ;;  %v6483_v56 = vld [vmem:[#allocation5 + $0x200] sm:$0xf]  ;;  %v7897_v35 = vld [vmem:[#allocation7 + $0x194] sm:$0xf0]  ;;  %v6587_v36 = vld [vmem:[#allocation5 + $0x2d0] sm:$0xf] }
 0x1f1   :  { %v1912_v44 = vpack.c.bf16 %v1910_v39, %v1910_v39  ;;  %v6388_v39 = vld [vmem:[#allocation7 + $0x1c8] sm:$0xf0]  ;;  %v6595_v27 = vld [vmem:[#allocation5 + $0x2e0] sm:$0xf] }
 0x1f2   :  { %2562 = vmatpush.bf16.msrb.mxu0 %v6343_v38  ;;  %v7902_v38 = vld [vmem:[#allocation7 + $0x1c4] sm:$0xf]  ;;  %v6596_v31 = vor.u32 %v7955_v54, %v6595_v27  ;;  %v7915_v27 = vld [vmem:[#allocation8 + $0xa8] sm:$0xff] }
 0x1f3   :  { %2064 = vmatmul.bf16.vlgmr.msrb.gmra.mxu1 %v1912_v44  ;;  %v7933_v44 = vld [vmem:[#allocation5 + $0x234] sm:$0xf0]  ;;  %v7923_v54 = vld [vmem:[#allocation8 + $0xe8] sm:$0xff] }
 0x1f4   :  { %v1907_v50 = vpop.f32.mrf.mxu3  ;;  %v2284_v52 = vpop.f32.mrf.mxu2  ;;  %2574 = vmatpush.bf16.msrb.mxu1 %v6415_v22  ;;  %v6508_v33 = vor.u32 %v7933_v44, %v6507_v41  ;;  %v6603_v22 = vld [vmem:[#allocation5 + $0x2f0] sm:$0xf]  ;;  %v7895_v41 = vld [vmem:[#allocation7 + $0x184] sm:$0xf0]  ;;  %v6579_v44 = vld [vmem:[#allocation5 + $0x2c0] sm:$0xf] }
 0x1f5   :  { %v2285_v59 = vadd.f32 %v2284_v52, %v2111_v42  ;;  %v7931_v50 = vld [vmem:[#allocation5 + $0x224] sm:$0xf0]  ;;  %v7929_v42 = vld [vmem:[#allocation5 + $0x214] sm:$0xf0] }
 0x1f6   :  { %2563 = vmatpush.bf16.msrb.mxu0 %v6335_v47  ;;  %v6391_v47 = vor.u32 %v7902_v38, %v6388_v39  ;;  %v6500_v52 = vor.u32 %v7931_v50, %v6499_v48  ;;  %v7953_v38 = vld [vmem:[#allocation5 + $0x2d4] sm:$0xf0]  ;;  %v6571_v50 = vld [vmem:[#allocation5 + $0x2b0] sm:$0xf] }
 0x1f7   :  { %v6588_v39 = vor.u32 %v7953_v38, %v6587_v36  ;;  %v7914_v36 = vld [vmem:[#allocation8 + $0xa0] sm:$0xff]  ;;  %v7971_v38 = vld [vmem:[#allocation7 + $0x264] sm:$0xf0] }
 0x1f8   :  { %2575 = vmatpush.bf16.msrb.mxu1 %v6407_v26  ;;  %v7899_v26 = vld [vmem:[#allocation7 + $0x1a4] sm:$0xf0] }
 0x1f9   :  { %v6371_v28 = vor.u32 %v7899_v26, %v6370_v25  ;;  %v7924_v25 = vld [vmem:[#allocation8 + $0xf0] sm:$0xff] }
 0x1fa   :  { %2564 = vmatpush.bf16.msrb.mxu0 %v6327_v53  ;;  %v6491_v53 = vld [vmem:[#allocation5 + $0x210] sm:$0xf] }
 0x1fb   :  { %v6492_v30 = vor.u32 %v7929_v42, %v6491_v53 }
 0x1fc   :  { %v2297_v63 = vpop.f32.mrf.mxu3  ;;  %v2286_v2 = vpop.f32.mrf.mxu2  ;;  %2576 = vmatpush.bf16.msrb.mxu1 %v6399_v37 }
 0x1fd   :  { %v2298_v0 = vadd.f32 %v2297_v63, %v2285_v59  ;;  %2309 = vmatmul.bf16.vlgmr.msra.gmra.mxu0 %v8540_v49  ;;  %v6295_v49 = vor.u32 %v7878_v9, %v6292_v10  ;;  %v1383_v59 = vmul.f32 0.01, %v8513_v58  ;;  %v6380_v2 = vld [vmem:[#allocation7 + $0x1b8] sm:$0xf0]  ;;  %v7905_v9 = vld [vmem:[#allocation7 + $0x1d4] sm:$0xf0] }
 0x1fe   :  { %2565 = vmatpush.bf16.msrb.mxu0 %v6319_v57  ;;  %v7927_v57 = vld [vmem:[#allocation5 + $0x204] sm:$0xf0] }
 0x1ff   :  { %vm2327_vm6 = vcmp.gt.f32.partialorder %v2298_v0, 0.0  ;;  %v2329_v4 = vmul.f32 0.01, %v2298_v0  ;;  %v6484_v61 = vor.u32 %v7927_v57, %v6483_v56  ;;  %v8569_v62 = vsel %vm1373_vm7, %v8513_v58, %v1383_v59  ;;  %v6394_v58 = vld [vmem:[#allocation7 + $0x1d0] sm:$0xf] }
 0x200   :  { %2577 = vmatpush.bf16.msrb.mxu1 %v6391_v47  ;;  %v8573_v63 = vpack.c.bf16 %v8569_v62, %v8569_v62  ;;  %v6395_v10 = vor.u32 %v7905_v9, %v6394_v58  ;;  %v6563_v56 = vld [vmem:[#allocation5 + $0x2a0] sm:$0xf]  ;;  %v7947_v57 = vld [vmem:[#allocation5 + $0x2a4] sm:$0xf0] }
 0x201   :  { %v2331_v6 = vsel %vm2327_vm6, %v2298_v0, %v2329_v4  ;;  %v7900_v0 = vld [vmem:[#allocation7 + $0x1b4] sm:$0xf]  ;;  %v7907_v4 = vld [vmem:[#allocation7 + $0x1e4] sm:$0xf0]  ;;  %v6564_v59 = vor.u32 %v7947_v57, %v6563_v56  ;;  %v7910_v56 = vld [vmem:[#allocation8 + $0x80] sm:$0xff] }
 0x202   :  { %v2333_v7 = vpack.c.bf16 %v2331_v6, %v2331_v6  ;;  %2566 = vmatpush.bf16.msrb.mxu0 %v6311_v46  ;;  %v6383_v46 = vor.u32 %v7900_v0, %v6380_v2  ;;  %v6403_v5 = vor.u32 %v7907_v4, %v6402_v3  ;;  %v7898_v6 = vld [vmem:[#allocation7 + $0x1a4] sm:$0xf]  ;;  %v6555_v0 = vld [vmem:[#allocation5 + $0x290] sm:$0xf]  ;;  %v7945_v2 = vld [vmem:[#allocation5 + $0x294] sm:$0xf0] }
 0x203   :  { %2322 = vmatmul.bf16.vlgmr.msra.gmra.mxu1 %v8550_v60  ;;  %v6523_v60 = vld [vmem:[#allocation5 + $0x250] sm:$0xf]  ;;  %v6556_v3 = vor.u32 %v7945_v2, %v6555_v0  ;;  %v6533_v0 = vld [vmem:[#allocation5 + $0x268] sm:$0xf0] }
 0x204   :  { %v2299_v11 = vpop.f32.mrf.mxu3  ;;  %2543 = vmatmul.bf16.vlgmr.msra.gmra.mxu2 %v2333_v7  ;;  %v6524_v34 = vor.u32 %v7937_v24, %v6523_v60  ;;  %2578 = vmatpush.bf16.msrb.mxu1 %v6383_v46  ;;  %v7957_v60 = vld [vmem:[#allocation5 + $0x2f4] sm:$0xf0] }
 0x205   :  { %2549 = vmatpush.bf16.msra.mxu3 %v6403_v5  ;;  %v7896_v11 = vld [vmem:[#allocation7 + $0x194] sm:$0xf]  ;;  %v6604_v24 = vor.u32 %v7957_v60, %v6603_v22 }
 0x206   :  { %2567 = vmatpush.bf16.msrb.mxu0 %v6303_v8  ;;  %v6367_v13 = vor.u32 %v7896_v11, %v6364_v12  ;;  %v7916_v60 = vld [vmem:[#allocation8 + $0xb0] sm:$0xff] }
 0x209   :  { %2550 = vmatpush.bf16.msra.mxu3 %v6395_v10  ;;  %v2112_v10 = vperm.slane %v8561_v51, 1  ;;  %v7925_v51 = vld [vmem:[#allocation8 + $0xf8] sm:$0xff] }
 0x20a   :  { %2568 = vmatpush.bf16.msrb.mxu0 %v6295_v49  ;;  %v6386_v49 = vld [vmem:[#allocation7 + $0x1c0] sm:$0xf] }
 0x20d   :  { %2569 = vmatmul.bf16.vlgmr.msrb.gmra.mxu0 %v2333_v7  ;;  %v6372_v7 = vld [vmem:[#allocation7 + $0x1a8] sm:$0xf0] }
 0x20e   :  { %2954 = vmatpush.bf16.msra.mxu0 %v6540_v15  ;;  %v6375_v8 = vor.u32 %v7898_v6, %v6372_v7  ;;  %v7903_v15 = vld [vmem:[#allocation7 + $0x1c4] sm:$0xf0]  ;;  %v6547_v6 = vld [vmem:[#allocation5 + $0x280] sm:$0xf] }
 0x20f   :  { %v6387_v16 = vor.u32 %v7903_v15, %v6386_v49  ;;  %v7943_v7 = vld [vmem:[#allocation5 + $0x284] sm:$0xf0] }
 0x210   :  { %2579 = vmatpush.bf16.msrb.mxu1 %v6375_v8  ;;  %v6548_v8 = vor.u32 %v7943_v7, %v6547_v6  ;;  %v7936_v7 = vld [vmem:[#allocation5 + $0x254] sm:$0xf] }
 0x211   :  { %2551 = vmatpush.bf16.msra.mxu3 %v6387_v16 }
 0x212   :  { %2955 = vmatpush.bf16.msra.mxu0 %v6532_v21  ;;  %v7901_v21 = vld [vmem:[#allocation7 + $0x1b4] sm:$0xf0] }
 0x213   :  { %v6379_v23 = vor.u32 %v7901_v21, %v6378_v20  ;;  %v1384_v21 = vmul.f32 0.01, %v8515_v1 }
 0x214   :  { %2580 = vmatpush.bf16.msrb.mxu1 %v6367_v13 }
 0x215   :  { %2552 = vmatpush.bf16.msra.mxu3 %v6379_v23  ;;  %v7917_v23 = vld [vmem:[#allocation8 + $0xb8] sm:$0xff]  ;;  %v8589_v26 = vsel %vm1374_vm9, %v8515_v1, %v1384_v21  ;;  %v6660_v1 = vld [vmem:[#allocation7 + $0x260] sm:$0xf] }
 0x216   :  { %2956 = vmatpush.bf16.msra.mxu0 %v6524_v34  ;;  %v6362_v34 = vld [vmem:[#allocation7 + $0x190] sm:$0xf]  ;;  %2722 = vmatpush.bf16.msrb.mxu2 %v7917_v23  ;;  %v7969_v21 = vld [vmem:[#allocation7 + $0x254] sm:$0xf0] }
 0x217   :  { %v6363_v37 = vor.u32 %v7897_v35, %v6362_v34  ;;  %v7973_v34 = vld [vmem:[#allocation7 + $0x274] sm:$0xf0] }
 0x218   :  { %2581 = vmatpush.bf16.msrb.mxu1 %v6359_v19 }
 0x219   :  { %2553 = vmatpush.bf16.msra.mxu3 %v6371_v28  ;;  %v8593_v28 = vpack.c.bf16 %v8589_v26, %v8589_v26 }
 0x21a   :  { %2957 = vmatpush.bf16.msra.mxu0 %v6516_v40  ;;  %v6354_v40 = vld [vmem:[#allocation7 + $0x180] sm:$0xf]  ;;  %2723 = vmatpush.bf16.msrb.mxu2 %v7916_v60  ;;  %v6501_v60 = vld [vmem:[#allocation5 + $0x228] sm:$0xf0] }
 0x21b   :  { %v6355_v47 = vor.u32 %v7895_v41, %v6354_v40  ;;  %v7913_v40 = vld [vmem:[#allocation8 + $0x98] sm:$0xff] }
 0x21c   :  { %2967 = vmatpush.bf16.msra.mxu1 %v6604_v24  ;;  %v7921_v41 = vld [vmem:[#allocation8 + $0xd8] sm:$0xff] }
 0x21d   :  { %2554 = vmatpush.bf16.msra.mxu3 %v6363_v37  ;;  %v7922_v37 = vld [vmem:[#allocation8 + $0xe0] sm:$0xff] }
 0x21e   :  { %2958 = vmatpush.bf16.msra.mxu0 %v6508_v33  ;;  %v7951_v33 = vld [vmem:[#allocation5 + $0x2c4] sm:$0xf0]  ;;  %2724 = vmatpush.bf16.msrb.mxu2 %v7915_v27  ;;  %v6581_v27 = vld [vmem:[#allocation5 + $0x2c8] sm:$0xf0] }
 0x21f   :  { %v6580_v48 = vor.u32 %v7951_v33, %v6579_v44  ;;  %v7912_v44 = vld [vmem:[#allocation8 + $0x90] sm:$0xff]  ;;  %v7911_v33 = vld [vmem:[#allocation8 + $0x88] sm:$0xff] }
 0x220   :  { %2968 = vmatpush.bf16.msra.mxu1 %v6596_v31  ;;  %v6668_v31 = vld [vmem:[#allocation7 + $0x270] sm:$0xf] }
 0x221   :  { %2555 = vmatpush.bf16.msra.mxu3 %v6355_v47  ;;  %v6669_v35 = vor.u32 %v7973_v34, %v6668_v31  ;;  %v7920_v47 = vld [vmem:[#allocation8 + $0xd0] sm:$0xff]  ;;  %v7967_v31 = vld [vmem:[#allocation7 + $0x244] sm:$0xf0] }
 0x222   :  { %2959 = vmatpush.bf16.msra.mxu0 %v6500_v52  ;;  %v7949_v52 = vld [vmem:[#allocation5 + $0x2b4] sm:$0xf0]  ;;  %2725 = vmatpush.bf16.msrb.mxu2 %v7914_v36  ;;  %v7928_v36 = vld [vmem:[#allocation5 + $0x214] sm:$0xf] }
 0x223   :  { %v6572_v53 = vor.u32 %v7949_v52, %v6571_v50  ;;  %v7940_v52 = vld [vmem:[#allocation5 + $0x274] sm:$0xf] }
 0x224   :  { %2969 = vmatpush.bf16.msra.mxu1 %v6588_v39  ;;  %v6661_v39 = vor.u32 %v7971_v38, %v6660_v1  ;;  %v7948_v1 = vld [vmem:[#allocation5 + $0x2b4] sm:$0xf] }
 0x225   :  { %2735 = vmatpush.bf16.msrb.mxu3 %v7925_v51  ;;  %v7930_v51 = vld [vmem:[#allocation5 + $0x224] sm:$0xf] }
 0x226   :  { %2960 = vmatpush.bf16.msra.mxu0 %v6492_v30  ;;  %v8218_v30 = vld [vmem:[%s8759_s8] ss:$0 sm:$0xff]  ;;  %2726 = vmatpush.bf16.msrb.mxu2 %v7913_v40  ;;  %v6636_v40 = vld [vmem:[#allocation7 + $0x230] sm:$0xf] }
 0x228   :  { %2970 = vmatpush.bf16.msra.mxu1 %v6580_v48  ;;  %v7919_v48 = vld [vmem:[#allocation8 + $0xc8] sm:$0xff] }
 0x229   :  { %2736 = vmatpush.bf16.msrb.mxu3 %v7924_v25  ;;  %v6504_v25 = vor.u32 %v7930_v51, %v6501_v60  ;;  %v7972_v51 = vld [vmem:[#allocation7 + $0x274] sm:$0xf]  ;;  %v6670_v60 = vld [vmem:[#allocation7 + $0x278] sm:$0xf0] }
 0x22a   :  { %2961 = vmatpush.bf16.msra.mxu0 %v6484_v61  ;;  %2727 = vmatpush.bf16.msrb.mxu2 %v7912_v44 }
 0x22c   :  { %2971 = vmatpush.bf16.msra.mxu1 %v6572_v53  ;;  %v6541_v53 = vld [vmem:[#allocation5 + $0x278] sm:$0xf0] }
 0x22d   :  { %2962 = vmatmul.bf16.vlgmr.msra.gmra.mxu0 %v8573_v63  ;;  %2737 = vmatpush.bf16.msrb.mxu3 %v7923_v54  ;;  %v6544_v57 = vor.u32 %v7940_v52, %v6541_v53  ;;  %v6644_v54 = vld [vmem:[#allocation7 + $0x240] sm:$0xf]  ;;  %v7946_v52 = vld [vmem:[#allocation5 + $0x2a4] sm:$0xf] }
 0x22e   :  { %3214 = vmatpush.bf16.msrb.mxu0 %v6669_v35  ;;  %2728 = vmatpush.bf16.msrb.mxu2 %v7911_v33  ;;  %v6645_v35 = vor.u32 %v7967_v31, %v6644_v54  ;;  %v7926_v33 = vld [vmem:[#allocation5 + $0x204] sm:$0xf] }
 0x22f   :  { %v7970_v31 = vld [vmem:[#allocation7 + $0x264] sm:$0xf] }
 0x230   :  { %2972 = vmatpush.bf16.msra.mxu1 %v6564_v59  ;;  %v7918_v59 = vld [vmem:[#allocation8 + $0xc0] sm:$0xff] }
 0x231   :  { %2738 = vmatpush.bf16.msrb.mxu3 %v7922_v37  ;;  %v6493_v37 = vld [vmem:[#allocation5 + $0x218] sm:$0xf0] }
 0x232   :  { %3215 = vmatpush.bf16.msrb.mxu0 %v6661_v39  ;;  %2729 = vmatpush.bf16.msrb.mxu2 %v7910_v56  ;;  %v6496_v38 = vor.u32 %v7928_v36, %v6493_v37  ;;  %v6573_v39 = vld [vmem:[#allocation5 + $0x2b8] sm:$0xf0]  ;;  %v7963_v56 = vld [vmem:[#allocation7 + $0x224] sm:$0xf0]  ;;  %v7968_v37 = vld [vmem:[#allocation7 + $0x254] sm:$0xf] }
 0x233   :  { %v6576_v44 = vor.u32 %v7948_v1, %v6573_v39  ;;  %v6654_v1 = vld [vmem:[#allocation7 + $0x258] sm:$0xf0] }
 0x234   :  { %2973 = vmatpush.bf16.msra.mxu1 %v6556_v3  ;;  %v6597_v3 = vld [vmem:[#allocation5 + $0x2e8] sm:$0xf0] }
 0x235   :  { %2739 = vmatpush.bf16.msrb.mxu3 %v7921_v41  ;;  %v7965_v41 = vld [vmem:[#allocation7 + $0x234] sm:$0xf0] }
 0x236   :  { %2980 = vmatpush.bf16.msra.mxu2 %v6544_v57 }
 0x238   :  { %2974 = vmatpush.bf16.msra.mxu1 %v6548_v8  ;;  %v6525_v8 = vld [vmem:[#allocation5 + $0x258] sm:$0xf0] }
 0x239   :  { %2740 = vmatpush.bf16.msrb.mxu3 %v7920_v47  ;;  %v6637_v47 = vor.u32 %v7965_v41, %v6636_v40  ;;  %v6657_v40 = vor.u32 %v7968_v37, %v6654_v1  ;;  %v7966_v41 = vld [vmem:[#allocation7 + $0x244] sm:$0xf]  ;;  %v1385_v37 = vmul.f32 0.01, %v8519_v32 }
 0x23d   :  { %2741 = vmatpush.bf16.msrb.mxu3 %v7919_v48  ;;  %v6485_v48 = vld [vmem:[#allocation5 + $0x208] sm:$0xf0] }
 0x23e   :  { %v6488_v53 = vor.u32 %v7926_v33, %v6485_v48 }
 0x241   :  { %2742 = vmatpush.bf16.msrb.mxu3 %v7918_v59 }
 0x26a   :  { %v2052_v42 = vpop.f32.mrf.mxu0 }
 0x26b   :  { %v2053_v61 = vadd.f32 %v8218_v30, %v2052_v42  ;;  %v7956_v42 = vld [vmem:[#allocation5 + $0x2f4] sm:$0xf]  ;;  %v6605_v30 = vld [vmem:[#allocation5 + $0x2f8] sm:$0xf0] }
 0x26c   :  { %v6608_v2 = vor.u32 %v7956_v42, %v6605_v30  ;;  %v6565_v42 = vld [vmem:[#allocation5 + $0x2a8] sm:$0xf0]  ;;  %v6628_v30 = vld [vmem:[#allocation7 + $0x220] sm:$0xf] }
 0x26d   :  { %v6568_v57 = vor.u32 %v7946_v52, %v6565_v42  ;;  %v6629_v59 = vor.u32 %v7963_v56, %v6628_v30  ;;  %v7964_v52 = vld [vmem:[#allocation7 + $0x234] sm:$0xf]  ;;  %v7962_v30 = vld [vmem:[#allocation7 + $0x224] sm:$0xf]  ;;  %v6630_v56 = vld [vmem:[#allocation7 + $0x228] sm:$0xf0] }
 0x270   :  { %v2065_v46 = vpop.f32.mrf.mxu1 }
 0x271   :  { %v8579_v4 = vadd.f32 %v2065_v46, %v2053_v61  ;;  %v7938_v61 = vld [vmem:[#allocation5 + $0x264] sm:$0xf] }
 0x272   :  { %v2054_v5 = vpop.f32.mrf.mxu0  ;;  %v7954_v46 = vld [vmem:[#allocation5 + $0x2e4] sm:$0xf] }
 0x273   :  { %v6536_v5 = vor.u32 %v7938_v61, %v6533_v0  ;;  %v7944_v61 = vld [vmem:[#allocation5 + $0x294] sm:$0xf]  ;;  %v6557_v0 = vld [vmem:[#allocation5 + $0x298] sm:$0xf0]  ;;  %vm2069_vm3 = vcmp.gt.f32.partialorder %v8579_v4, 0.0 }
 0x275   :  { %2981 = vmatpush.bf16.msra.mxu2 %v6536_v5 }
 0x278   :  { %v2067_v58 = vpop.f32.mrf.mxu1 }
 0x279   :  { %v6600_v58 = vor.u32 %v7954_v46, %v6597_v3  ;;  %v6620_v46 = vld [vmem:[#allocation7 + $0x210] sm:$0xf]  ;;  %v7961_v3 = vld [vmem:[#allocation7 + $0x214] sm:$0xf0] }
 0x27a   :  { %v2310_v9 = vpop.f32.mrf.mxu0  ;;  %v6621_v5 = vor.u32 %v7961_v3, %v6620_v46  ;;  %v6614_v46 = vld [vmem:[#allocation7 + $0x208] sm:$0xf0]  ;;  %v6861_v3 = vld [vmem:[#allocation5 + $0x370] sm:$0xf] }
 0x27b   :  { %v2311_v11 = vadd.f32 %v2310_v9, %v2112_v10  ;;  %v6528_v9 = vor.u32 %v7936_v7, %v6525_v8  ;;  %v7934_v10 = vld [vmem:[#allocation5 + $0x244] sm:$0xf]  ;;  %v6549_v7 = vld [vmem:[#allocation5 + $0x288] sm:$0xf0] }
 0x27d   :  { %2982 = vmatpush.bf16.msra.mxu2 %v6528_v9  ;;  %v7959_v9 = vld [vmem:[#allocation7 + $0x204] sm:$0xf0] }
 0x280   :  { %v2323_v12 = vpop.f32.mrf.mxu1 }
 0x281   :  { %v2324_v13 = vadd.f32 %v2323_v12, %v2311_v11  ;;  %v6517_v11 = vld [vmem:[#allocation5 + $0x248] sm:$0xf0] }
 0x282   :  { %v2312_v49 = vpop.f32.mrf.mxu0  ;;  %v6520_v12 = vor.u32 %v7934_v10, %v6517_v11  ;;  %v6287_v11 = vld [vmem:[%s8757_s6 + $0x1] ss:$8 sm:$0x3] }
 0x283   :  { %vm2328_vm8 = vcmp.gt.f32.partialorder %v2324_v13, 0.0  ;;  %v2330_v15 = vmul.f32 0.01, %v2324_v13  ;;  %v6509_v49 = vld [vmem:[#allocation5 + $0x238] sm:$0xf0] }
 0x284   :  { %2983 = vmatpush.bf16.msra.mxu2 %v6520_v12  ;;  %v2372_v12 = vperm.slane %v6287_v11, 1 }
 0x285   :  { %v2332_v16 = vsel %vm2328_vm8, %v2324_v13, %v2330_v15  ;;  %v7932_v13 = vld [vmem:[#allocation5 + $0x234] sm:$0xf] }
 0x286   :  { %v2334_v17 = vpack.c.bf16 %v2332_v16, %v2332_v16  ;;  %v7952_v15 = vld [vmem:[#allocation5 + $0x2d4] sm:$0xf]  ;;  %v6512_v16 = vor.u32 %v7932_v13, %v6509_v49 }
 0x287   :  { %v8582_v18 = vpop.f32.mrf.mxu2 }
 0x288   :  { %v2325_v19 = vpop.f32.mrf.mxu1  ;;  %2556 = vmatmul.bf16.vlgmr.msra.gmra.mxu3 %v2334_v17  ;;  %2582 = vmatmul.bf16.vlgmr.msrb.gmra.mxu1 %v2334_v17  ;;  %v6589_v17 = vld [vmem:[#allocation5 + $0x2d8] sm:$0xf0] }
 0x289   :  { %2993 = vmatpush.bf16.msra.mxu3 %v6608_v2  ;;  %v6652_v19 = vld [vmem:[#allocation7 + $0x250] sm:$0xf]  ;;  %2984 = vmatpush.bf16.msra.mxu2 %v6512_v16  ;;  %v6560_v2 = vor.u32 %v7944_v61, %v6557_v0  ;;  %v6622_v61 = vld [vmem:[#allocation7 + $0x218] sm:$0xf0] }
 0x28a   :  { %v8584_v20 = vpop.f32.mrf.mxu0  ;;  %v6653_v23 = vor.u32 %v7969_v21, %v6652_v19 }
 0x28b   :  { %v2571_v13 = vadd.f32 %v8584_v20, %v2372_v12  ;;  %v6726_v12 = vld [vmem:[#allocation7 + $0x2e8] sm:$0xf0] }
 0x28c   :  { %3216 = vmatpush.bf16.msrb.mxu0 %v6653_v23 }
 0x28d   :  { %2994 = vmatpush.bf16.msra.mxu3 %v6600_v58  ;;  %2985 = vmatpush.bf16.msra.mxu2 %v6504_v25  ;;  %v6612_v58 = vld [vmem:[#allocation7 + $0x200] sm:$0xf] }
 0x28e   :  { %v6613_v10 = vor.u32 %v7959_v9, %v6612_v58  ;;  %v7988_v58 = vld [vmem:[#allocation7 + $0x2f4] sm:$0xf]  ;;  %v6734_v9 = vld [vmem:[#allocation7 + $0x2f8] sm:$0xf0] }
 0x28f   :  { %v2546_v22 = vpop.f32.mrf.mxu2 }
 0x290   :  { %v6592_v22 = vor.u32 %v7952_v15, %v6589_v17  ;;  %3217 = vmatpush.bf16.msrb.mxu0 %v6645_v35  ;;  %v2371_v15 = vperm.slane %v6287_v11, 0  ;;  %v6737_v11 = vor.u32 %v7988_v58, %v6734_v9  ;;  %v6700_v9 = vld [vmem:[#allocation7 + $0x2b0] sm:$0xf] }
 0x291   :  { %2986 = vmatpush.bf16.msra.mxu2 %v6496_v38 }
 0x292   :  { %v2572_v24 = vpop.f32.mrf.mxu0  ;;  %2995 = vmatpush.bf16.msra.mxu3 %v6592_v22  ;;  %v2545_v19 = vadd.f32 %v8582_v18, %v2371_v15  ;;  %v6662_v18 = vld [vmem:[#allocation7 + $0x268] sm:$0xf0] }
 0x293   :  { %v7950_v24 = vld [vmem:[#allocation5 + $0x2c4] sm:$0xf]  ;;  %v6665_v35 = vor.u32 %v7970_v31, %v6662_v18  ;;  %v6813_v31 = vld [vmem:[#allocation5 + $0x310] sm:$0xf]  ;;  %v8009_v18 = vld [vmem:[#allocation5 + $0x314] sm:$0xf0] }
 0x294   :  { %v6584_v34 = vor.u32 %v7950_v24, %v6581_v27  ;;  %3218 = vmatpush.bf16.msrb.mxu0 %v6637_v47  ;;  %v8607_v24 = vld [vmem:[%s8755_s4 + $0x2] ss:$8 sm:$0x3]  ;;  %v6673_v27 = vor.u32 %v7972_v51, %v6670_v60  ;;  %v6829_v60 = vld [vmem:[#allocation5 + $0x330] sm:$0xf] }
 0x295   :  { %2987 = vmatpush.bf16.msra.mxu2 %v6488_v53  ;;  %v2790_v54 = vperm.slane %v8607_v24, 0  ;;  %v6638_v53 = vld [vmem:[#allocation7 + $0x238] sm:$0xf0] }
 0x296   :  { %2996 = vmatpush.bf16.msra.mxu3 %v6584_v34 }
 0x298   :  { %2975 = vmatmul.bf16.vlgmr.msra.gmra.mxu1 %v8593_v28  ;;  %3219 = vmatpush.bf16.msrb.mxu0 %v6629_v59  ;;  %v7960_v59 = vld [vmem:[#allocation7 + $0x214] sm:$0xf] }
 0x299   :  { %v6625_v0 = vor.u32 %v7960_v59, %v6622_v61  ;;  %v6716_v59 = vld [vmem:[#allocation7 + $0x2d0] sm:$0xf]  ;;  %v7985_v61 = vld [vmem:[#allocation7 + $0x2d4] sm:$0xf0] }
 0x29a   :  { %2997 = vmatpush.bf16.msra.mxu3 %v6576_v44  ;;  %v6646_v44 = vld [vmem:[#allocation7 + $0x248] sm:$0xf0] }
 0x29b   :  { %v6649_v48 = vor.u32 %v7966_v41, %v6646_v44  ;;  %v6710_v41 = vld [vmem:[#allocation7 + $0x2c8] sm:$0xf0]  ;;  %v6732_v44 = vld [vmem:[#allocation7 + $0x2f0] sm:$0xf] }
 0x29c   :  { %3220 = vmatpush.bf16.msrb.mxu0 %v6621_v5 }
 0x29e   :  { %2998 = vmatpush.bf16.msra.mxu3 %v6568_v57  ;;  %v6633_v57 = vor.u32 %v7962_v30, %v6630_v56  ;;  %v7978_v30 = vld [vmem:[#allocation7 + $0x2a4] sm:$0xf]  ;;  %v6694_v56 = vld [vmem:[#allocation7 + $0x2a8] sm:$0xf0] }
 0x2a0   :  { %3221 = vmatpush.bf16.msrb.mxu0 %v6613_v10  ;;  %v7986_v10 = vld [vmem:[#allocation7 + $0x2e4] sm:$0xf] }
 0x2a1   :  { %v6729_v15 = vor.u32 %v7986_v10, %v6726_v12  ;;  %v7981_v10 = vld [vmem:[#allocation7 + $0x2b4] sm:$0xf0] }
 0x2a2   :  { %2999 = vmatpush.bf16.msra.mxu3 %v6560_v2  ;;  %v7958_v2 = vld [vmem:[#allocation7 + $0x204] sm:$0xf]  ;;  %v8037_v12 = vld [vmem:[#allocation5 + $0x3f4] sm:$0xf0] }
 0x2a3   :  { %v6617_v5 = vor.u32 %v7958_v2, %v6614_v46  ;;  %v7976_v2 = vld [vmem:[#allocation7 + $0x294] sm:$0xf]  ;;  %v6686_v46 = vld [vmem:[#allocation7 + $0x298] sm:$0xf0] }
 0x2aa   :  { %v8596_v50 = vpop.f32.mrf.mxu0 }
 0x2ab   :  { %v2964_v36 = vadd.f32 %v8596_v50, %v2790_v54  ;;  %v6641_v50 = vor.u32 %v7964_v52, %v6638_v53  ;;  %v8011_v54 = vld [vmem:[#allocation5 + $0x324] sm:$0xf0]  ;;  %v6702_v52 = vld [vmem:[#allocation7 + $0x2b8] sm:$0xf0]  ;;  %v6724_v53 = vld [vmem:[#allocation7 + $0x2e0] sm:$0xf] }
 0x2b2   :  { %v2965_v6 = vpop.f32.mrf.mxu0 }
 0x2b3   :  { %v7942_v6 = vld [vmem:[#allocation5 + $0x284] sm:$0xf] }
 0x2b4   :  { %v6552_v8 = vor.u32 %v7942_v6, %v6549_v7  ;;  %v6853_v7 = vld [vmem:[#allocation5 + $0x360] sm:$0xf] }
 0x2b6   :  { %3000 = vmatpush.bf16.msra.mxu3 %v6552_v8  ;;  %v8019_v8 = vld [vmem:[#allocation5 + $0x364] sm:$0xf0] }
 0x305   :  { %v2583_v49 = vpop.f32.mrf.mxu1 }
 0x306   :  { %v2584_v16 = vadd.f32 %v2583_v49, %v2571_v13  ;;  %v6845_v13 = vld [vmem:[#allocation5 + $0x350] sm:$0xf]  ;;  %v8017_v49 = vld [vmem:[#allocation5 + $0x354] sm:$0xf0] }
 0x308   :  { %v2588_v17 = vadd.f32 %v2584_v16, %v8546_v55  ;;  %v7984_v16 = vld [vmem:[#allocation7 + $0x2d4] sm:$0xf] }
 0x30a   :  { %v2590_v21 = vpack.c.bf16 %v2588_v17, %v2588_v17  ;;  %v6718_v17 = vld [vmem:[#allocation7 + $0x2d8] sm:$0xf0] }
 0x30b   :  { %v2557_v22 = vpop.f32.mrf.mxu3 }
 0x30c   :  { %v2558_v23 = vadd.f32 %v2557_v22, %v2545_v19  ;;  %2743 = vmatmul.bf16.vlgmr.msrb.gmra.mxu3 %v2590_v21  ;;  %v6846_v19 = vor.u32 %v8017_v49, %v6845_v13  ;;  %v6837_v21 = vld [vmem:[#allocation5 + $0x340] sm:$0xf]  ;;  %v8015_v22 = vld [vmem:[#allocation5 + $0x344] sm:$0xf0] }
 0x30d   :  { %v2585_v25 = vpop.f32.mrf.mxu1  ;;  %3253 = vmatpush.bf16.msrb.mxu3 %v6737_v11  ;;  %v6838_v51 = vor.u32 %v8015_v22, %v6837_v21  ;;  %v6701_v11 = vor.u32 %v7981_v10, %v6700_v9  ;;  %v6692_v49 = vld [vmem:[#allocation7 + $0x2a0] sm:$0xf]  ;;  %v6684_v22 = vld [vmem:[#allocation7 + $0x290] sm:$0xf]  ;;  %v1386_v10 = vmul.f32 0.01, %v8521_v43 }
 0x30e   :  { %v2587_v20 = vadd.f32 %v2558_v23, %v8536_v45  ;;  %v6721_v23 = vor.u32 %v7984_v16, %v6718_v17  ;;  %v8013_v25 = vld [vmem:[#allocation5 + $0x334] sm:$0xf0]  ;;  %v6917_v16 = vld [vmem:[#allocation5 + $0x3e0] sm:$0xf] }
 0x310   :  { %v2589_v55 = vpack.c.bf16 %v2587_v20, %v2587_v20  ;;  %v6830_v20 = vor.u32 %v8013_v25, %v6829_v60  ;;  %v8033_v25 = vld [vmem:[#allocation5 + $0x3d4] sm:$0xf0] }
 0x311   :  { %3254 = vmatpush.bf16.msrb.mxu3 %v6729_v15  ;;  %v7979_v15 = vld [vmem:[#allocation7 + $0x2a4] sm:$0xf0] }
 0x312   :  { %2730 = vmatmul.bf16.vlgmr.msrb.gmra.mxu2 %v2589_v55  ;;  %v6693_v17 = vor.u32 %v7979_v15, %v6692_v49  ;;  %v8004_v15 = vld [vmem:[#allocation8 + $0x170] sm:$0xff] }
 0x313   :  { %3240 = vmatpush.bf16.msrb.mxu2 %v6673_v27  ;;  %v2559_v34 = vpop.f32.mrf.mxu3  ;;  %v6821_v27 = vld [vmem:[#allocation5 + $0x320] sm:$0xf] }
 0x314   :  { %v6822_v55 = vor.u32 %v8011_v54, %v6821_v27  ;;  %v6814_v34 = vor.u32 %v8009_v18, %v6813_v31  ;;  %v6676_v27 = vld [vmem:[#allocation7 + $0x280] sm:$0xf]  ;;  %v7975_v54 = vld [vmem:[#allocation7 + $0x284] sm:$0xf0] }
 0x315   :  { %v2976_v38 = vpop.f32.mrf.mxu1  ;;  %3255 = vmatpush.bf16.msrb.mxu3 %v6721_v23  ;;  %v7977_v23 = vld [vmem:[#allocation7 + $0x294] sm:$0xf0]  ;;  %v6677_v31 = vor.u32 %v7975_v54, %v6676_v27  ;;  %v8031_v18 = vld [vmem:[#allocation5 + $0x3c4] sm:$0xf0] }
 0x316   :  { %v2977_v39 = vadd.f32 %v2976_v38, %v2964_v36  ;;  %v8007_v36 = vld [vmem:[#allocation5 + $0x304] sm:$0xf0]  ;;  %v8617_v38 = vsel %vm1375_vm11, %v8519_v32, %v1385_v37  ;;  %v6685_v60 = vor.u32 %v7977_v23, %v6684_v22  ;;  %v8001_v22 = vld [vmem:[#allocation8 + $0x158] sm:$0xff]  ;;  %v7992_v23 = vld [vmem:[#allocation8 + $0x110] sm:$0xff] }
 0x317   :  { %3241 = vmatpush.bf16.msrb.mxu2 %v6665_v35  ;;  %v6805_v35 = vld [vmem:[#allocation5 + $0x300] sm:$0xf]  ;;  %v7987_v32 = vld [vmem:[#allocation7 + $0x2e4] sm:$0xf0] }
 0x318   :  { %vm3006_vm10 = vcmp.gt.f32.partialorder %v2977_v39, 0.0  ;;  %v3008_v45 = vmul.f32 0.01, %v2977_v39  ;;  %v6806_v1 = vor.u32 %v8007_v36, %v6805_v35  ;;  %v6893_v35 = vld [vmem:[#allocation5 + $0x3b0] sm:$0xf]  ;;  %v7991_v27 = vld [vmem:[#allocation8 + $0x108] sm:$0xff] }
 0x319   :  { %v8029_v36 = vld [vmem:[#allocation5 + $0x3b4] sm:$0xf0] }
 0x31a   :  { %v3010_v47 = vsel %vm3006_vm10, %v2977_v39, %v3008_v45  ;;  %v8621_v39 = vpack.c.bf16 %v8617_v38, %v8617_v38 }
 0x31b   :  { %v3012_v33 = vpack.c.bf16 %v3010_v47, %v3010_v47  ;;  %3242 = vmatpush.bf16.msrb.mxu2 %v6657_v40  ;;  %v7982_v40 = vld [vmem:[#allocation7 + $0x2c4] sm:$0xf]  ;;  %v7989_v47 = vld [vmem:[#allocation7 + $0x2f4] sm:$0xf0] }
 0x31c   :  { %3001 = vmatmul.bf16.vlgmr.msra.gmra.mxu3 %v8593_v28  ;;  %v8021_v28 = vld [vmem:[#allocation5 + $0x374] sm:$0xf0]  ;;  %v6713_v45 = vor.u32 %v7982_v40, %v6710_v41  ;;  %v6885_v40 = vld [vmem:[#allocation5 + $0x3a0] sm:$0xf]  ;;  %v8027_v41 = vld [vmem:[#allocation5 + $0x3a4] sm:$0xf0] }
 0x31d   :  { %v2978_v42 = vpop.f32.mrf.mxu1  ;;  %3222 = vmatmul.bf16.vlgmr.msrb.gmra.mxu0 %v3012_v33  ;;  %v6862_v6 = vor.u32 %v8021_v28, %v6861_v3  ;;  %v6708_v3 = vld [vmem:[#allocation7 + $0x2c0] sm:$0xf]  ;;  %v6689_v28 = vor.u32 %v7976_v2, %v6686_v46  ;;  %v2791_v2 = vperm.slane %v8607_v24, 1  ;;  %v7997_v24 = vld [vmem:[#allocation8 + $0x138] sm:$0xff] }
 0x31e   :  { %3256 = vmatpush.bf16.msrb.mxu3 %v6713_v45  ;;  %v8219_v45 = vld [vmem:[%s8759_s8 + $0x1] ss:$0 sm:$0xff]  ;;  %3401 = vmatpush.bf16.msra.mxu0 %v7997_v24  ;;  %v8006_v24 = vld [vmem:[#allocation5 + $0x304] sm:$0xf] }
 0x31f   :  { %3243 = vmatpush.bf16.msrb.mxu2 %v6649_v48  ;;  %v7980_v48 = vld [vmem:[#allocation7 + $0x2b4] sm:$0xf] }
 0x320   :  { %v6705_v42 = vor.u32 %v7980_v48, %v6702_v52  ;;  %v6877_v48 = vld [vmem:[#allocation5 + $0x390] sm:$0xf]  ;;  %v8025_v52 = vld [vmem:[#allocation5 + $0x394] sm:$0xf0] }
 0x322   :  { %2988 = vmatmul.bf16.vlgmr.msra.gmra.mxu2 %v8573_v63  ;;  %v6854_v63 = vor.u32 %v8019_v8, %v6853_v7  ;;  %3257 = vmatpush.bf16.msrb.mxu3 %v6705_v42  ;;  %v7974_v7 = vld [vmem:[#allocation7 + $0x284] sm:$0xf]  ;;  %v6678_v8 = vld [vmem:[#allocation7 + $0x288] sm:$0xf0]  ;;  %v6878_v42 = vor.u32 %v8025_v52, %v6877_v48  ;;  %v6847_v48 = vld [vmem:[#allocation5 + $0x358] sm:$0xf0] }
 0x323   :  { %3244 = vmatpush.bf16.msrb.mxu2 %v6641_v50  ;;  %v6725_v50 = vor.u32 %v7987_v32, %v6724_v53  ;;  %v6681_v58 = vor.u32 %v7974_v7, %v6678_v8  ;;  %v6869_v32 = vld [vmem:[#allocation5 + $0x380] sm:$0xf] }
 0x327   :  { %3245 = vmatpush.bf16.msrb.mxu2 %v6633_v57  ;;  %v6697_v57 = vor.u32 %v7978_v30, %v6694_v56 }
 0x329   :  { %3258 = vmatpush.bf16.msrb.mxu3 %v6697_v57 }
 0x32b   :  { %3246 = vmatpush.bf16.msrb.mxu2 %v6625_v0  ;;  %v6717_v0 = vor.u32 %v7985_v61, %v6716_v59 }
 0x32d   :  { %3259 = vmatpush.bf16.msrb.mxu3 %v6689_v28 }
 0x32f   :  { %3247 = vmatpush.bf16.msrb.mxu2 %v6617_v5  ;;  %v7983_v5 = vld [vmem:[#allocation7 + $0x2c4] sm:$0xf0] }
 0x331   :  { %3260 = vmatpush.bf16.msrb.mxu3 %v6681_v58 }
 0x332   :  { %3248 = vmatmul.bf16.vlgmr.msrb.gmra.mxu2 %v3012_v33  ;;  %v6733_v33 = vor.u32 %v7989_v47, %v6732_v44  ;;  %v6886_v44 = vor.u32 %v8027_v41, %v6885_v40  ;;  %v6855_v40 = vld [vmem:[#allocation5 + $0x368] sm:$0xf0]  ;;  %v7998_v41 = vld [vmem:[#allocation8 + $0x140] sm:$0xff] }
 0x333   :  { %3633 = vmatpush.bf16.msra.mxu2 %v6862_v6  ;;  %v6709_v6 = vor.u32 %v7983_v5, %v6708_v3 }
 0x334   :  { %3227 = vmatpush.bf16.msrb.mxu1 %v6733_v33 }
 0x337   :  { %3634 = vmatpush.bf16.msra.mxu2 %v6854_v63  ;;  %v6925_v63 = vld [vmem:[#allocation5 + $0x3f0] sm:$0xf] }
 0x338   :  { %3228 = vmatpush.bf16.msrb.mxu1 %v6725_v50  ;;  %v6926_v13 = vor.u32 %v8037_v12, %v6925_v63  ;;  %v8023_v50 = vld [vmem:[#allocation5 + $0x384] sm:$0xf0]  ;;  %v8637_v63 = vsel %vm1376_vm13, %v8521_v43, %v1386_v10  ;;  %v8005_v12 = vld [vmem:[#allocation8 + $0x178] sm:$0xff]  ;;  %v7994_v43 = vld [vmem:[#allocation8 + $0x120] sm:$0xff] }
 0x339   :  { %v6870_v57 = vor.u32 %v8023_v50, %v6869_v32  ;;  %v8012_v50 = vld [vmem:[#allocation5 + $0x334] sm:$0xf] }
 0x33a   :  { %3646 = vmatpush.bf16.msra.mxu3 %v6926_v13  ;;  %v8641_v13 = vpack.c.bf16 %v8637_v63, %v8637_v63 }
 0x33b   :  { %3635 = vmatpush.bf16.msra.mxu2 %v6846_v19  ;;  %v8035_v19 = vld [vmem:[#allocation5 + $0x3e4] sm:$0xf0] }
 0x33c   :  { %3229 = vmatpush.bf16.msrb.mxu1 %v6717_v0  ;;  %v6918_v21 = vor.u32 %v8035_v19, %v6917_v16  ;;  %v7995_v16 = vld [vmem:[#allocation8 + $0x128] sm:$0xff]  ;;  %v8002_v19 = vld [vmem:[#allocation8 + $0x160] sm:$0xff] }
 0x33e   :  { %3647 = vmatpush.bf16.msra.mxu3 %v6918_v21  ;;  %v7993_v21 = vld [vmem:[#allocation8 + $0x118] sm:$0xff] }
 0x33f   :  { %3636 = vmatpush.bf16.msra.mxu2 %v6838_v51  ;;  %v6909_v51 = vld [vmem:[#allocation5 + $0x3d0] sm:$0xf] }
 0x340   :  { %3230 = vmatpush.bf16.msrb.mxu1 %v6709_v6 }
 0x343   :  { %3637 = vmatpush.bf16.msra.mxu2 %v6830_v20  ;;  %v6910_v20 = vor.u32 %v8033_v25, %v6909_v51  ;;  %v6990_v51 = vld [vmem:[#allocation7 + $0x370] sm:$0xf]  ;;  %v8053_v25 = vld [vmem:[#allocation7 + $0x374] sm:$0xf0] }
 0x344   :  { %3231 = vmatpush.bf16.msrb.mxu1 %v6701_v11  ;;  %v7996_v11 = vld [vmem:[#allocation8 + $0x130] sm:$0xff] }
 0x345   :  { %3648 = vmatpush.bf16.msra.mxu3 %v6910_v20  ;;  %3402 = vmatpush.bf16.msra.mxu0 %v7996_v11  ;;  %v6991_v20 = vor.u32 %v8053_v25, %v6990_v51  ;;  %v6807_v11 = vld [vmem:[#allocation5 + $0x308] sm:$0xf0]  ;;  %v6966_v51 = vld [vmem:[#allocation7 + $0x340] sm:$0xf] }
 0x347   :  { %3638 = vmatpush.bf16.msra.mxu2 %v6822_v55  ;;  %v6901_v55 = vld [vmem:[#allocation5 + $0x3c0] sm:$0xf] }
 0x348   :  { %3232 = vmatpush.bf16.msrb.mxu1 %v6693_v17  ;;  %v8003_v17 = vld [vmem:[#allocation8 + $0x168] sm:$0xff] }
 0x349   :  { %3403 = vmatpush.bf16.msra.mxu0 %v7995_v16  ;;  %v6974_v16 = vld [vmem:[#allocation7 + $0x350] sm:$0xf] }
 0x34b   :  { %3639 = vmatpush.bf16.msra.mxu2 %v6814_v34  ;;  %v6902_v34 = vor.u32 %v8031_v18, %v6901_v55  ;;  %v8020_v55 = vld [vmem:[#allocation5 + $0x374] sm:$0xf]  ;;  %v7999_v18 = vld [vmem:[#allocation8 + $0x148] sm:$0xff] }
 0x34c   :  { %3233 = vmatpush.bf16.msrb.mxu1 %v6685_v60  ;;  %v8000_v60 = vld [vmem:[#allocation8 + $0x150] sm:$0xff] }
 0x34d   :  { %3649 = vmatpush.bf16.msra.mxu3 %v6902_v34  ;;  %3404 = vmatpush.bf16.msra.mxu0 %v7994_v43  ;;  %v7990_v34 = vld [vmem:[#allocation8 + $0x100] sm:$0xff] }
 0x34f   :  { %3640 = vmatpush.bf16.msra.mxu2 %v6806_v1  ;;  %v6894_v1 = vor.u32 %v8029_v36, %v6893_v35  ;;  %v8036_v35 = vld [vmem:[#allocation5 + $0x3f4] sm:$0xf]  ;;  %v6927_v36 = vld [vmem:[#allocation5 + $0x3f8] sm:$0xf0] }
 0x350   :  { %3234 = vmatpush.bf16.msrb.mxu1 %v6677_v31  ;;  %v6863_v31 = vld [vmem:[#allocation5 + $0x378] sm:$0xf0] }
 0x351   :  { %3650 = vmatpush.bf16.msra.mxu3 %v6894_v1  ;;  %3405 = vmatpush.bf16.msra.mxu0 %v7993_v21  ;;  %v8018_v1 = vld [vmem:[#allocation5 + $0x364] sm:$0xf] }
 0x352   :  { %3641 = vmatmul.bf16.vlgmr.msra.gmra.mxu2 %v8621_v39  ;;  %v8030_v21 = vld [vmem:[#allocation5 + $0x3c4] sm:$0xf] }
 0x353   :  { %3893 = vmatpush.bf16.msrb.mxu2 %v6991_v20  ;;  %v8028_v20 = vld [vmem:[#allocation5 + $0x3b4] sm:$0xf] }
 0x354   :  { %3414 = vmatpush.bf16.msra.mxu1 %v8005_v12  ;;  %v8032_v12 = vld [vmem:[#allocation5 + $0x3d4] sm:$0xf] }
 0x355   :  { %3651 = vmatpush.bf16.msra.mxu3 %v6886_v44  ;;  %3406 = vmatpush.bf16.msra.mxu0 %v7992_v23  ;;  %v6858_v44 = vor.u32 %v8018_v1, %v6855_v40  ;;  %v8043_v40 = vld [vmem:[#allocation7 + $0x324] sm:$0xf0] }
 0x358   :  { %3415 = vmatpush.bf16.msra.mxu1 %v8004_v15  ;;  %v6911_v15 = vld [vmem:[#allocation5 + $0x3d8] sm:$0xf0] }
 0x359   :  { %3652 = vmatpush.bf16.msra.mxu3 %v6878_v42  ;;  %3407 = vmatpush.bf16.msra.mxu0 %v7991_v27  ;;  %v6839_v42 = vld [vmem:[#allocation5 + $0x348] sm:$0xf0]  ;;  %v6914_v43 = vor.u32 %v8032_v12, %v6911_v15  ;;  %v6895_v27 = vld [vmem:[#allocation5 + $0x3b8] sm:$0xf0] }
 0x35c   :  { %3416 = vmatpush.bf16.msra.mxu1 %v8003_v17  ;;  %v8049_v17 = vld [vmem:[#allocation7 + $0x354] sm:$0xf0] }
 0x35d   :  { %3653 = vmatpush.bf16.msra.mxu3 %v6870_v57  ;;  %3408 = vmatpush.bf16.msra.mxu0 %v7990_v34  ;;  %v6831_v57 = vld [vmem:[#allocation5 + $0x338] sm:$0xf0] }
 0x360   :  { %3417 = vmatpush.bf16.msra.mxu1 %v8002_v19  ;;  %v6975_v19 = vor.u32 %v8049_v17, %v6974_v16  ;;  %v8048_v17 = vld [vmem:[#allocation7 + $0x354] sm:$0xf] }
 0x364   :  { %3418 = vmatpush.bf16.msra.mxu1 %v8001_v22  ;;  %v6903_v22 = vld [vmem:[#allocation5 + $0x3c8] sm:$0xf0] }
 0x365   :  { %v6906_v23 = vor.u32 %v8030_v21, %v6903_v22  ;;  %v6968_v22 = vld [vmem:[#allocation7 + $0x348] sm:$0xf0] }
 0x368   :  { %3419 = vmatpush.bf16.msra.mxu1 %v8000_v60  ;;  %v8047_v60 = vld [vmem:[#allocation7 + $0x344] sm:$0xf0] }
 0x369   :  { %v6967_v25 = vor.u32 %v8047_v60, %v6966_v51 }
 0x36c   :  { %3420 = vmatpush.bf16.msra.mxu1 %v7999_v18  ;;  %v8045_v18 = vld [vmem:[#allocation7 + $0x334] sm:$0xf0] }
 0x370   :  { %3421 = vmatpush.bf16.msra.mxu1 %v7998_v41 }
 0x38f   :  { %v2744_v37 = vpop.f32.mrf.mxu3 }
 0x395   :  { %v2731_v47 = vpop.f32.mrf.mxu2 }
 0x396   :  { %v2732_v33 = vadd.f32 %v8219_v45, %v2731_v47  ;;  %v6930_v45 = vor.u32 %v8036_v35, %v6927_v36  ;;  %v8026_v35 = vld [vmem:[#allocation5 + $0x3a4] sm:$0xf]  ;;  %v6887_v36 = vld [vmem:[#allocation5 + $0x3a8] sm:$0xf0] }
 0x397   :  { %v2746_v53 = vpop.f32.mrf.mxu3  ;;  %v6890_v1 = vor.u32 %v8026_v35, %v6887_v36  ;;  %v8040_v36 = vld [vmem:[#allocation7 + $0x314] sm:$0xf] }
 0x398   :  { %v8627_v30 = vadd.f32 %v2744_v37, %v2732_v33  ;;  %v6866_v37 = vor.u32 %v8020_v55, %v6863_v31  ;;  %v8016_v33 = vld [vmem:[#allocation5 + $0x354] sm:$0xf]  ;;  %v8014_v53 = vld [vmem:[#allocation5 + $0x344] sm:$0xf]  ;;  %v6898_v55 = vor.u32 %v8028_v20, %v6895_v27  ;;  %v6958_v31 = vld [vmem:[#allocation7 + $0x330] sm:$0xf] }
 0x399   :  { %v6850_v52 = vor.u32 %v8016_v33, %v6847_v48  ;;  %v6842_v32 = vor.u32 %v8014_v53, %v6839_v42  ;;  %v6959_v34 = vor.u32 %v8045_v18, %v6958_v31  ;;  %v6942_v33 = vld [vmem:[#allocation7 + $0x310] sm:$0xf]  ;;  %v8041_v48 = vld [vmem:[#allocation7 + $0x314] sm:$0xf0]  ;;  %v8022_v42 = vld [vmem:[#allocation5 + $0x384] sm:$0xf] }
 0x39a   :  { %v8629_v56 = vpop.f32.mrf.mxu0  ;;  %3659 = vmatpush.bf16.msrb.mxu0 %v6866_v37  ;;  %v6950_v37 = vld [vmem:[#allocation7 + $0x320] sm:$0xf]  ;;  %v6952_v31 = vld [vmem:[#allocation7 + $0x328] sm:$0xf0]  ;;  %vm2748_vm5 = vcmp.gt.f32.partialorder %v8627_v30, 0.0 }
 0x39b   :  { %v6951_v41 = vor.u32 %v8043_v40, %v6950_v37  ;;  %v6609_v53 = vld [vmem:[%s8757_s6 + $0x2] ss:$8 sm:$0x3] }
 0x39d   :  { %v2733_v59 = vpop.f32.mrf.mxu2 }
 0x39e   :  { %3660 = vmatpush.bf16.msrb.mxu0 %v6858_v44  ;;  %v6834_v59 = vor.u32 %v8012_v50, %v6831_v57  ;;  %v6879_v44 = vld [vmem:[#allocation5 + $0x398] sm:$0xf0]  ;;  %v6934_v57 = vld [vmem:[#allocation7 + $0x300] sm:$0xf] }
 0x39f   :  { %v3002_v61 = vpop.f32.mrf.mxu3 }
 0x3a2   :  { %v3225_v0 = vpop.f32.mrf.mxu0  ;;  %3661 = vmatpush.bf16.msrb.mxu0 %v6850_v52  ;;  %v6943_v52 = vor.u32 %v8041_v48, %v6942_v33  ;;  %v7183_v33 = vld [vmem:[#allocation5 + $0x470] sm:$0xf]  ;;  %v8101_v48 = vld [vmem:[#allocation5 + $0x474] sm:$0xf0] }
 0x3a3   :  { %v6823_v0 = vld [vmem:[#allocation5 + $0x328] sm:$0xf0] }
 0x3a5   :  { %v2989_v46 = vpop.f32.mrf.mxu2 }
 0x3a6   :  { %v2990_v3 = vadd.f32 %v2989_v46, %v2791_v2  ;;  %3662 = vmatpush.bf16.msrb.mxu0 %v6842_v32  ;;  %v8008_v46 = vld [vmem:[#allocation5 + $0x314] sm:$0xf]  ;;  %v6871_v32 = vld [vmem:[#allocation5 + $0x388] sm:$0xf0] }
 0x3a7   :  { %v3004_v28 = vpop.f32.mrf.mxu3  ;;  %v6874_v50 = vor.u32 %v8022_v42, %v6871_v32  ;;  %v8099_v42 = vld [vmem:[#allocation5 + $0x464] sm:$0xf0]  ;;  %v8068_v32 = vld [vmem:[#allocation7 + $0x3f4] sm:$0xf] }
 0x3a8   :  { %v3003_v5 = vadd.f32 %v3002_v61, %v2990_v3  ;;  %v8010_v61 = vld [vmem:[#allocation5 + $0x324] sm:$0xf]  ;;  %v6815_v3 = vld [vmem:[#allocation5 + $0x318] sm:$0xf0] }
 0x3a9   :  { %v6826_v2 = vor.u32 %v8010_v61, %v6823_v0  ;;  %v8034_v28 = vld [vmem:[#allocation5 + $0x3e4] sm:$0xf]  ;;  %v3050_v0 = vperm.slane %v6609_v53, 0 }
 0x3aa   :  { %vm3007_vm12 = vcmp.gt.f32.partialorder %v3003_v5, 0.0  ;;  %v3009_v6 = vmul.f32 0.01, %v3003_v5  ;;  %3663 = vmatpush.bf16.msrb.mxu0 %v6834_v59  ;;  %v8039_v59 = vld [vmem:[#allocation7 + $0x304] sm:$0xf0] }
 0x3ab   :  { %v6935_v61 = vor.u32 %v8039_v59, %v6934_v57  ;;  %v8066_v57 = vld [vmem:[#allocation7 + $0x3e4] sm:$0xf] }
 0x3ac   :  { %v3011_v7 = vsel %vm3007_vm12, %v3003_v5, %v3009_v6  ;;  %v6818_v5 = vor.u32 %v8008_v46, %v6815_v3  ;;  %v6919_v6 = vld [vmem:[#allocation5 + $0x3e8] sm:$0xf0]  ;;  %v3051_v3 = vperm.slane %v6609_v53, 1  ;;  %v7175_v53 = vld [vmem:[#allocation5 + $0x460] sm:$0xf] }
 0x3ad   :  { %v3013_v8 = vpack.c.bf16 %v3011_v7, %v3011_v7  ;;  %v2991_v58 = vpop.f32.mrf.mxu2  ;;  %v6982_v7 = vld [vmem:[#allocation7 + $0x360] sm:$0xf]  ;;  %v7176_v59 = vor.u32 %v8099_v42, %v7175_v53  ;;  %v7000_v53 = vld [vmem:[#allocation7 + $0x388] sm:$0xf0] }
 0x3ae   :  { %3664 = vmatpush.bf16.msrb.mxu0 %v6826_v2  ;;  %v6922_v58 = vor.u32 %v8034_v28, %v6919_v6  ;;  %v3224_v2 = vadd.f32 %v8629_v56, %v3050_v0  ;;  %v6992_v6 = vld [vmem:[#allocation7 + $0x378] sm:$0xf0]  ;;  %v7048_v0 = vld [vmem:[#allocation7 + $0x3e8] sm:$0xf0] }
 0x3af   :  { %3235 = vmatmul.bf16.vlgmr.msrb.gmra.mxu1 %v3013_v8  ;;  %3261 = vmatmul.bf16.vlgmr.msrb.gmra.mxu3 %v3013_v8  ;;  %v8051_v8 = vld [vmem:[#allocation7 + $0x364] sm:$0xf0] }
 0x3b0   :  { %3672 = vmatpush.bf16.msrb.mxu1 %v6930_v45  ;;  %v6983_v10 = vor.u32 %v8051_v8, %v6982_v7  ;;  %v8024_v45 = vld [vmem:[#allocation5 + $0x394] sm:$0xf] }
 0x3b2   :  { %3665 = vmatpush.bf16.msrb.mxu0 %v6818_v5  ;;  %3894 = vmatpush.bf16.msrb.mxu2 %v6983_v10  ;;  %v8052_v5 = vld [vmem:[#allocation7 + $0x374] sm:$0xf] }
 0x3b3   :  { %v6995_v8 = vor.u32 %v8052_v5, %v6992_v6  ;;  %v8064_v5 = vld [vmem:[#allocation7 + $0x3d4] sm:$0xf]  ;;  %v7040_v6 = vld [vmem:[#allocation7 + $0x3d8] sm:$0xf0] }
 0x3b4   :  { %3673 = vmatpush.bf16.msrb.mxu1 %v6922_v58 }
 0x3b5   :  { %v8632_v9 = vpop.f32.mrf.mxu2 }
 0x3b6   :  { %3895 = vmatpush.bf16.msrb.mxu2 %v6975_v19  ;;  %v3250_v58 = vadd.f32 %v8632_v9, %v3051_v3  ;;  %v8656_v9 = vld [vmem:[%s8755_s4 + $0x3] ss:$8 sm:$0x3]  ;;  %v7051_v3 = vor.u32 %v8066_v57, %v7048_v0  ;;  %v7247_v57 = vld [vmem:[#allocation5 + $0x4f0] sm:$0xf] }
 0x3b7   :  { %v3469_v60 = vperm.slane %v8656_v9, 0 }
 0x3b8   :  { %3674 = vmatpush.bf16.msrb.mxu1 %v6914_v43  ;;  %v6976_v43 = vld [vmem:[#allocation7 + $0x358] sm:$0xf0] }
 0x3b9   :  { %v6979_v21 = vor.u32 %v8048_v17, %v6976_v43  ;;  %v7143_v43 = vld [vmem:[#allocation5 + $0x420] sm:$0xf] }
 0x3ba   :  { %3896 = vmatpush.bf16.msrb.mxu2 %v6967_v25  ;;  %v8044_v25 = vld [vmem:[#allocation7 + $0x334] sm:$0xf] }
 0x3bc   :  { %3675 = vmatpush.bf16.msrb.mxu1 %v6906_v23 }
 0x3bd   :  { %v3251_v49 = vpop.f32.mrf.mxu2 }
 0x3be   :  { %v6810_v49 = vor.u32 %v8006_v24, %v6807_v11  ;;  %3897 = vmatpush.bf16.msrb.mxu2 %v6959_v34  ;;  %v8050_v24 = vld [vmem:[#allocation7 + $0x364] sm:$0xf]  ;;  %v6984_v11 = vld [vmem:[#allocation7 + $0x368] sm:$0xf0] }
 0x3bf   :  { %3654 = vmatmul.bf16.vlgmr.msra.gmra.mxu3 %v8641_v13  ;;  %v6987_v16 = vor.u32 %v8050_v24, %v6984_v11  ;;  %v7043_v24 = vor.u32 %v8064_v5, %v7040_v6  ;;  %v8062_v11 = vld [vmem:[#allocation7 + $0x3c4] sm:$0xf]  ;;  %v7006_v6 = vld [vmem:[#allocation7 + $0x390] sm:$0xf] }
 0x3c0   :  { %3666 = vmatpush.bf16.msrb.mxu0 %v6810_v49  ;;  %3676 = vmatpush.bf16.msrb.mxu1 %v6898_v55  ;;  %v8042_v55 = vld [vmem:[#allocation7 + $0x324] sm:$0xf] }
 0x3c1   :  { %v6955_v35 = vor.u32 %v8042_v55, %v6952_v31  ;;  %v8060_v55 = vld [vmem:[#allocation7 + $0x3b4] sm:$0xf]  ;;  %v7024_v31 = vld [vmem:[#allocation7 + $0x3b8] sm:$0xf0] }
 0x3c2   :  { %3898 = vmatpush.bf16.msrb.mxu2 %v6951_v41 }
 0x3c4   :  { %3677 = vmatpush.bf16.msrb.mxu1 %v6890_v1  ;;  %v6944_v1 = vld [vmem:[#allocation7 + $0x318] sm:$0xf0] }
 0x3c6   :  { %3899 = vmatpush.bf16.msrb.mxu2 %v6943_v52  ;;  %v7184_v52 = vor.u32 %v8101_v48, %v7183_v33  ;;  %v7030_v33 = vld [vmem:[#allocation7 + $0x3c0] sm:$0xf]  ;;  %v8063_v48 = vld [vmem:[#allocation7 + $0x3c4] sm:$0xf0] }
 0x3ca   :  { %3900 = vmatpush.bf16.msrb.mxu2 %v6935_v61 }
 0x3d5   :  { %v8644_v54 = vpop.f32.mrf.mxu2 }
 0x3d6   :  { %v3643_v27 = vadd.f32 %v8644_v54, %v3469_v60  ;;  %v6936_v54 = vld [vmem:[#allocation7 + $0x308] sm:$0xf0]  ;;  %v8087_v60 = vld [vmem:[#allocation5 + $0x404] sm:$0xf0] }
 0x3dd   :  { %v3644_v47 = vpop.f32.mrf.mxu2 }
 0x3de   :  { %v6882_v47 = vor.u32 %v8024_v45, %v6879_v44  ;;  %v6947_v45 = vor.u32 %v8040_v36, %v6944_v1  ;;  %v8038_v44 = vld [vmem:[#allocation7 + $0x304] sm:$0xf]  ;;  %v7016_v1 = vld [vmem:[#allocation7 + $0x3a8] sm:$0xf0] }
 0x3e0   :  { %3678 = vmatpush.bf16.msrb.mxu1 %v6882_v47 }
 0x3e4   :  { %3679 = vmatpush.bf16.msrb.mxu1 %v6874_v50  ;;  %v7056_v50 = vld [vmem:[#allocation7 + $0x3f8] sm:$0xf0] }
 0x3e5   :  { %v7059_v61 = vor.u32 %v8068_v32, %v7056_v50  ;;  %v7022_v32 = vld [vmem:[#allocation7 + $0x3b0] sm:$0xf]  ;;  %v8061_v50 = vld [vmem:[#allocation7 + $0x3b4] sm:$0xf0] }
 0x42c   :  { %v3236_v46 = vpop.f32.mrf.mxu1 }
 0x42d   :  { %v3237_v28 = vadd.f32 %v3236_v46, %v3224_v2  ;;  %v8097_v2 = vld [vmem:[#allocation5 + $0x454] sm:$0xf0]  ;;  %v7054_v46 = vld [vmem:[#allocation7 + $0x3f0] sm:$0xf] }
 0x42f   :  { %v3266_v7 = vadd.f32 %v3237_v28, %v8569_v62  ;;  %v8046_v62 = vld [vmem:[#allocation7 + $0x344] sm:$0xf]  ;;  %v8069_v28 = vld [vmem:[#allocation7 + $0x3f4] sm:$0xf0] }
 0x430   :  { %v6971_v51 = vor.u32 %v8046_v62, %v6968_v22  ;;  %v7135_v62 = vld [vmem:[#allocation5 + $0x410] sm:$0xf]  ;;  %v8089_v22 = vld [vmem:[#allocation5 + $0x414] sm:$0xf0] }
 0x431   :  { %v3268_v10 = vpack.c.bf16 %v3266_v7, %v3266_v7  ;;  %v7055_v7 = vor.u32 %v8069_v28, %v7054_v46  ;;  %v7239_v46 = vld [vmem:[#allocation5 + $0x4e0] sm:$0xf]  ;;  %v8115_v28 = vld [vmem:[#allocation5 + $0x4e4] sm:$0xf0] }
 0x432   :  { %v3262_v12 = vpop.f32.mrf.mxu3  ;;  %v7240_v5 = vor.u32 %v8115_v28, %v7239_v46  ;;  %v8083_v46 = vld [vmem:[#allocation8 + $0x1e8] sm:$0xff]  ;;  %v8133_v28 = vld [vmem:[#allocation7 + $0x474] sm:$0xf0] }
 0x433   :  { %v3263_v49 = vadd.f32 %v3262_v12, %v3250_v58  ;;  %3409 = vmatmul.bf16.vlgmr.msra.gmra.mxu0 %v3268_v10  ;;  %v7159_v58 = vld [vmem:[#allocation5 + $0x440] sm:$0xf]  ;;  %v8095_v10 = vld [vmem:[#allocation5 + $0x444] sm:$0xf0]  ;;  %3906 = vmatpush.bf16.msrb.mxu3 %v7055_v7  ;;  %v7032_v12 = vld [vmem:[#allocation7 + $0x3c8] sm:$0xf0] }
 0x434   :  { %3919 = vmatpush.bf16.msra.mxu0 %v6995_v8  ;;  %v3238_v15 = vpop.f32.mrf.mxu1  ;;  %v8057_v7 = vld [vmem:[#allocation7 + $0x394] sm:$0xf0] }
 0x435   :  { %v3267_v56 = vadd.f32 %v3263_v49, %v8589_v26  ;;  %v6960_v26 = vld [vmem:[#allocation7 + $0x338] sm:$0xf0]  ;;  %v7160_v49 = vor.u32 %v8095_v10, %v7159_v58  ;;  %v7151_v15 = vld [vmem:[#allocation5 + $0x430] sm:$0xf]  ;;  %v7007_v58 = vor.u32 %v8057_v7, %v7006_v6  ;;  %v8113_v10 = vld [vmem:[#allocation5 + $0x4d4] sm:$0xf0] }
 0x436   :  { %v6963_v20 = vor.u32 %v8044_v25, %v6960_v26  ;;  %v1387_v25 = vmul.f32 0.01, %v8526_v14  ;;  %v8074_v6 = vld [vmem:[#allocation8 + $0x1a0] sm:$0xff] }
 0x437   :  { %v3269_v19 = vpack.c.bf16 %v3267_v56, %v3267_v56  ;;  %v7035_v56 = vor.u32 %v8062_v11, %v7032_v12  ;;  %v6998_v11 = vld [vmem:[#allocation7 + $0x380] sm:$0xf]  ;;  %v8055_v12 = vld [vmem:[#allocation7 + $0x384] sm:$0xf0] }
 0x438   :  { %3920 = vmatpush.bf16.msra.mxu0 %v6987_v16  ;;  %v8093_v16 = vld [vmem:[#allocation5 + $0x434] sm:$0xf0]  ;;  %v8082_v7 = vld [vmem:[#allocation8 + $0x1e0] sm:$0xff] }
 0x439   :  { %3422 = vmatmul.bf16.vlgmr.msra.gmra.mxu1 %v3269_v19  ;;  %v7152_v17 = vor.u32 %v8093_v16, %v7151_v15  ;;  %v8091_v19 = vld [vmem:[#allocation5 + $0x424] sm:$0xf0]  ;;  %v6999_v15 = vor.u32 %v8055_v12, %v6998_v11  ;;  %v8072_v11 = vld [vmem:[#allocation8 + $0x190] sm:$0xff] }
 0x43a   :  { %v3264_v23 = vpop.f32.mrf.mxu3  ;;  %3932 = vmatpush.bf16.msra.mxu1 %v7059_v61  ;;  %v8117_v61 = vld [vmem:[#allocation5 + $0x4f4] sm:$0xf0]  ;;  %v8111_v16 = vld [vmem:[#allocation5 + $0x4c4] sm:$0xf0]  ;;  %v8080_v12 = vld [vmem:[#allocation8 + $0x1d0] sm:$0xff] }
 0x43b   :  { %v7136_v23 = vor.u32 %v8089_v22, %v7135_v62  ;;  %v7248_v0 = vor.u32 %v8117_v61, %v7247_v57  ;;  %v8220_v62 = vld [vmem:[%s8759_s8 + $0x2] ss:$0 sm:$0xff]  ;;  %v8076_v57 = vld [vmem:[#allocation8 + $0x1b0] sm:$0xff] }
 0x43c   :  { %3921 = vmatpush.bf16.msra.mxu0 %v6979_v21  ;;  %v7144_v21 = vor.u32 %v8091_v19, %v7143_v43  ;;  %v8109_v43 = vld [vmem:[#allocation5 + $0x4b4] sm:$0xf0]  ;;  %v7207_v22 = vld [vmem:[#allocation5 + $0x4a0] sm:$0xf]  ;;  %v8084_v61 = vld [vmem:[#allocation8 + $0x1f0] sm:$0xff] }
 0x43e   :  { %3933 = vmatpush.bf16.msra.mxu1 %v7051_v3 }
 0x440   :  { %3922 = vmatpush.bf16.msra.mxu0 %v6971_v51  ;;  %v7127_v51 = vld [vmem:[#allocation5 + $0x400] sm:$0xf] }
 0x441   :  { %v7128_v26 = vor.u32 %v8087_v60, %v7127_v51 }
 0x442   :  { %v3655_v18 = vpop.f32.mrf.mxu3  ;;  %3934 = vmatpush.bf16.msra.mxu1 %v7043_v24 }
 0x443   :  { %v3656_v34 = vadd.f32 %v3655_v18, %v3643_v27  ;;  %3667 = vmatmul.bf16.vlgmr.msrb.gmra.mxu0 %v8621_v39  ;;  %v6939_v39 = vor.u32 %v8038_v44, %v6936_v54  ;;  %v7027_v18 = vor.u32 %v8060_v55, %v7024_v31  ;;  %v8056_v44 = vld [vmem:[#allocation7 + $0x394] sm:$0xf]  ;;  %v7008_v54 = vld [vmem:[#allocation7 + $0x398] sm:$0xf0] }
 0x444   :  { %3923 = vmatpush.bf16.msra.mxu0 %v6963_v20  ;;  %v8665_v20 = vsel %vm1377_vm15, %v8526_v14, %v1387_v25  ;;  %v7038_v14 = vld [vmem:[#allocation7 + $0x3d0] sm:$0xf] }
 0x445   :  { %vm3685_vm14 = vcmp.gt.f32.partialorder %v3656_v34, 0.0  ;;  %v3687_v37 = vmul.f32 0.01, %v3656_v34  ;;  %v8669_v27 = vpack.c.bf16 %v8665_v20, %v8665_v20  ;;  %v7199_v25 = vld [vmem:[#allocation5 + $0x490] sm:$0xf] }
 0x446   :  { %3935 = vmatpush.bf16.msra.mxu1 %v7035_v56 }
 0x447   :  { %v3689_v40 = vsel %vm3685_vm14, %v3656_v34, %v3687_v37  ;;  %v7046_v34 = vld [vmem:[#allocation7 + $0x3e0] sm:$0xf]  ;;  %v8058_v37 = vld [vmem:[#allocation7 + $0x3a4] sm:$0xf] }
 0x448   :  { %v3691_v41 = vpack.c.bf16 %v3689_v40, %v3689_v40  ;;  %3924 = vmatpush.bf16.msra.mxu0 %v6955_v35  ;;  %v8067_v35 = vld [vmem:[#allocation7 + $0x3e4] sm:$0xf0]  ;;  %v7019_v40 = vor.u32 %v8058_v37, %v7016_v1 }
 0x449   :  { %3680 = vmatmul.bf16.vlgmr.msrb.gmra.mxu1 %v8641_v13  ;;  %v7167_v13 = vld [vmem:[#allocation5 + $0x450] sm:$0xf]  ;;  %v7047_v36 = vor.u32 %v8067_v35, %v7046_v34  ;;  %v7191_v35 = vld [vmem:[#allocation5 + $0x480] sm:$0xf] }
 0x44a   :  { %v3657_v47 = vpop.f32.mrf.mxu3  ;;  %3901 = vmatmul.bf16.vlgmr.msrb.gmra.mxu2 %v3691_v41  ;;  %v7168_v8 = vor.u32 %v8097_v2, %v7167_v13  ;;  %3936 = vmatpush.bf16.msra.mxu1 %v7027_v18  ;;  %v7014_v13 = vld [vmem:[#allocation7 + $0x3a0] sm:$0xf]  ;;  %v8059_v2 = vld [vmem:[#allocation7 + $0x3a4] sm:$0xf0] }
 0x44b   :  { %3907 = vmatpush.bf16.msrb.mxu3 %v7047_v36  ;;  %v7011_v47 = vor.u32 %v8056_v44, %v7008_v54  ;;  %v7015_v3 = vor.u32 %v8059_v2, %v7014_v13  ;;  %v8103_v36 = vld [vmem:[#allocation5 + $0x484] sm:$0xf0] }
 0x44c   :  { %3925 = vmatpush.bf16.msra.mxu0 %v6947_v45  ;;  %v7192_v37 = vor.u32 %v8103_v36, %v7191_v35  ;;  %v8075_v13 = vld [vmem:[#allocation8 + $0x1a8] sm:$0xff]  ;;  %v7169_v35 = vld [vmem:[#allocation5 + $0x458] sm:$0xf0] }
 0x44e   :  { %3937 = vmatpush.bf16.msra.mxu1 %v7019_v40 }
 0x450   :  { %3926 = vmatpush.bf16.msra.mxu0 %v6939_v39  ;;  %v7031_v39 = vor.u32 %v8063_v48, %v7030_v33 }
 0x452   :  { %3938 = vmatpush.bf16.msra.mxu1 %v7011_v47 }
 0x453   :  { %3927 = vmatmul.bf16.vlgmr.msra.gmra.mxu0 %v3691_v41  ;;  %v8065_v41 = vld [vmem:[#allocation7 + $0x3d4] sm:$0xf0] }
 0x454   :  { %4312 = vmatpush.bf16.msrb.mxu0 %v7184_v52  ;;  %v7039_v45 = vor.u32 %v8065_v41, %v7038_v14  ;;  %v8054_v52 = vld [vmem:[#allocation7 + $0x384] sm:$0xf]  ;;  %v3470_v14 = vperm.slane %v8656_v9, 1  ;;  %v8085_v9 = vld [vmem:[#allocation8 + $0x1f8] sm:$0xff] }
 0x455   :  { %v7003_v42 = vor.u32 %v8054_v52, %v7000_v53 }
 0x456   :  { %3908 = vmatpush.bf16.msrb.mxu3 %v7039_v45 }
 0x457   :  { %3939 = vmatpush.bf16.msra.mxu1 %v7003_v42  ;;  %v1388_v42 = vmul.f32 0.01, %v8528_v29 }
 0x458   :  { %4313 = vmatpush.bf16.msrb.mxu0 %v7176_v59  ;;  %v7023_v59 = vor.u32 %v8061_v50, %v7022_v32  ;;  %v8077_v50 = vld [vmem:[#allocation8 + $0x1b8] sm:$0xff] }
 0x459   :  { %4080 = vmatpush.bf16.msra.mxu2 %v8077_v50  ;;  %v7145_v50 = vld [vmem:[#allocation5 + $0x428] sm:$0xf0] }
 0x45a   :  { %3909 = vmatpush.bf16.msrb.mxu3 %v7031_v39 }
 0x45b   :  { %4325 = vmatpush.bf16.msrb.mxu1 %v7248_v0  ;;  %v8685_v0 = vsel %vm1378_vm1, %v8528_v29, %v1388_v42  ;;  %v7304_v29 = vld [vmem:[#allocation7 + $0x460] sm:$0xf] }
 0x45c   :  { %4314 = vmatpush.bf16.msrb.mxu0 %v7168_v8  ;;  %v7231_v8 = vld [vmem:[#allocation5 + $0x4d0] sm:$0xf]  ;;  %v8689_v2 = vpack.c.bf16 %v8685_v0, %v8685_v0 }
 0x45d   :  { %v7232_v24 = vor.u32 %v8113_v10, %v7231_v8  ;;  %4081 = vmatpush.bf16.msra.mxu2 %v8076_v57  ;;  %v8131_v8 = vld [vmem:[#allocation7 + $0x464] sm:$0xf0]  ;;  %v8073_v10 = vld [vmem:[#allocation8 + $0x198] sm:$0xff] }
 0x45e   :  { %3910 = vmatpush.bf16.msrb.mxu3 %v7023_v59 }
 0x45f   :  { %4326 = vmatpush.bf16.msrb.mxu1 %v7240_v5 }
 0x460   :  { %4315 = vmatpush.bf16.msrb.mxu0 %v7160_v49  ;;  %v7223_v49 = vld [vmem:[#allocation5 + $0x4c0] sm:$0xf] }
 0x461   :  { %v7224_v56 = vor.u32 %v8111_v16, %v7223_v49  ;;  %4082 = vmatpush.bf16.msra.mxu2 %v8075_v13  ;;  %v8071_v49 = vld [vmem:[#allocation8 + $0x188] sm:$0xff] }
 0x462   :  { %3911 = vmatpush.bf16.msrb.mxu3 %v7015_v3  ;;  %v7312_v3 = vld [vmem:[#allocation7 + $0x470] sm:$0xf]  ;;  %v8127_v13 = vld [vmem:[#allocation7 + $0x444] sm:$0xf0] }
 0x463   :  { %4327 = vmatpush.bf16.msrb.mxu1 %v7232_v24  ;;  %v7313_v5 = vor.u32 %v8133_v28, %v7312_v3  ;;  %v8081_v24 = vld [vmem:[#allocation8 + $0x1d8] sm:$0xff]  ;;  %v8088_v28 = vld [vmem:[#allocation5 + $0x414] sm:$0xf] }
 0x464   :  { %4316 = vmatpush.bf16.msrb.mxu0 %v7152_v17  ;;  %v7215_v17 = vld [vmem:[#allocation5 + $0x4b0] sm:$0xf] }
 0x465   :  { %v7216_v19 = vor.u32 %v8109_v43, %v7215_v17  ;;  %4083 = vmatpush.bf16.msra.mxu2 %v8074_v6  ;;  %v7185_v17 = vld [vmem:[#allocation5 + $0x478] sm:$0xf0]  ;;  %v8116_v43 = vld [vmem:[#allocation5 + $0x4f4] sm:$0xf] }
 0x466   :  { %3912 = vmatpush.bf16.msrb.mxu3 %v7007_v58  ;;  %v7305_v58 = vor.u32 %v8131_v8, %v7304_v29  ;;  %v8108_v6 = vld [vmem:[#allocation5 + $0x4b4] sm:$0xf]  ;;  %v7217_v29 = vld [vmem:[#allocation5 + $0x4b8] sm:$0xf0]  ;;  %v7280_v8 = vld [vmem:[#allocation7 + $0x430] sm:$0xf] }
 0x467   :  { %4328 = vmatpush.bf16.msrb.mxu1 %v7224_v56  ;;  %v8100_v56 = vld [vmem:[#allocation5 + $0x474] sm:$0xf] }
 0x468   :  { %4317 = vmatpush.bf16.msrb.mxu0 %v7144_v21 }
 0x469   :  { %4084 = vmatpush.bf16.msra.mxu2 %v8073_v10  ;;  %v7220_v10 = vor.u32 %v8108_v6, %v7217_v29  ;;  %v8126_v29 = vld [vmem:[#allocation7 + $0x444] sm:$0xf] }
 0x46a   :  { %3913 = vmatpush.bf16.msrb.mxu3 %v6999_v15  ;;  %v8079_v15 = vld [vmem:[#allocation8 + $0x1c8] sm:$0xff] }
 0x46b   :  { %4329 = vmatpush.bf16.msrb.mxu1 %v7216_v19  ;;  %v7249_v19 = vld [vmem:[#allocation5 + $0x4f8] sm:$0xf0] }
 0x46c   :  { %4318 = vmatpush.bf16.msrb.mxu0 %v7136_v23  ;;  %v8107_v23 = vld [vmem:[#allocation5 + $0x4a4] sm:$0xf0] }
 0x46d   :  { %v7208_v51 = vor.u32 %v8107_v23, %v7207_v22  ;;  %4085 = vmatpush.bf16.msra.mxu2 %v8072_v11  ;;  %v8078_v22 = vld [vmem:[#allocation8 + $0x1c0] sm:$0xff] }
 0x46e   :  { %4093 = vmatpush.bf16.msra.mxu3 %v8085_v9  ;;  %v8098_v23 = vld [vmem:[#allocation5 + $0x464] sm:$0xf] }
 0x46f   :  { %4330 = vmatpush.bf16.msrb.mxu1 %v7208_v51  ;;  %v7177_v51 = vld [vmem:[#allocation5 + $0x468] sm:$0xf0]  ;;  %v8110_v9 = vld [vmem:[#allocation5 + $0x4c4] sm:$0xf] }
 0x470   :  { %4319 = vmatpush.bf16.msrb.mxu0 %v7128_v26  ;;  %v8105_v26 = vld [vmem:[#allocation5 + $0x494] sm:$0xf0]  ;;  %v8086_v11 = vld [vmem:[#allocation5 + $0x404] sm:$0xf] }
 0x471   :  { %v7200_v31 = vor.u32 %v8105_v26, %v7199_v25  ;;  %4086 = vmatpush.bf16.msra.mxu2 %v8071_v49  ;;  %v8114_v25 = vld [vmem:[#allocation5 + $0x4e4] sm:$0xf]  ;;  %v7241_v26 = vld [vmem:[#allocation5 + $0x4e8] sm:$0xf0] }
 0x472   :  { %4094 = vmatpush.bf16.msra.mxu3 %v8084_v61  ;;  %v7244_v36 = vor.u32 %v8114_v25, %v7241_v26  ;;  %v7288_v61 = vld [vmem:[#allocation7 + $0x440] sm:$0xf]  ;;  %v8106_v49 = vld [vmem:[#allocation5 + $0x4a4] sm:$0xf] }
 0x473   :  { %4320 = vmatmul.bf16.vlgmr.msrb.gmra.mxu0 %v8669_v27  ;;  %4331 = vmatpush.bf16.msrb.mxu1 %v7200_v31  ;;  %v7289_v3 = vor.u32 %v8127_v13, %v7288_v61  ;;  %v8102_v26 = vld [vmem:[#allocation5 + $0x484] sm:$0xf] }
 0x474   :  { %4572 = vmatpush.bf16.msra.mxu0 %v7313_v5  ;;  %v7137_v5 = vld [vmem:[#allocation5 + $0x418] sm:$0xf0] }
 0x476   :  { %4095 = vmatpush.bf16.msra.mxu3 %v8083_v46 }
 0x477   :  { %4332 = vmatpush.bf16.msrb.mxu1 %v7192_v37 }
 0x478   :  { %4573 = vmatpush.bf16.msra.mxu0 %v7305_v58  ;;  %v8125_v58 = vld [vmem:[#allocation7 + $0x434] sm:$0xf0] }
 0x47a   :  { %4096 = vmatpush.bf16.msra.mxu3 %v8082_v7  ;;  %v7140_v7 = vor.u32 %v8088_v28, %v7137_v5  ;;  %v7298_v28 = vld [vmem:[#allocation7 + $0x458] sm:$0xf0] }
 0x47e   :  { %4097 = vmatpush.bf16.msra.mxu3 %v8081_v24  ;;  %v7281_v24 = vor.u32 %v8125_v58, %v7280_v8  ;;  %v7290_v8 = vld [vmem:[#allocation7 + $0x448] sm:$0xf0] }
 0x482   :  { %4098 = vmatpush.bf16.msra.mxu3 %v8080_v12  ;;  %v7129_v12 = vld [vmem:[#allocation5 + $0x408] sm:$0xf0] }
 0x486   :  { %4099 = vmatpush.bf16.msra.mxu3 %v8079_v15  ;;  %v7132_v15 = vor.u32 %v8086_v11, %v7129_v12  ;;  %v8124_v11 = vld [vmem:[#allocation7 + $0x434] sm:$0xf]  ;;  %v7282_v12 = vld [vmem:[#allocation7 + $0x438] sm:$0xf0] }
 0x48a   :  { %4100 = vmatpush.bf16.msra.mxu3 %v8078_v22  ;;  %v7201_v22 = vld [vmem:[#allocation5 + $0x498] sm:$0xf0] }
 0x4b0   :  { %v3410_v21 = vpop.f32.mrf.mxu0 }
 0x4b1   :  { %v3411_v60 = vadd.f32 %v8220_v62, %v3410_v21  ;;  %v8070_v21 = vld [vmem:[#allocation8 + $0x180] sm:$0xff]  ;;  %v7188_v62 = vor.u32 %v8100_v56, %v7185_v17  ;;  %v7209_v56 = vld [vmem:[#allocation5 + $0x4a8] sm:$0xf0] }
 0x4b2   :  { %4087 = vmatpush.bf16.msra.mxu2 %v8070_v21  ;;  %v7272_v17 = vld [vmem:[#allocation7 + $0x420] sm:$0xf] }
 0x4b6   :  { %v3423_v55 = vpop.f32.mrf.mxu1  ;;  %4338 = vmatpush.bf16.msrb.mxu2 %v7188_v62  ;;  %v8104_v62 = vld [vmem:[#allocation5 + $0x494] sm:$0xf] }
 0x4b7   :  { %v8675_v18 = vadd.f32 %v3423_v55, %v3411_v60  ;;  %v7252_v60 = vor.u32 %v8116_v43, %v7249_v19  ;;  %v7180_v55 = vor.u32 %v8098_v23, %v7177_v51  ;;  %v8123_v43 = vld [vmem:[#allocation7 + $0x424] sm:$0xf0]  ;;  %v7212_v19 = vor.u32 %v8106_v49, %v7209_v56  ;;  %v7264_v51 = vld [vmem:[#allocation7 + $0x410] sm:$0xf]  ;;  %v7274_v56 = vld [vmem:[#allocation7 + $0x428] sm:$0xf0] }
 0x4b8   :  { %v3412_v34 = vpop.f32.mrf.mxu0  ;;  %v7273_v21 = vor.u32 %v8123_v43, %v7272_v17  ;;  %v7204_v23 = vor.u32 %v8104_v62, %v7201_v22  ;;  %v8120_v43 = vld [vmem:[#allocation7 + $0x414] sm:$0xf]  ;;  %v8118_v62 = vld [vmem:[#allocation7 + $0x404] sm:$0xf]  ;;  %v7258_v22 = vld [vmem:[#allocation7 + $0x408] sm:$0xf0] }
 0x4b9   :  { %v8096_v34 = vld [vmem:[#allocation5 + $0x454] sm:$0xf]  ;;  %vm3427_vm6 = vcmp.gt.f32.partialorder %v8675_v18, 0.0 }
 0x4ba   :  { %4339 = vmatpush.bf16.msrb.mxu2 %v7180_v55  ;;  %v7172_v37 = vor.u32 %v8096_v34, %v7169_v35  ;;  %v7193_v55 = vld [vmem:[#allocation5 + $0x488] sm:$0xf0]  ;;  %v7256_v34 = vld [vmem:[#allocation7 + $0x400] sm:$0xf]  ;;  %v8119_v35 = vld [vmem:[#allocation7 + $0x404] sm:$0xf0] }
 0x4be   :  { %v3425_v1 = vpop.f32.mrf.mxu1  ;;  %4340 = vmatpush.bf16.msrb.mxu2 %v7172_v37  ;;  %v6931_v37 = vld [vmem:[%s8757_s6 + $0x3] ss:$8 sm:$0x3] }
 0x4bf   :  { %v8094_v1 = vld [vmem:[#allocation5 + $0x444] sm:$0xf] }
 0x4c0   :  { %v3668_v40 = vpop.f32.mrf.mxu0 }
 0x4c1   :  { %v3669_v41 = vadd.f32 %v3668_v40, %v3470_v14  ;;  %v7161_v40 = vld [vmem:[#allocation5 + $0x448] sm:$0xf0] }
 0x4c2   :  { %v7164_v14 = vor.u32 %v8094_v1, %v7161_v40  ;;  %v3730_v1 = vperm.slane %v6931_v37, 1 }
 0x4c4   :  { %4341 = vmatpush.bf16.msrb.mxu2 %v7164_v14 }
 0x4c6   :  { %v3681_v45 = vpop.f32.mrf.mxu1 }
 0x4c7   :  { %v3682_v44 = vadd.f32 %v3681_v45, %v3669_v41  ;;  %v8092_v41 = vld [vmem:[#allocation5 + $0x434] sm:$0xf]  ;;  %v7153_v45 = vld [vmem:[#allocation5 + $0x438] sm:$0xf0] }
 0x4c8   :  { %v3670_v54 = vpop.f32.mrf.mxu0 }
 0x4c9   :  { %vm3686_vm0 = vcmp.gt.f32.partialorder %v3682_v44, 0.0  ;;  %v3688_v47 = vmul.f32 0.01, %v3682_v44  ;;  %v7156_v54 = vor.u32 %v8092_v41, %v7153_v45  ;;  %v3729_v41 = vperm.slane %v6931_v37, 0 }
 0x4cb   :  { %v3690_v33 = vsel %vm3686_vm0, %v3682_v44, %v3688_v47  ;;  %v8112_v44 = vld [vmem:[#allocation5 + $0x4d4] sm:$0xf]  ;;  %v7233_v47 = vld [vmem:[#allocation5 + $0x4d8] sm:$0xf0]  ;;  %4342 = vmatpush.bf16.msrb.mxu2 %v7156_v54 }
 0x4cc   :  { %v3692_v48 = vpack.c.bf16 %v3690_v33, %v3690_v33  ;;  %v7296_v33 = vld [vmem:[#allocation7 + $0x450] sm:$0xf] }
 0x4cd   :  { %v8678_v39 = vpop.f32.mrf.mxu2 }
 0x4ce   :  { %v3683_v52 = vpop.f32.mrf.mxu1  ;;  %3914 = vmatmul.bf16.vlgmr.msrb.gmra.mxu3 %v3692_v48  ;;  %3940 = vmatmul.bf16.vlgmr.msra.gmra.mxu1 %v3692_v48  ;;  %v8129_v48 = vld [vmem:[#allocation7 + $0x454] sm:$0xf0]  ;;  %v3903_v54 = vadd.f32 %v8678_v39, %v3729_v41  ;;  %v7306_v39 = vld [vmem:[#allocation7 + $0x468] sm:$0xf0] }
 0x4cf   :  { %4351 = vmatpush.bf16.msrb.mxu3 %v7252_v60  ;;  %v7236_v52 = vor.u32 %v8112_v44, %v7233_v47  ;;  %v7297_v42 = vor.u32 %v8129_v48, %v7296_v33  ;;  %v8121_v60 = vld [vmem:[#allocation7 + $0x414] sm:$0xf0]  ;;  %v8167_v41 = vld [vmem:[#allocation10 + $0x8] sm:$0xff] }
 0x4d0   :  { %v8680_v53 = vpop.f32.mrf.mxu0  ;;  %v7265_v25 = vor.u32 %v8121_v60, %v7264_v51  ;;  %v8148_v51 = vld [vmem:[#allocation7 + $0x4f4] sm:$0xf]  ;;  %v7378_v60 = vld [vmem:[#allocation7 + $0x4f8] sm:$0xf0] }
 0x4d1   :  { %4574 = vmatpush.bf16.msra.mxu0 %v7297_v42  ;;  %v3929_v40 = vadd.f32 %v8680_v53, %v3730_v1  ;;  %v7314_v42 = vld [vmem:[#allocation7 + $0x478] sm:$0xf0]  ;;  %v8170_v1 = vld [vmem:[#allocation10 + $0x20] sm:$0xff] }
 0x4d3   :  { %4352 = vmatpush.bf16.msrb.mxu3 %v7244_v36  ;;  %v7257_v36 = vor.u32 %v8119_v35, %v7256_v34  ;;  %v8144_v34 = vld [vmem:[#allocation7 + $0x4d4] sm:$0xf]  ;;  %v7362_v35 = vld [vmem:[#allocation7 + $0x4d8] sm:$0xf0] }
 0x4d4   :  { %v7365_v37 = vor.u32 %v8144_v34, %v7362_v35 }
 0x4d5   :  { %v3904_v32 = vpop.f32.mrf.mxu2  ;;  %4575 = vmatpush.bf16.msra.mxu0 %v7289_v3  ;;  %v8128_v3 = vld [vmem:[#allocation7 + $0x454] sm:$0xf] }
 0x4d6   :  { %v8090_v32 = vld [vmem:[#allocation5 + $0x424] sm:$0xf] }
 0x4d7   :  { %4353 = vmatpush.bf16.msrb.mxu3 %v7236_v52  ;;  %v7148_v57 = vor.u32 %v8090_v32, %v7145_v50  ;;  %v8132_v52 = vld [vmem:[#allocation7 + $0x474] sm:$0xf]  ;;  %v8703_v32 = vld [vmem:[%s8755_s4 + $0x4] ss:$8 sm:$0x3] }
 0x4d8   :  { %v3930_v59 = vpop.f32.mrf.mxu0 }
 0x4d9   :  { %v7225_v59 = vld [vmem:[#allocation5 + $0x4c8] sm:$0xf0]  ;;  %4343 = vmatpush.bf16.msrb.mxu2 %v7148_v57  ;;  %4576 = vmatpush.bf16.msra.mxu0 %v7281_v24  ;;  %v4148_v57 = vperm.slane %v8703_v32, 0  ;;  %v7293_v24 = vor.u32 %v8126_v29, %v7290_v8  ;;  %v7352_v29 = vld [vmem:[#allocation7 + $0x4c0] sm:$0xf] }
 0x4da   :  { %v7228_v46 = vor.u32 %v8110_v9, %v7225_v59  ;;  %v7317_v9 = vor.u32 %v8132_v52, %v7314_v42  ;;  %v8130_v59 = vld [vmem:[#allocation7 + $0x464] sm:$0xf]  ;;  %v7376_v42 = vld [vmem:[#allocation7 + $0x4f0] sm:$0xf]  ;;  %v8143_v8 = vld [vmem:[#allocation7 + $0x4c4] sm:$0xf0] }
 0x4db   :  { %v7309_v13 = vor.u32 %v8130_v59, %v7306_v39  ;;  %v8147_v39 = vld [vmem:[#allocation7 + $0x4e4] sm:$0xf0] }
 0x4dc   :  { %4354 = vmatpush.bf16.msrb.mxu3 %v7228_v46 }
 0x4dd   :  { %4344 = vmatpush.bf16.msrb.mxu2 %v7140_v7  ;;  %4577 = vmatpush.bf16.msra.mxu0 %v7273_v21  ;;  %v7301_v7 = vor.u32 %v8128_v3, %v7298_v28  ;;  %v7360_v3 = vld [vmem:[#allocation7 + $0x4d0] sm:$0xf]  ;;  %v8145_v28 = vld [vmem:[#allocation7 + $0x4d4] sm:$0xf0] }
 0x4de   :  { %4333 = vmatmul.bf16.vlgmr.msrb.gmra.mxu1 %v8689_v2 }
 0x4e0   :  { %4355 = vmatpush.bf16.msrb.mxu3 %v7220_v10 }
 0x4e1   :  { %4345 = vmatpush.bf16.msrb.mxu2 %v7132_v15  ;;  %4578 = vmatpush.bf16.msra.mxu0 %v7265_v25  ;;  %v8122_v15 = vld [vmem:[#allocation7 + $0x424] sm:$0xf] }
 0x4e2   :  { %v7277_v17 = vor.u32 %v8122_v15, %v7274_v56  ;;  %v8146_v25 = vld [vmem:[#allocation7 + $0x4e4] sm:$0xf]  ;;  %v8181_v15 = vld [vmem:[#allocation10 + $0x78] sm:$0xff]  ;;  %v7336_v56 = vld [vmem:[#allocation7 + $0x4a0] sm:$0xf] }
 0x4e4   :  { %4356 = vmatpush.bf16.msrb.mxu3 %v7212_v19  ;;  %v7266_v19 = vld [vmem:[#allocation7 + $0x418] sm:$0xf0] }
 0x4e5   :  { %4579 = vmatpush.bf16.msra.mxu0 %v7257_v36  ;;  %v7269_v21 = vor.u32 %v8120_v43, %v7266_v19  ;;  %v8171_v36 = vld [vmem:[#allocation10 + $0x28] sm:$0xff]  ;;  %v8180_v43 = vld [vmem:[#allocation10 + $0x70] sm:$0xff] }
 0x4e8   :  { %4357 = vmatpush.bf16.msrb.mxu3 %v7204_v23  ;;  %v8173_v23 = vld [vmem:[#allocation10 + $0x38] sm:$0xff] }
 0x4f0   :  { %v8692_v16 = vpop.f32.mrf.mxu0 }
 0x4f1   :  { %v4322_v46 = vadd.f32 %v8692_v16, %v4148_v57  ;;  %v7285_v16 = vor.u32 %v8124_v11, %v7282_v12  ;;  %v7346_v57 = vld [vmem:[#allocation7 + $0x4b8] sm:$0xf0]  ;;  %v7344_v12 = vld [vmem:[#allocation7 + $0x4b0] sm:$0xf] }
 0x4f8   :  { %v4323_v31 = vpop.f32.mrf.mxu0 }
 0x4f9   :  { %v7196_v31 = vor.u32 %v8102_v26, %v7193_v55  ;;  %v8172_v26 = vld [vmem:[#allocation10 + $0x30] sm:$0xff]  ;;  %v7381_v55 = vor.u32 %v8148_v51, %v7378_v60  ;;  %v8135_v51 = vld [vmem:[#allocation7 + $0x484] sm:$0xf0] }
 0x4fb   :  { %4358 = vmatpush.bf16.msrb.mxu3 %v7196_v31  ;;  %v7370_v31 = vld [vmem:[#allocation7 + $0x4e8] sm:$0xf0] }
 0x54b   :  { %v3941_v14 = vpop.f32.mrf.mxu1 }
 0x54c   :  { %v3942_v45 = vadd.f32 %v3941_v14, %v3929_v40  ;;  %v8169_v40 = vld [vmem:[#allocation10 + $0x18] sm:$0xff]  ;;  %v8168_v14 = vld [vmem:[#allocation10 + $0x10] sm:$0xff] }
 0x54e   :  { %v3946_v44 = vadd.f32 %v3942_v45, %v8637_v63  ;;  %v2070_v45 = vmul.f32 0.01, %v8579_v4 }
 0x550   :  { %v3948_v47 = vpack.c.bf16 %v3946_v44, %v3946_v44  ;;  %v8166_v44 = vld [vmem:[#allocation10] sm:$0xff] }
 0x551   :  { %v3915_v33 = vpop.f32.mrf.mxu3 }
 0x552   :  { %v3916_v48 = vadd.f32 %v3915_v33, %v3903_v54  ;;  %4101 = vmatmul.bf16.vlgmr.msra.gmra.mxu3 %v3948_v47  ;;  %v2071_v54 = vsel %vm2069_vm3, %v8579_v4, %v2070_v45  ;;  %v8142_v33 = vld [vmem:[#allocation7 + $0x4c4] sm:$0xf] }
 0x553   :  { %v3943_v50 = vpop.f32.mrf.mxu1  ;;  %4611 = vmatpush.bf16.msra.mxu3 %v7381_v55  ;;  %v2072_v47 = vpack.c.bf16 %v2071_v54, %v2071_v54  ;;  %v8138_v4 = vld [vmem:[#allocation7 + $0x4a4] sm:$0xf]  ;;  %v8177_v55 = vld [vmem:[#allocation10 + $0x58] sm:$0xff]  ;;  %v4149_v54 = vperm.slane %v8703_v32, 1 }
 0x554   :  { %v3945_v53 = vadd.f32 %v3916_v48, %v8617_v38  ;;  %v7354_v48 = vld [vmem:[#allocation7 + $0x4c8] sm:$0xf0]  ;;  %v8149_v50 = vld [vmem:[#allocation7 + $0x4f4] sm:$0xf0] }
 0x555   :  { %v7357_v52 = vor.u32 %v8142_v33, %v7354_v48  ;;  %v8157_v32 = vld [vmem:[#allocation8 + $0x238] sm:$0xff] }
 0x556   :  { %v3947_v63 = vpack.c.bf16 %v3945_v53, %v3945_v53  ;;  %v7377_v53 = vor.u32 %v8149_v50, %v7376_v42  ;;  %4759 = vmatpush.bf16.msrb.mxu0 %v8157_v32 }
 0x558   :  { %4088 = vmatmul.bf16.vlgmr.msra.gmra.mxu2 %v3947_v63  ;;  %v7368_v63 = vld [vmem:[#allocation7 + $0x4e0] sm:$0xf]  ;;  %4585 = vmatpush.bf16.msra.mxu1 %v7377_v53 }
 0x559   :  { %4598 = vmatpush.bf16.msra.mxu2 %v7317_v9  ;;  %v3917_v61 = vpop.f32.mrf.mxu3  ;;  %v8140_v9 = vld [vmem:[#allocation7 + $0x4b4] sm:$0xf] }
 0x55a   :  { %v7349_v59 = vor.u32 %v8140_v9, %v7346_v57  ;;  %v7369_v61 = vor.u32 %v8147_v39, %v7368_v63  ;;  %v2749_v63 = vmul.f32 0.01, %v8627_v30  ;;  %v8165_v39 = vld [vmem:[#allocation8 + $0x278] sm:$0xff] }
 0x55b   :  { %v4334_v5 = vpop.f32.mrf.mxu1 }
 0x55c   :  { %v4335_v6 = vadd.f32 %v4334_v5, %v4322_v46  ;;  %4586 = vmatpush.bf16.msra.mxu1 %v7369_v61  ;;  %v7361_v5 = vor.u32 %v8145_v28, %v7360_v3  ;;  %v8156_v61 = vld [vmem:[#allocation8 + $0x230] sm:$0xff]  ;;  %v8155_v3 = vld [vmem:[#allocation8 + $0x228] sm:$0xff] }
 0x55d   :  { %4599 = vmatpush.bf16.msra.mxu2 %v7309_v13  ;;  %v7338_v13 = vld [vmem:[#allocation7 + $0x4a8] sm:$0xf0]  ;;  %4760 = vmatpush.bf16.msrb.mxu0 %v8156_v61 }
 0x55e   :  { %vm4364_vm2 = vcmp.gt.f32.partialorder %v4335_v6, 0.0  ;;  %v4366_v38 = vmul.f32 0.01, %v4335_v6  ;;  %v7341_v46 = vor.u32 %v8138_v4, %v7338_v13  ;;  %v8164_v4 = vld [vmem:[#allocation8 + $0x270] sm:$0xff]  ;;  %v8163_v28 = vld [vmem:[#allocation8 + $0x268] sm:$0xff] }
 0x560   :  { %v4368_v58 = vsel %vm4364_vm2, %v4335_v6, %v4366_v38  ;;  %4587 = vmatpush.bf16.msra.mxu1 %v7361_v5  ;;  %v8136_v6 = vld [vmem:[#allocation7 + $0x494] sm:$0xf]  ;;  %v8154_v5 = vld [vmem:[#allocation8 + $0x220] sm:$0xff] }
 0x561   :  { %v4370_v10 = vpack.c.bf16 %v4368_v58, %v4368_v58  ;;  %4600 = vmatpush.bf16.msra.mxu2 %v7301_v7  ;;  %v7330_v7 = vld [vmem:[#allocation7 + $0x498] sm:$0xf0]  ;;  %v7353_v58 = vor.u32 %v8143_v8, %v7352_v29  ;;  %4761 = vmatpush.bf16.msrb.mxu0 %v8155_v3  ;;  %v8152_v29 = vld [vmem:[#allocation8 + $0x210] sm:$0xff]  ;;  %v8151_v8 = vld [vmem:[#allocation8 + $0x208] sm:$0xff] }
 0x562   :  { %4359 = vmatmul.bf16.vlgmr.msrb.gmra.mxu3 %v8689_v2  ;;  %v7261_v2 = vor.u32 %v8118_v62, %v7258_v22  ;;  %v7333_v38 = vor.u32 %v8136_v6, %v7330_v7  ;;  %v8137_v62 = vld [vmem:[#allocation7 + $0x494] sm:$0xf0]  ;;  %v8162_v6 = vld [vmem:[#allocation8 + $0x260] sm:$0xff]  ;;  %v8199_v3 = vld [vmem:[#allocation10 + $0x108] sm:$0xff] }
 0x563   :  { %v4336_v49 = vpop.f32.mrf.mxu1  ;;  %4580 = vmatmul.bf16.vlgmr.msra.gmra.mxu0 %v4370_v10  ;;  %v8153_v7 = vld [vmem:[#allocation8 + $0x218] sm:$0xff] }
 0x564   :  { %4588 = vmatpush.bf16.msra.mxu1 %v7353_v58  ;;  %v8141_v49 = vld [vmem:[#allocation7 + $0x4b4] sm:$0xf0]  ;;  %v8159_v58 = vld [vmem:[#allocation8 + $0x248] sm:$0xff] }
 0x565   :  { %4601 = vmatpush.bf16.msra.mxu2 %v7293_v24  ;;  %v7322_v24 = vld [vmem:[#allocation7 + $0x488] sm:$0xf0]  ;;  %4762 = vmatpush.bf16.msrb.mxu0 %v8154_v5  ;;  %v8223_v5 = vld [vmem:[%s8759_s8 + $0x4] ss:$0 sm:$0xff] }
 0x568   :  { %4346 = vmatmul.bf16.vlgmr.msrb.gmra.mxu2 %v8669_v27  ;;  %v7373_v27 = vor.u32 %v8146_v25, %v7370_v31  ;;  %v8178_v25 = vld [vmem:[#allocation10 + $0x60] sm:$0xff] }
 0x569   :  { %4602 = vmatpush.bf16.msra.mxu2 %v7285_v16  ;;  %v7345_v16 = vor.u32 %v8141_v49, %v7344_v12  ;;  %v8221_v31 = vld [vmem:[%s8759_s8 + $0x3] ss:$0 sm:$0xff]  ;;  %4763 = vmatpush.bf16.msrb.mxu0 %v8153_v7  ;;  %v8189_v12 = vld [vmem:[#allocation10 + $0xb8] sm:$0xff] }
 0x56a   :  { %4612 = vmatpush.bf16.msra.mxu3 %v7373_v27  ;;  %v8176_v27 = vld [vmem:[#allocation10 + $0x50] sm:$0xff]  ;;  %v8197_v49 = vld [vmem:[#allocation10 + $0xf8] sm:$0xff] }
 0x56b   :  { %4589 = vmatpush.bf16.msra.mxu1 %v7345_v16  ;;  %v8188_v16 = vld [vmem:[#allocation10 + $0xb0] sm:$0xff] }
 0x56d   :  { %4603 = vmatpush.bf16.msra.mxu2 %v7277_v17  ;;  %v8139_v17 = vld [vmem:[#allocation7 + $0x4a4] sm:$0xf0]  ;;  %4764 = vmatpush.bf16.msrb.mxu0 %v8152_v29 }
 0x56e   :  { %4613 = vmatpush.bf16.msra.mxu3 %v7365_v37  ;;  %v7337_v19 = vor.u32 %v8139_v17, %v7336_v56  ;;  %v8187_v56 = vld [vmem:[#allocation10 + $0xa8] sm:$0xff]  ;;  %v8196_v17 = vld [vmem:[#allocation10 + $0xf0] sm:$0xff] }
 0x570   :  { %4590 = vmatpush.bf16.msra.mxu1 %v7337_v19  ;;  %v8195_v19 = vld [vmem:[#allocation10 + $0xe8] sm:$0xff] }
 0x571   :  { %4604 = vmatpush.bf16.msra.mxu2 %v7269_v21  ;;  %v7328_v21 = vld [vmem:[#allocation7 + $0x490] sm:$0xf]  ;;  %4765 = vmatpush.bf16.msrb.mxu0 %v8151_v8 }
 0x572   :  { %4614 = vmatpush.bf16.msra.mxu3 %v7357_v52  ;;  %v7329_v22 = vor.u32 %v8137_v62, %v7328_v21  ;;  %v8185_v21 = vld [vmem:[#allocation10 + $0x98] sm:$0xff]  ;;  %v8194_v62 = vld [vmem:[#allocation10 + $0xe0] sm:$0xff] }
 0x574   :  { %4591 = vmatpush.bf16.msra.mxu1 %v7329_v22  ;;  %v8184_v22 = vld [vmem:[#allocation10 + $0x90] sm:$0xff] }
 0x575   :  { %4605 = vmatpush.bf16.msra.mxu2 %v7261_v2  ;;  %v8179_v2 = vld [vmem:[#allocation10 + $0x68] sm:$0xff] }
 0x576   :  { %4615 = vmatpush.bf16.msra.mxu3 %v7349_v59  ;;  %v2750_v59 = vsel %vm2748_vm5, %v8627_v30, %v2749_v63  ;;  %v8161_v30 = vld [vmem:[#allocation8 + $0x258] sm:$0xff] }
 0x577   :  { %v2751_v13 = vpack.c.bf16 %v2750_v59, %v2750_v59 }
 0x578   :  { %4606 = vmatmul.bf16.vlgmr.msra.gmra.mxu2 %v4370_v10  ;;  %v8134_v10 = vld [vmem:[#allocation7 + $0x484] sm:$0xf] }
 0x579   :  { %5113 = vmatpush.bf16.msrb.mxu2 %v8173_v23  ;;  %v7325_v11 = vor.u32 %v8134_v10, %v7322_v24  ;;  %v7320_v23 = vld [vmem:[#allocation7 + $0x480] sm:$0xf] }
 0x57a   :  { %4616 = vmatpush.bf16.msra.mxu3 %v7341_v46  ;;  %v7321_v60 = vor.u32 %v8135_v51, %v7320_v23  ;;  %v8150_v24 = vld [vmem:[#allocation8 + $0x200] sm:$0xff]  ;;  %v8183_v23 = vld [vmem:[#allocation10 + $0x88] sm:$0xff]  ;;  %v8192_v51 = vld [vmem:[#allocation10 + $0xd0] sm:$0xff] }
 0x57b   :  { %4766 = vmatpush.bf16.msrb.mxu0 %v8150_v24 }
 0x57c   :  { %4592 = vmatpush.bf16.msra.mxu1 %v7321_v60  ;;  %v8182_v60 = vld [vmem:[#allocation10 + $0x80] sm:$0xff] }
 0x57d   :  { %5114 = vmatpush.bf16.msrb.mxu2 %v8172_v26 }
 0x57e   :  { %4617 = vmatpush.bf16.msra.mxu3 %v7333_v38  ;;  %v8160_v38 = vld [vmem:[#allocation8 + $0x250] sm:$0xff] }
 0x57f   :  { %5139 = vmatpush.bf16.msra.mxu0 %v8189_v12 }
 0x580   :  { %4772 = vmatpush.bf16.msrb.mxu1 %v8165_v39 }
 0x581   :  { %5115 = vmatpush.bf16.msrb.mxu2 %v8171_v36  ;;  %v8175_v36 = vld [vmem:[#allocation10 + $0x48] sm:$0xff] }
 0x582   :  { %4618 = vmatpush.bf16.msra.mxu3 %v7325_v11  ;;  %v8158_v11 = vld [vmem:[#allocation8 + $0x240] sm:$0xff] }
 0x583   :  { %5140 = vmatpush.bf16.msra.mxu0 %v8188_v16 }
 0x584   :  { %4773 = vmatpush.bf16.msrb.mxu1 %v8164_v4 }
 0x585   :  { %5116 = vmatpush.bf16.msrb.mxu2 %v8170_v1 }
 0x586   :  { %5126 = vmatpush.bf16.msrb.mxu3 %v8181_v15 }
 0x587   :  { %5141 = vmatpush.bf16.msra.mxu0 %v8187_v56 }
 0x588   :  { %4774 = vmatpush.bf16.msrb.mxu1 %v8163_v28 }
 0x589   :  { %5117 = vmatpush.bf16.msrb.mxu2 %v8169_v40 }
 0x58a   :  { %5127 = vmatpush.bf16.msrb.mxu3 %v8180_v43  ;;  %v8186_v43 = vld [vmem:[#allocation10 + $0xa0] sm:$0xff] }
 0x58b   :  { %5142 = vmatpush.bf16.msra.mxu0 %v8186_v43 }
 0x58c   :  { %4775 = vmatpush.bf16.msrb.mxu1 %v8162_v6 }
 0x58d   :  { %5118 = vmatpush.bf16.msrb.mxu2 %v8168_v14  ;;  %v8174_v14 = vld [vmem:[#allocation10 + $0x40] sm:$0xff] }
 0x58e   :  { %5128 = vmatpush.bf16.msrb.mxu3 %v8179_v2  ;;  %v8193_v2 = vld [vmem:[#allocation10 + $0xd8] sm:$0xff] }
 0x58f   :  { %5143 = vmatpush.bf16.msra.mxu0 %v8185_v21 }
 0x590   :  { %4776 = vmatpush.bf16.msrb.mxu1 %v8161_v30 }
 0x591   :  { %5119 = vmatpush.bf16.msrb.mxu2 %v8167_v41 }
 0x592   :  { %5129 = vmatpush.bf16.msrb.mxu3 %v8178_v25  ;;  %v8191_v25 = vld [vmem:[#allocation10 + $0xc8] sm:$0xff] }
 0x593   :  { %5144 = vmatpush.bf16.msra.mxu0 %v8184_v22 }
 0x594   :  { %4777 = vmatpush.bf16.msrb.mxu1 %v8160_v38 }
 0x595   :  { %5120 = vmatpush.bf16.msrb.mxu2 %v8166_v44 }
 0x596   :  { %5130 = vmatpush.bf16.msrb.mxu3 %v8177_v55  ;;  %v7253_v55 = vld [vmem:[%s8757_s6 + $0x4] ss:$8 sm:$0x3] }
 0x597   :  { %5145 = vmatpush.bf16.msra.mxu0 %v8183_v23 }
 0x598   :  { %5121 = vmatmul.bf16.vlgmr.msrb.gmra.mxu2 %v2072_v47  ;;  %4778 = vmatpush.bf16.msrb.mxu1 %v8159_v58 }
 0x59a   :  { %5131 = vmatpush.bf16.msrb.mxu3 %v8176_v27  ;;  %v8205_v27 = vld [vmem:[#allocation10 + $0x138] sm:$0xff] }
 0x59b   :  { %5146 = vmatpush.bf16.msra.mxu0 %v8182_v60  ;;  %5165 = vmatpush.bf16.msra.mxu2 %v8205_v27 }
 0x59c   :  { %4779 = vmatpush.bf16.msrb.mxu1 %v8158_v11 }
 0x59e   :  { %5132 = vmatpush.bf16.msrb.mxu3 %v8175_v36  ;;  %v8204_v36 = vld [vmem:[#allocation10 + $0x130] sm:$0xff] }
 0x59f   :  { %5166 = vmatpush.bf16.msra.mxu2 %v8204_v36 }
 0x5a2   :  { %5133 = vmatpush.bf16.msrb.mxu3 %v8174_v14 }
 0x5d5   :  { %v4102_v26 = vpop.f32.mrf.mxu3 }
 0x5db   :  { %v4089_v34 = vpop.f32.mrf.mxu2 }
 0x5dc   :  { %v4090_v35 = vadd.f32 %v8221_v31, %v4089_v34  ;;  %v4408_v31 = vperm.slane %v7253_v55, 0 }
 0x5dd   :  { %v4104_v37 = vpop.f32.mrf.mxu3 }
 0x5de   :  { %v8716_v1 = vadd.f32 %v4102_v26, %v4090_v35  ;;  %v8190_v26 = vld [vmem:[#allocation10 + $0xc0] sm:$0xff]  ;;  %v4409_v37 = vperm.slane %v7253_v55, 1 }
 0x5e0   :  { %v8718_v40 = vpop.f32.mrf.mxu0  ;;  %v4107_v63 = vmul.f32 0.01, %v8716_v1  ;;  %vm4106_vm7 = vcmp.gt.f32.partialorder %v8716_v1, 0.0 }
 0x5e1   :  { %v4582_v34 = vadd.f32 %v8718_v40, %v4408_v31 }
 0x5e2   :  { %v4108_v61 = vsel %vm4106_vm7, %v8716_v1, %v4107_v63 }
 0x5e3   :  { %v4091_v41 = vpop.f32.mrf.mxu2  ;;  %v4109_v4 = vpack.c.bf16 %v4108_v61, %v4108_v61 }
 0x5e5   :  { %v4360_v45 = vpop.f32.mrf.mxu3 }
 0x5e8   :  { %v4583_v44 = vpop.f32.mrf.mxu0 }
 0x5eb   :  { %v4347_v47 = vpop.f32.mrf.mxu2 }
 0x5ec   :  { %v4348_v33 = vadd.f32 %v4347_v47, %v4149_v54 }
 0x5ed   :  { %v4362_v48 = vpop.f32.mrf.mxu3 }
 0x5ee   :  { %v4361_v52 = vadd.f32 %v4360_v45, %v4348_v33  ;;  %v8203_v45 = vld [vmem:[#allocation10 + $0x128] sm:$0xff] }
 0x5ef   :  { %5167 = vmatpush.bf16.msra.mxu2 %v8203_v45 }
 0x5f0   :  { %vm4365_vm4 = vcmp.gt.f32.partialorder %v4361_v52, 0.0  ;;  %v4367_v42 = vmul.f32 0.01, %v4361_v52 }
 0x5f2   :  { %v4369_v50 = vsel %vm4365_vm4, %v4361_v52, %v4367_v42  ;;  %v8202_v52 = vld [vmem:[#allocation10 + $0x120] sm:$0xff] }
 0x5f3   :  { %v4371_v53 = vpack.c.bf16 %v4369_v50, %v4369_v50  ;;  %v4349_v9 = vpop.f32.mrf.mxu2  ;;  %5168 = vmatpush.bf16.msra.mxu2 %v8202_v52  ;;  %v8201_v50 = vld [vmem:[#allocation10 + $0x118] sm:$0xff] }
 0x5f4   :  { %v8222_v9 = vld [vmem:[%s8761_s10] ss:$0 sm:$0xff] }
 0x5f5   :  { %4593 = vmatmul.bf16.vlgmr.msra.gmra.mxu1 %v4371_v53  ;;  %4619 = vmatmul.bf16.vlgmr.msra.gmra.mxu3 %v4371_v53  ;;  %v3428_v53 = vmul.f32 0.01, %v8675_v18 }
 0x5f6   :  { %5152 = vmatpush.bf16.msra.mxu1 %v8197_v49 }
 0x5f7   :  { %5169 = vmatpush.bf16.msra.mxu2 %v8201_v50 }
 0x5fa   :  { %5153 = vmatpush.bf16.msra.mxu1 %v8196_v17 }
 0x5fb   :  { %v8721_v57 = vpop.f32.mrf.mxu2 }
 0x5fc   :  { %v4608_v44 = vadd.f32 %v8721_v57, %v4409_v37  ;;  %v3429_v57 = vsel %vm3427_vm6, %v8675_v18, %v3428_v53  ;;  %v8198_v18 = vld [vmem:[#allocation10 + $0x100] sm:$0xff] }
 0x5fd   :  { %v3430_v59 = vpack.c.bf16 %v3429_v57, %v3429_v57 }
 0x5fe   :  { %5154 = vmatpush.bf16.msra.mxu1 %v8195_v19 }
 0x602   :  { %5155 = vmatpush.bf16.msra.mxu1 %v8194_v62 }
 0x603   :  { %v4609_v46 = vpop.f32.mrf.mxu2 }
 0x604   :  { %v8200_v46 = vld [vmem:[#allocation10 + $0x110] sm:$0xff] }
 0x605   :  { %5134 = vmatmul.bf16.vlgmr.msrb.gmra.mxu3 %v2751_v13  ;;  %5170 = vmatpush.bf16.msra.mxu2 %v8200_v46 }
 0x606   :  { %5156 = vmatpush.bf16.msra.mxu1 %v8193_v2 }
 0x609   :  { %5171 = vmatpush.bf16.msra.mxu2 %v8199_v3 }
 0x60a   :  { %5157 = vmatpush.bf16.msra.mxu1 %v8192_v51 }
 0x60d   :  { %5172 = vmatpush.bf16.msra.mxu2 %v8198_v18 }
 0x60e   :  { %5158 = vmatpush.bf16.msra.mxu1 %v8191_v25 }
 0x612   :  { %5159 = vmatpush.bf16.msra.mxu1 %v8190_v26 }
 0x61b   :  { %v8726_v10 = vpop.f32.mrf.mxu2 }
 0x623   :  { %v5124_v15 = vpop.f32.mrf.mxu2 }
 0x672   :  { %v4594_v35 = vpop.f32.mrf.mxu1 }
 0x673   :  { %v4595_v14 = vadd.f32 %v4594_v35, %v4582_v34 }
 0x675   :  { %v4624_v41 = vadd.f32 %v4595_v14, %v8665_v20 }
 0x677   :  { %v4626_v54 = vpack.c.bf16 %v4624_v41, %v4624_v41 }
 0x678   :  { %v4620_v47 = vpop.f32.mrf.mxu3 }
 0x679   :  { %v4621_v33 = vadd.f32 %v4620_v47, %v4608_v44  ;;  %4767 = vmatmul.bf16.vlgmr.msrb.gmra.mxu0 %v4626_v54 }
 0x67a   :  { %v4596_v48 = vpop.f32.mrf.mxu1 }
 0x67b   :  { %v4625_v40 = vadd.f32 %v4621_v33, %v8685_v0  ;;  %v5123_v0 = vadd.f32 %v8222_v9, %v8726_v10 }
 0x67d   :  { %v4627_v42 = vpack.c.bf16 %v4625_v40, %v4625_v40 }
 0x67f   :  { %4780 = vmatmul.bf16.vlgmr.msrb.gmra.mxu1 %v4627_v42 }
 0x680   :  { %v4622_v20 = vpop.f32.mrf.mxu3 }
 0x688   :  { %v5135_v32 = vpop.f32.mrf.mxu3 }
 0x689   :  { %v5136_v39 = vadd.f32 %v5135_v32, %v5123_v0  ;;  %5147 = vmatmul.bf16.vlgmr.msra.gmra.mxu0 %v3430_v59 }
 0x68f   :  { %5160 = vmatmul.bf16.vlgmr.msra.gmra.mxu1 %v4109_v4 }
 0x690   :  { %v5137_v13 = vpop.f32.mrf.mxu3 }
 0x6f6   :  { %v4768_v28 = vpop.f32.mrf.mxu0 }
 0x6f7   :  { %v4769_v6 = vadd.f32 %v8223_v5, %v4768_v28 }
 0x6fc   :  { %v4781_v7 = vpop.f32.mrf.mxu1 }
 0x6fd   :  { %v4782_v30 = vadd.f32 %v4781_v7, %v4769_v6 }
 0x6fe   :  { %v4770_v29 = vpop.f32.mrf.mxu0 }
 0x6ff   :  { %vm4785_vm8 = vcmp.gt.f32.partialorder %v4782_v30, 0.0  ;;  %v4786_v1 = vmul.f32 0.01, %v4782_v30 }
 0x701   :  { %v4787_v38 = vsel %vm4785_vm8, %v4782_v30, %v4786_v1 }
 0x702   :  { %v4788_v8 = vpack.c.bf16 %v4787_v38, %v4787_v38 }
 0x704   :  { %v4783_v58 = vpop.f32.mrf.mxu1  ;;  %5173 = vmatmul.bf16.vlgmr.msra.gmra.mxu2 %v4788_v8 }
 0x706   :  { %v5148_v10 = vpop.f32.mrf.mxu0 }
 0x707   :  { %v5149_v24 = vadd.f32 %v5148_v10, %v5136_v39 }
 0x70c   :  { %v5161_v11 = vpop.f32.mrf.mxu1 }
 0x70d   :  { %v5162_v12 = vadd.f32 %v5161_v11, %v5149_v24 }
 0x70e   :  { %v5150_v49 = vpop.f32.mrf.mxu0 }
 0x714   :  { %v5163_v16 = vpop.f32.mrf.mxu1 }
 0x787   :  { %v5174_v15 = vpop.f32.mrf.mxu2 }
 0x788   :  { %v5175_v56 = vadd.f32 %v5174_v15, %v5162_v12 }
 0x78a   :  { %5178 = vst [vmem:[#allocation11] sm:$0xff] %v5175_v56 }
 0x78b   :  { %5189 = dma.vmem_to_hbm [thread:$0]  %s5185_s12, 128, %s5187_s14, [#allocation4]  }
 0x78f   :  { %v5176_v17 = vpop.f32.mrf.mxu2 }
 0x790   :  { %8374 = dma.done.wait [#allocation4], 128  }
 0x791   :  { %8375 = vsyncadd [#allocation4], 4294967168 }
 0x792   :  { %5194 = vsyncpa [#allocation3], 1 }
 0x793   :  { %5195 = vsyncpa [#allocation6], 1 }
 0x794   :  { %5196 = vsyncpa [#allocation9], 1 }
 0x795   :  { %5197 = vsyncpa [#allocation4], 1 }

</bundles_post_ra>
